<compile_context>
chip_gen: v7x
topology: tpu7x:2x2x1
jax: 0.10.0
libtpu: 0.0.40
codegen_flags: <defaults>
</compile_context>

<pallas_src>
import functools

import jax
import jax.numpy as jnp
from jax.experimental import pallas as pl
from jax.experimental.pallas import tpu as pltpu


# ---------------------------------------------------------------------------
# Fused Pallas kernel: L LSTM layers + 2-layer MLP classifier
# ---------------------------------------------------------------------------
def _lstm03d_kernel(L, T, Bp, H, *refs):
    """refs = inputs..., outputs..., scratch...

    inputs  : x_flat (T*Bp, Din) bf16,
              [wih4_l (4, Din_l, H) bf16, whh4_l (4, H, H) bf16,
               bias4_l (4, 1, H) f32] * L,
              h0 (L, Bp, H) f32, c0 (L, Bp, H) f32,
              w1_t (H, Hc) bf16, b1 (1, Hc) f32, w2_t (Hc, C) bf16, b2 (1, C) f32
    outputs : out (Bp, C) f32, hn (L, Bp, H) f32, cn (L, Bp, H) f32
    scratch : gbuf_i/f/g/o (T*Bp, H) f32, ybuf (T*Bp, H) f32

    Gate order is PyTorch's (i, f, g, o) along the stacked leading axis; every
    gate lives in its own lane-aligned (T*Bp, H) pane, so the serial recurrence
    never slices at lane offsets H/2H/3H (no XLU rotates on the h->h path).
    """
    n_in = 1 + 3 * L + 2 + 4
    x_ref = refs[0]
    layer_refs = refs[1:1 + 3 * L]
    h0_ref = refs[1 + 3 * L]
    c0_ref = refs[2 + 3 * L]
    w1_ref, b1_ref, w2_ref, b2_ref = refs[3 + 3 * L:n_in]
    out_ref, hn_ref, cn_ref = refs[n_in:n_in + 3]
    gbufs = refs[n_in + 3:n_in + 7]          # (i, f, g, o) gate panes, f32
    ybuf = refs[n_in + 7]                    # single in-place layer-output slab

    h_fin = None
    for l in range(L):                       # static layer loop (trace time)
        wih_ref = layer_refs[3 * l]          # (4, Din_l, H) bf16, pre-transposed
        whh_ref = layer_refs[3 * l + 1]      # (4, H, H)     bf16, pre-transposed
        bias_ref = layer_refs[3 * l + 2]     # (4, 1, H)     f32,  b_ih + b_hh

        # ---- hoisted input projection (off the serial path): one bulk bf16
        #      MXU matmul per gate, f32 accumulate, bias folded in ------------
        if l == 0:
            x_in = x_ref[...]                                # bf16
        else:
            # previous layer's slab; dead after this load -> ybuf reused below
            x_in = ybuf[...].astype(jnp.bfloat16)
        for k in range(4):
            gbufs[k][...] = (
                jnp.dot(x_in, wih_ref[k], preferred_element_type=jnp.float32)
                + bias_ref[k])

        # recurrent weights hoisted out of the time loop (loaded once per layer)
        whh_i = whh_ref[0]
        whh_f = whh_ref[1]
        whh_g = whh_ref[2]
        whh_o = whh_ref[3]

        is_last = (l == L - 1)

        # ---- serial recurrence: four lane-aligned (Bp,H)@(H,H) bf16 matmuls
        #      + f32 gate elementwise math per step ---------------------------
        def step(t, carry, whh_i=whh_i, whh_f=whh_f, whh_g=whh_g, whh_o=whh_o,
                 is_last=is_last):
            h, c = carry
            row = pl.multiple_of(t * Bp, Bp)       # 8-aligned sublane offset
            hb = h.astype(jnp.bfloat16)            # MXU operands in bf16
            pre_i = gbufs[0][pl.ds(row, Bp), :] + jnp.dot(
                hb, whh_i, preferred_element_type=jnp.float32)
            pre_f = gbufs[1][pl.ds(row, Bp), :] + jnp.dot(
                hb, whh_f, preferred_element_type=jnp.float32)
            pre_g = gbufs[2][pl.ds(row, Bp), :] + jnp.dot(
                hb, whh_g, preferred_element_type=jnp.float32)
            pre_o = gbufs[3][pl.ds(row, Bp), :] + jnp.dot(
                hb, whh_o, preferred_element_type=jnp.float32)
            i_t = jax.nn.sigmoid(pre_i)            # f32 gate math (v5e-safe)
            f_t = jax.nn.sigmoid(pre_f)
            o_t = jax.nn.sigmoid(pre_o)
            g_t = jnp.tanh(pre_g)
            c_new = f_t * c + i_t * g_t
            h_new = o_t * jnp.tanh(c_new)
            if not is_last:                        # next layer's input slab
                ybuf[pl.ds(row, Bp), :] = h_new
            return h_new, c_new

        h_fin, c_fin = jax.lax.fori_loop(
            0, T, step, (h0_ref[l], c0_ref[l]), unroll=min(T, 8))

        hn_ref[l] = h_fin
        cn_ref[l] = c_fin

    # ---- classifier: Linear(H,Hc) -> ReLU -> Linear(Hc,C) on final hidden ---
    z = jnp.dot(h_fin.astype(jnp.bfloat16), w1_ref[...],
                preferred_element_type=jnp.float32) + b1_ref[...]
    z = jnp.maximum(z, 0.0)
    out_ref[...] = jnp.dot(z.astype(jnp.bfloat16), w2_ref[...],
                           preferred_element_type=jnp.float32) + b2_ref[...]


# ---------------------------------------------------------------------------
# Wrapper
# ---------------------------------------------------------------------------
_VMEM_SPEC = pl.BlockSpec(memory_space=pltpu.MemorySpace.VMEM)


def _prep_lstm_layer(p, H):
    """Split PyTorch's (i,f,g,o)-stacked weights into per-gate lane-aligned
    panes, pre-transpose for `x @ W^T`, fold the two bias vectors, and cast the
    MXU operands to bf16.  All done once, in XLA, outside the kernel."""
    din = p["w_ih"].shape[1]
    wih4 = jnp.transpose(p["w_ih"].reshape(4, H, din), (0, 2, 1)).astype(jnp.bfloat16)
    whh4 = jnp.transpose(p["w_hh"].reshape(4, H, H), (0, 2, 1)).astype(jnp.bfloat16)
    bias4 = (p["b_ih"] + p["b_hh"]).reshape(4, 1, H).astype(jnp.float32)
    return wih4, whh4, bias4


def lstm03d_forward(params, x, h_0=None, c_0=None, *, rand_key=None):
    B, T, Din = x.shape
    L = len(params["lstm"])
    H = params["lstm"][0]["w_hh"].shape[1]
    C = params["cls"]["w2"].shape[0]

    if (h_0 is None) != (c_0 is None):
        raise ValueError("h_0 and c_0 must be provided together (or both None).")
    if h_0 is None:
        # PyTorch: torch.rand(num_layers, B, H) -> U[0,1). Distribution parity
        # only (not bit-identical to a seeded torch run).
        if rand_key is None:
            rand_key = jax.random.PRNGKey(0)
        kh, kc = jax.random.split(rand_key)
        h_0 = jax.random.uniform(kh, (L, B, H), dtype=jnp.float32)
        c_0 = jax.random.uniform(kc, (L, B, H), dtype=jnp.float32)

    # Pad batch to a full sublane (8) so per-step slices are aligned and
    # (Bp, H) tiles are store-dense. Padded rows are discarded afterwards.
    Bp = max(8, ((B + 7) // 8) * 8)

    # time-major + flat (T*Bp, Din) layout, built once in XLA outside the kernel
    x_tm = jnp.transpose(x, (1, 0, 2)).astype(jnp.float32)          # (T, B, Din)
    x_tm = jnp.pad(x_tm, ((0, 0), (0, Bp - B), (0, 0)))
    x_flat = x_tm.reshape(T * Bp, Din).astype(jnp.bfloat16)

    h0p = jnp.pad(h_0.astype(jnp.float32), ((0, 0), (0, Bp - B), (0, 0)))
    c0p = jnp.pad(c_0.astype(jnp.float32), ((0, 0), (0, Bp - B), (0, 0)))

    layer_args = []
    for p in params["lstm"]:
        layer_args.extend(_prep_lstm_layer(p, H))

    cls = params["cls"]
    w1_t = cls["w1"].T.astype(jnp.bfloat16)                         # (H, Hc)
    b1 = cls["b1"].reshape(1, -1).astype(jnp.float32)
    w2_t = cls["w2"].T.astype(jnp.bfloat16)                         # (Hc, C)
    b2 = cls["b2"].reshape(1, -1).astype(jnp.float32)

    n_in = 1 + 3 * L + 2 + 4
    kernel = functools.partial(_lstm03d_kernel, L, T, Bp, H)
    out_shapes = (
        jax.ShapeDtypeStruct((Bp, C), jnp.float32),                 # results
        jax.ShapeDtypeStruct((L, Bp, H), jnp.float32),              # h_n
        jax.ShapeDtypeStruct((L, Bp, H), jnp.float32),              # c_n
    )
    results_p, hn_p, cn_p = pl.pallas_call(
        kernel,
        out_shape=out_shapes,
        in_specs=[_VMEM_SPEC] * n_in,
        out_specs=(_VMEM_SPEC, _VMEM_SPEC, _VMEM_SPEC),
        scratch_shapes=[
            pltpu.VMEM((T * Bp, H), jnp.float32),   # gate pane i  (x@W_ii + b)
            pltpu.VMEM((T * Bp, H), jnp.float32),   # gate pane f
            pltpu.VMEM((T * Bp, H), jnp.float32),   # gate pane g
            pltpu.VMEM((T * Bp, H), jnp.float32),   # gate pane o
            pltpu.VMEM((T * Bp, H), jnp.float32),   # layer output slab (in-place)
        ],
    )(x_flat, *layer_args, h0p, c0p, w1_t, b1, w2_t, b2)

    # strip batch padding
    return results_p[:B], hn_p[:, :B, :], cn_p[:, :B, :]


# ---------------------------------------------------------------------------
# Deterministic parameter initialization (mirrors nn.LSTM / nn.Linear shapes)
# ---------------------------------------------------------------------------
def init_params(key, nb_classes, input_size, hidden_lstm, hidden_cls, num_layers):
    params = {"lstm": [], "cls": {}}
    k = 1.0 / jnp.sqrt(hidden_lstm)

    def u(key, shape, bound):
        return jax.random.uniform(key, shape, jnp.float32, -bound, bound)

    for l in range(num_layers):
        din = input_size if l == 0 else hidden_lstm
        key, k1, k2, k3, k4 = jax.random.split(key, 5)
        params["lstm"].append({
            "w_ih": u(k1, (4 * hidden_lstm, din), k),
            "w_hh": u(k2, (4 * hidden_lstm, hidden_lstm), k),
            "b_ih": u(k3, (4 * hidden_lstm,), k),
            "b_hh": u(k4, (4 * hidden_lstm,), k),
        })

    key, k1, k2, k3, k4 = jax.random.split(key, 5)
    k_l1 = 1.0 / jnp.sqrt(hidden_lstm)
    k_l2 = 1.0 / jnp.sqrt(hidden_cls)
    params["cls"] = {
        "w1": u(k1, (hidden_cls, hidden_lstm), k_l1),
        "b1": u(k2, (hidden_cls,), k_l1),
        "w2": u(k3, (nb_classes, hidden_cls), k_l2),
        "b2": u(k4, (nb_classes,), k_l2),
    }
    return params


# ---------------------------------------------------------------------------
if __name__ == "__main__":
    # Small, module-consistent shapes.
    B, T = 2, 8
    INPUT_SIZE = 16
    HIDDEN_LSTM = 32
    HIDDEN_CLS = 32
    NB_CLASSES = 4
    NUM_LAYERS = 2

    root = jax.random.PRNGKey(0)
    k_param, k_x, k_state = jax.random.split(root, 3)

    params = init_params(k_param, NB_CLASSES, INPUT_SIZE,
                         HIDDEN_LSTM, HIDDEN_CLS, NUM_LAYERS)
    x = jax.random.normal(k_x, (B, T, INPUT_SIZE), dtype=jnp.float32)

    fwd = jax.jit(functools.partial(lstm03d_forward, params))
    results, h_n, c_n = fwd(x, rand_key=k_state)
    jax.block_until_ready((results, h_n, c_n))

    assert results.shape == (B, NB_CLASSES)
    assert h_n.shape == (NUM_LAYERS, B, HIDDEN_LSTM)
    assert c_n.shape == (NUM_LAYERS, B, HIDDEN_LSTM)
    assert bool(jnp.isfinite(results).all())
    assert bool(jnp.isfinite(h_n).all()) and bool(jnp.isfinite(c_n).all())
    print("KERNEL_OK")
</pallas_src>

<mosaic_0001>
module attributes {stable_mosaic.version = 11 : i64} {
  func.func @_lstm03d_kernel(%arg0: memref<64x16xbf16, #tpu.memory_space<vmem>>, %arg1: memref<4x16x32xbf16, #tpu.memory_space<vmem>>, %arg2: memref<4x32x32xbf16, #tpu.memory_space<vmem>>, %arg3: memref<4x1x32xf32, #tpu.memory_space<vmem>>, %arg4: memref<4x32x32xbf16, #tpu.memory_space<vmem>>, %arg5: memref<4x32x32xbf16, #tpu.memory_space<vmem>>, %arg6: memref<4x1x32xf32, #tpu.memory_space<vmem>>, %arg7: memref<2x8x32xf32, #tpu.memory_space<vmem>>, %arg8: memref<2x8x32xf32, #tpu.memory_space<vmem>>, %arg9: memref<32x32xbf16, #tpu.memory_space<vmem>>, %arg10: memref<1x32xf32, #tpu.memory_space<vmem>>, %arg11: memref<32x4xbf16, #tpu.memory_space<vmem>>, %arg12: memref<1x4xf32, #tpu.memory_space<vmem>>, %arg13: memref<8x4xf32, #tpu.memory_space<vmem>>, %arg14: memref<2x8x32xf32, #tpu.memory_space<vmem>>, %arg15: memref<2x8x32xf32, #tpu.memory_space<vmem>>, %arg16: memref<64x32xf32, #tpu.memory_space<vmem>>, %arg17: memref<64x32xf32, #tpu.memory_space<vmem>>, %arg18: memref<64x32xf32, #tpu.memory_space<vmem>>, %arg19: memref<64x32xf32, #tpu.memory_space<vmem>>, %arg20: memref<64x32xf32, #tpu.memory_space<vmem>>) attributes {dimension_semantics = [], scalar_prefetch = 0 : i64, scratch_operands = 5 : i64, tpu.core_type = #tpu.core_type<tc>} {
    %c0 = arith.constant 0 : index
    %c0_0 = arith.constant 0 : index
    %0 = vector.load %arg0[%c0, %c0_0] : memref<64x16xbf16, #tpu.memory_space<vmem>>, vector<64x16xbf16>
    %c0_1 = arith.constant 0 : index
    %c0_2 = arith.constant 0 : index
    %c0_3 = arith.constant 0 : index
    %1 = vector.load %arg1[%c0_1, %c0_2, %c0_3] : memref<4x16x32xbf16, #tpu.memory_space<vmem>>, vector<1x16x32xbf16>
    %2 = vector.shape_cast %1 : vector<1x16x32xbf16> to vector<16x32xbf16>
    %cst = arith.constant dense<0.000000e+00> : vector<64x32xf32>
    %3 = tpu.matmul %0, %2, %cst {dimension_numbers = #tpu.dot_dimension_numbers<[1], [0], [0], [1], [0, 0, 1, 1], [], []>} : vector<64x16xbf16>, vector<16x32xbf16>, vector<64x32xf32> -> vector<64x32xf32>
    %c0_4 = arith.constant 0 : index
    %c0_5 = arith.constant 0 : index
    %c0_6 = arith.constant 0 : index
    %4 = vector.load %arg3[%c0_4, %c0_5, %c0_6] : memref<4x1x32xf32, #tpu.memory_space<vmem>>, vector<1x1x32xf32>
    %5 = vector.shape_cast %4 : vector<1x1x32xf32> to vector<1x32xf32>
    %6 = vector.broadcast %5 : vector<1x32xf32> to vector<64x32xf32>
    %7 = arith.addf %3, %6 : vector<64x32xf32>
    %c0_7 = arith.constant 0 : index
    %c0_8 = arith.constant 0 : index
    %8 = vector.load %arg16[%c0_7, %c0_8] : memref<64x32xf32, #tpu.memory_space<vmem>>, vector<64x32xf32>
    tpu.vector_store %arg16[%c0_7, %c0_8], %7 {strides = array<i32>} : memref<64x32xf32, #tpu.memory_space<vmem>>, vector<64x32xf32>,
    %c1 = arith.constant 1 : index
    %c0_9 = arith.constant 0 : index
    %c0_10 = arith.constant 0 : index
    %9 = vector.load %arg1[%c1, %c0_9, %c0_10] : memref<4x16x32xbf16, #tpu.memory_space<vmem>>, vector<1x16x32xbf16>
    %10 = vector.shape_cast %9 : vector<1x16x32xbf16> to vector<16x32xbf16>
    %cst_11 = arith.constant dense<0.000000e+00> : vector<64x32xf32>
    %11 = tpu.matmul %0, %10, %cst_11 {dimension_numbers = #tpu.dot_dimension_numbers<[1], [0], [0], [1], [0, 0, 1, 1], [], []>} : vector<64x16xbf16>, vector<16x32xbf16>, vector<64x32xf32> -> vector<64x32xf32>
    %c1_12 = arith.constant 1 : index
    %c0_13 = arith.constant 0 : index
    %c0_14 = arith.constant 0 : index
    %12 = vector.load %arg3[%c1_12, %c0_13, %c0_14] : memref<4x1x32xf32, #tpu.memory_space<vmem>>, vector<1x1x32xf32>
    %13 = vector.shape_cast %12 : vector<1x1x32xf32> to vector<1x32xf32>
    %14 = vector.broadcast %13 : vector<1x32xf32> to vector<64x32xf32>
    %15 = arith.addf %11, %14 : vector<64x32xf32>
    %c0_15 = arith.constant 0 : index
    %c0_16 = arith.constant 0 : index
    %16 = vector.load %arg17[%c0_15, %c0_16] : memref<64x32xf32, #tpu.memory_space<vmem>>, vector<64x32xf32>
    tpu.vector_store %arg17[%c0_15, %c0_16], %15 {strides = array<i32>} : memref<64x32xf32, #tpu.memory_space<vmem>>, vector<64x32xf32>,
    %c2 = arith.constant 2 : index
    %c0_17 = arith.constant 0 : index
    %c0_18 = arith.constant 0 : index
    %17 = vector.load %arg1[%c2, %c0_17, %c0_18] : memref<4x16x32xbf16, #tpu.memory_space<vmem>>, vector<1x16x32xbf16>
    %18 = vector.shape_cast %17 : vector<1x16x32xbf16> to vector<16x32xbf16>
    %cst_19 = arith.constant dense<0.000000e+00> : vector<64x32xf32>
    %19 = tpu.matmul %0, %18, %cst_19 {dimension_numbers = #tpu.dot_dimension_numbers<[1], [0], [0], [1], [0, 0, 1, 1], [], []>} : vector<64x16xbf16>, vector<16x32xbf16>, vector<64x32xf32> -> vector<64x32xf32>
    %c2_20 = arith.constant 2 : index
    %c0_21 = arith.constant 0 : index
    %c0_22 = arith.constant 0 : index
    %20 = vector.load %arg3[%c2_20, %c0_21, %c0_22] : memref<4x1x32xf32, #tpu.memory_space<vmem>>, vector<1x1x32xf32>
    %21 = vector.shape_cast %20 : vector<1x1x32xf32> to vector<1x32xf32>
    %22 = vector.broadcast %21 : vector<1x32xf32> to vector<64x32xf32>
    %23 = arith.addf %19, %22 : vector<64x32xf32>
    %c0_23 = arith.constant 0 : index
    %c0_24 = arith.constant 0 : index
    %24 = vector.load %arg18[%c0_23, %c0_24] : memref<64x32xf32, #tpu.memory_space<vmem>>, vector<64x32xf32>
    tpu.vector_store %arg18[%c0_23, %c0_24], %23 {strides = array<i32>} : memref<64x32xf32, #tpu.memory_space<vmem>>, vector<64x32xf32>,
    %c3 = arith.constant 3 : index
    %c0_25 = arith.constant 0 : index
    %c0_26 = arith.constant 0 : index
    %25 = vector.load %arg1[%c3, %c0_25, %c0_26] : memref<4x16x32xbf16, #tpu.memory_space<vmem>>, vector<1x16x32xbf16>
    %26 = vector.shape_cast %25 : vector<1x16x32xbf16> to vector<16x32xbf16>
    %cst_27 = arith.constant dense<0.000000e+00> : vector<64x32xf32>
    %27 = tpu.matmul %0, %26, %cst_27 {dimension_numbers = #tpu.dot_dimension_numbers<[1], [0], [0], [1], [0, 0, 1, 1], [], []>} : vector<64x16xbf16>, vector<16x32xbf16>, vector<64x32xf32> -> vector<64x32xf32>
    %c3_28 = arith.constant 3 : index
    %c0_29 = arith.constant 0 : index
    %c0_30 = arith.constant 0 : index
    %28 = vector.load %arg3[%c3_28, %c0_29, %c0_30] : memref<4x1x32xf32, #tpu.memory_space<vmem>>, vector<1x1x32xf32>
    %29 = vector.shape_cast %28 : vector<1x1x32xf32> to vector<1x32xf32>
    %30 = vector.broadcast %29 : vector<1x32xf32> to vector<64x32xf32>
    %31 = arith.addf %27, %30 : vector<64x32xf32>
    %c0_31 = arith.constant 0 : index
    %c0_32 = arith.constant 0 : index
    %32 = vector.load %arg19[%c0_31, %c0_32] : memref<64x32xf32, #tpu.memory_space<vmem>>, vector<64x32xf32>
    tpu.vector_store %arg19[%c0_31, %c0_32], %31 {strides = array<i32>} : memref<64x32xf32, #tpu.memory_space<vmem>>, vector<64x32xf32>,
    %c0_33 = arith.constant 0 : index
    %c0_34 = arith.constant 0 : index
    %c0_35 = arith.constant 0 : index
    %33 = vector.load %arg2[%c0_33, %c0_34, %c0_35] : memref<4x32x32xbf16, #tpu.memory_space<vmem>>, vector<1x32x32xbf16>
    %34 = vector.shape_cast %33 : vector<1x32x32xbf16> to vector<32x32xbf16>
    %c1_36 = arith.constant 1 : index
    %c0_37 = arith.constant 0 : index
    %c0_38 = arith.constant 0 : index
    %35 = vector.load %arg2[%c1_36, %c0_37, %c0_38] : memref<4x32x32xbf16, #tpu.memory_space<vmem>>, vector<1x32x32xbf16>
    %36 = vector.shape_cast %35 : vector<1x32x32xbf16> to vector<32x32xbf16>
    %c2_39 = arith.constant 2 : index
    %c0_40 = arith.constant 0 : index
    %c0_41 = arith.constant 0 : index
    %37 = vector.load %arg2[%c2_39, %c0_40, %c0_41] : memref<4x32x32xbf16, #tpu.memory_space<vmem>>, vector<1x32x32xbf16>
    %38 = vector.shape_cast %37 : vector<1x32x32xbf16> to vector<32x32xbf16>
    %c3_42 = arith.constant 3 : index
    %c0_43 = arith.constant 0 : index
    %c0_44 = arith.constant 0 : index
    %39 = vector.load %arg2[%c3_42, %c0_43, %c0_44] : memref<4x32x32xbf16, #tpu.memory_space<vmem>>, vector<1x32x32xbf16>
    %40 = vector.shape_cast %39 : vector<1x32x32xbf16> to vector<32x32xbf16>
    %c0_45 = arith.constant 0 : index
    %c0_46 = arith.constant 0 : index
    %c0_47 = arith.constant 0 : index
    %41 = vector.load %arg7[%c0_45, %c0_46, %c0_47] : memref<2x8x32xf32, #tpu.memory_space<vmem>>, vector<1x8x32xf32>
    %42 = vector.shape_cast %41 : vector<1x8x32xf32> to vector<8x32xf32>
    %c0_48 = arith.constant 0 : index
    %c0_49 = arith.constant 0 : index
    %c0_50 = arith.constant 0 : index
    %43 = vector.load %arg8[%c0_48, %c0_49, %c0_50] : memref<2x8x32xf32, #tpu.memory_space<vmem>>, vector<1x8x32xf32>
    %44 = vector.shape_cast %43 : vector<1x8x32xf32> to vector<8x32xf32>
    %c0_i32 = arith.constant 0 : i32
    %c8_i32 = arith.constant 8 : i32
    %45 = arith.muli %c0_i32, %c8_i32 : i32
    %46 = tpu.assume_multiple %45, 8 : i32
    %47 = arith.truncf %42 : vector<8x32xf32> to vector<8x32xbf16>
    %48 = arith.index_cast %46 : i32 to index
    %c0_51 = arith.constant 0 : index
    %49 = vector.load %arg16[%48, %c0_51] : memref<64x32xf32, #tpu.memory_space<vmem>>, vector<8x32xf32>
    %cst_52 = arith.constant dense<0.000000e+00> : vector<8x32xf32>
    %50 = tpu.matmul %47, %34, %cst_52 {dimension_numbers = #tpu.dot_dimension_numbers<[1], [0], [0], [1], [0, 0, 1, 1], [], []>} : vector<8x32xbf16>, vector<32x32xbf16>, vector<8x32xf32> -> vector<8x32xf32>
    %51 = arith.addf %49, %50 : vector<8x32xf32>
    %52 = arith.index_cast %46 : i32 to index
    %c0_53 = arith.constant 0 : index
    %53 = vector.load %arg17[%52, %c0_53] : memref<64x32xf32, #tpu.memory_space<vmem>>, vector<8x32xf32>
    %cst_54 = arith.constant dense<0.000000e+00> : vector<8x32xf32>
    %54 = tpu.matmul %47, %36, %cst_54 {dimension_numbers = #tpu.dot_dimension_numbers<[1], [0], [0], [1], [0, 0, 1, 1], [], []>} : vector<8x32xbf16>, vector<32x32xbf16>, vector<8x32xf32> -> vector<8x32xf32>
    %55 = arith.addf %53, %54 : vector<8x32xf32>
    %56 = arith.index_cast %46 : i32 to index
    %c0_55 = arith.constant 0 : index
    %57 = vector.load %arg18[%56, %c0_55] : memref<64x32xf32, #tpu.memory_space<vmem>>, vector<8x32xf32>
    %cst_56 = arith.constant dense<0.000000e+00> : vector<8x32xf32>
    %58 = tpu.matmul %47, %38, %cst_56 {dimension_numbers = #tpu.dot_dimension_numbers<[1], [0], [0], [1], [0, 0, 1, 1], [], []>} : vector<8x32xbf16>, vector<32x32xbf16>, vector<8x32xf32> -> vector<8x32xf32>
    %59 = arith.addf %57, %58 : vector<8x32xf32>
    %60 = arith.index_cast %46 : i32 to index
    %c0_57 = arith.constant 0 : index
    %61 = vector.load %arg19[%60, %c0_57] : memref<64x32xf32, #tpu.memory_space<vmem>>, vector<8x32xf32>
    %cst_58 = arith.constant dense<0.000000e+00> : vector<8x32xf32>
    %62 = tpu.matmul %47, %40, %cst_58 {dimension_numbers = #tpu.dot_dimension_numbers<[1], [0], [0], [1], [0, 0, 1, 1], [], []>} : vector<8x32xbf16>, vector<32x32xbf16>, vector<8x32xf32> -> vector<8x32xf32>
    %63 = arith.addf %61, %62 : vector<8x32xf32>
    %64 = arith.negf %51 : vector<8x32xf32>
    %65 = math.exp %64 : vector<8x32xf32>
    %cst_59 = arith.constant 1.000000e+00 : f32
    %66 = vector.broadcast %cst_59 : f32 to vector<8x32xf32>
    %67 = arith.addf %66, %65 : vector<8x32xf32>
    %68 = arith.divf %66, %67 : vector<8x32xf32>
    %69 = arith.negf %55 : vector<8x32xf32>
    %70 = math.exp %69 : vector<8x32xf32>
    %cst_60 = arith.constant 1.000000e+00 : f32
    %71 = vector.broadcast %cst_60 : f32 to vector<8x32xf32>
    %72 = arith.addf %71, %70 : vector<8x32xf32>
    %73 = arith.divf %71, %72 : vector<8x32xf32>
    %74 = arith.negf %63 : vector<8x32xf32>
    %75 = math.exp %74 : vector<8x32xf32>
    %cst_61 = arith.constant 1.000000e+00 : f32
    %76 = vector.broadcast %cst_61 : f32 to vector<8x32xf32>
    %77 = arith.addf %76, %75 : vector<8x32xf32>
    %78 = arith.divf %76, %77 : vector<8x32xf32>
    %79 = math.tanh %59 : vector<8x32xf32>
    %80 = arith.mulf %73, %44 : vector<8x32xf32>
    %81 = arith.mulf %68, %79 : vector<8x32xf32>
    %82 = arith.addf %80, %81 : vector<8x32xf32>
    %83 = math.tanh %82 : vector<8x32xf32>
    %84 = arith.mulf %78, %83 : vector<8x32xf32>
    %85 = arith.index_cast %46 : i32 to index
    %c0_62 = arith.constant 0 : index
    %86 = vector.load %arg20[%85, %c0_62] : memref<64x32xf32, #tpu.memory_space<vmem>>, vector<8x32xf32>
    tpu.vector_store %arg20[%85, %c0_62], %84 {strides = array<i32>} : memref<64x32xf32, #tpu.memory_space<vmem>>, vector<8x32xf32>,
    %c1_i32 = arith.constant 1 : i32
    %c8_i32_63 = arith.constant 8 : i32
    %87 = arith.muli %c1_i32, %c8_i32_63 : i32
    %88 = tpu.assume_multiple %87, 8 : i32
    %89 = arith.truncf %84 : vector<8x32xf32> to vector<8x32xbf16>
    %90 = arith.index_cast %88 : i32 to index
    %c0_64 = arith.constant 0 : index
    %91 = vector.load %arg16[%90, %c0_64] : memref<64x32xf32, #tpu.memory_space<vmem>>, vector<8x32xf32>
    %cst_65 = arith.constant dense<0.000000e+00> : vector<8x32xf32>
    %92 = tpu.matmul %89, %34, %cst_65 {dimension_numbers = #tpu.dot_dimension_numbers<[1], [0], [0], [1], [0, 0, 1, 1], [], []>} : vector<8x32xbf16>, vector<32x32xbf16>, vector<8x32xf32> -> vector<8x32xf32>
    %93 = arith.addf %91, %92 : vector<8x32xf32>
    %94 = arith.index_cast %88 : i32 to index
    %c0_66 = arith.constant 0 : index
    %95 = vector.load %arg17[%94, %c0_66] : memref<64x32xf32, #tpu.memory_space<vmem>>, vector<8x32xf32>
    %cst_67 = arith.constant dense<0.000000e+00> : vector<8x32xf32>
    %96 = tpu.matmul %89, %36, %cst_67 {dimension_numbers = #tpu.dot_dimension_numbers<[1], [0], [0], [1], [0, 0, 1, 1], [], []>} : vector<8x32xbf16>, vector<32x32xbf16>, vector<8x32xf32> -> vector<8x32xf32>
    %97 = arith.addf %95, %96 : vector<8x32xf32>
    %98 = arith.index_cast %88 : i32 to index
    %c0_68 = arith.constant 0 : index
    %99 = vector.load %arg18[%98, %c0_68] : memref<64x32xf32, #tpu.memory_space<vmem>>, vector<8x32xf32>
    %cst_69 = arith.constant dense<0.000000e+00> : vector<8x32xf32>
    %100 = tpu.matmul %89, %38, %cst_69 {dimension_numbers = #tpu.dot_dimension_numbers<[1], [0], [0], [1], [0, 0, 1, 1], [], []>} : vector<8x32xbf16>, vector<32x32xbf16>, vector<8x32xf32> -> vector<8x32xf32>
    %101 = arith.addf %99, %100 : vector<8x32xf32>
    %102 = arith.index_cast %88 : i32 to index
    %c0_70 = arith.constant 0 : index
    %103 = vector.load %arg19[%102, %c0_70] : memref<64x32xf32, #tpu.memory_space<vmem>>, vector<8x32xf32>
    %cst_71 = arith.constant dense<0.000000e+00> : vector<8x32xf32>
    %104 = tpu.matmul %89, %40, %cst_71 {dimension_numbers = #tpu.dot_dimension_numbers<[1], [0], [0], [1], [0, 0, 1, 1], [], []>} : vector<8x32xbf16>, vector<32x32xbf16>, vector<8x32xf32> -> vector<8x32xf32>
    %105 = arith.addf %103, %104 : vector<8x32xf32>
    %106 = arith.negf %93 : vector<8x32xf32>
    %107 = math.exp %106 : vector<8x32xf32>
    %cst_72 = arith.constant 1.000000e+00 : f32
    %108 = vector.broadcast %cst_72 : f32 to vector<8x32xf32>
    %109 = arith.addf %108, %107 : vector<8x32xf32>
    %110 = arith.divf %108, %109 : vector<8x32xf32>
    %111 = arith.negf %97 : vector<8x32xf32>
    %112 = math.exp %111 : vector<8x32xf32>
    %cst_73 = arith.constant 1.000000e+00 : f32
    %113 = vector.broadcast %cst_73 : f32 to vector<8x32xf32>
    %114 = arith.addf %113, %112 : vector<8x32xf32>
    %115 = arith.divf %113, %114 : vector<8x32xf32>
    %116 = arith.negf %105 : vector<8x32xf32>
    %117 = math.exp %116 : vector<8x32xf32>
    %cst_74 = arith.constant 1.000000e+00 : f32
    %118 = vector.broadcast %cst_74 : f32 to vector<8x32xf32>
    %119 = arith.addf %118, %117 : vector<8x32xf32>
    %120 = arith.divf %118, %119 : vector<8x32xf32>
    %121 = math.tanh %101 : vector<8x32xf32>
    %122 = arith.mulf %115, %82 : vector<8x32xf32>
    %123 = arith.mulf %110, %121 : vector<8x32xf32>
    %124 = arith.addf %122, %123 : vector<8x32xf32>
    %125 = math.tanh %124 : vector<8x32xf32>
    %126 = arith.mulf %120, %125 : vector<8x32xf32>
    %127 = arith.index_cast %88 : i32 to index
    %c0_75 = arith.constant 0 : index
    %128 = vector.load %arg20[%127, %c0_75] : memref<64x32xf32, #tpu.memory_space<vmem>>, vector<8x32xf32>
    tpu.vector_store %arg20[%127, %c0_75], %126 {strides = array<i32>} : memref<64x32xf32, #tpu.memory_space<vmem>>, vector<8x32xf32>,
    %c2_i32 = arith.constant 2 : i32
    %c8_i32_76 = arith.constant 8 : i32
    %129 = arith.muli %c2_i32, %c8_i32_76 : i32
    %130 = tpu.assume_multiple %129, 8 : i32
    %131 = arith.truncf %126 : vector<8x32xf32> to vector<8x32xbf16>
    %132 = arith.index_cast %130 : i32 to index
    %c0_77 = arith.constant 0 : index
    %133 = vector.load %arg16[%132, %c0_77] : memref<64x32xf32, #tpu.memory_space<vmem>>, vector<8x32xf32>
    %cst_78 = arith.constant dense<0.000000e+00> : vector<8x32xf32>
    %134 = tpu.matmul %131, %34, %cst_78 {dimension_numbers = #tpu.dot_dimension_numbers<[1], [0], [0], [1], [0, 0, 1, 1], [], []>} : vector<8x32xbf16>, vector<32x32xbf16>, vector<8x32xf32> -> vector<8x32xf32>
    %135 = arith.addf %133, %134 : vector<8x32xf32>
    %136 = arith.index_cast %130 : i32 to index
    %c0_79 = arith.constant 0 : index
    %137 = vector.load %arg17[%136, %c0_79] : memref<64x32xf32, #tpu.memory_space<vmem>>, vector<8x32xf32>
    %cst_80 = arith.constant dense<0.000000e+00> : vector<8x32xf32>
    %138 = tpu.matmul %131, %36, %cst_80 {dimension_numbers = #tpu.dot_dimension_numbers<[1], [0], [0], [1], [0, 0, 1, 1], [], []>} : vector<8x32xbf16>, vector<32x32xbf16>, vector<8x32xf32> -> vector<8x32xf32>
    %139 = arith.addf %137, %138 : vector<8x32xf32>
    %140 = arith.index_cast %130 : i32 to index
    %c0_81 = arith.constant 0 : index
    %141 = vector.load %arg18[%140, %c0_81] : memref<64x32xf32, #tpu.memory_space<vmem>>, vector<8x32xf32>
    %cst_82 = arith.constant dense<0.000000e+00> : vector<8x32xf32>
    %142 = tpu.matmul %131, %38, %cst_82 {dimension_numbers = #tpu.dot_dimension_numbers<[1], [0], [0], [1], [0, 0, 1, 1], [], []>} : vector<8x32xbf16>, vector<32x32xbf16>, vector<8x32xf32> -> vector<8x32xf32>
    %143 = arith.addf %141, %142 : vector<8x32xf32>
    %144 = arith.index_cast %130 : i32 to index
    %c0_83 = arith.constant 0 : index
    %145 = vector.load %arg19[%144, %c0_83] : memref<64x32xf32, #tpu.memory_space<vmem>>, vector<8x32xf32>
    %cst_84 = arith.constant dense<0.000000e+00> : vector<8x32xf32>
    %146 = tpu.matmul %131, %40, %cst_84 {dimension_numbers = #tpu.dot_dimension_numbers<[1], [0], [0], [1], [0, 0, 1, 1], [], []>} : vector<8x32xbf16>, vector<32x32xbf16>, vector<8x32xf32> -> vector<8x32xf32>
    %147 = arith.addf %145, %146 : vector<8x32xf32>
    %148 = arith.negf %135 : vector<8x32xf32>
    %149 = math.exp %148 : vector<8x32xf32>
    %cst_85 = arith.constant 1.000000e+00 : f32
    %150 = vector.broadcast %cst_85 : f32 to vector<8x32xf32>
    %151 = arith.addf %150, %149 : vector<8x32xf32>
    %152 = arith.divf %150, %151 : vector<8x32xf32>
    %153 = arith.negf %139 : vector<8x32xf32>
    %154 = math.exp %153 : vector<8x32xf32>
    %cst_86 = arith.constant 1.000000e+00 : f32
    %155 = vector.broadcast %cst_86 : f32 to vector<8x32xf32>
    %156 = arith.addf %155, %154 : vector<8x32xf32>
    %157 = arith.divf %155, %156 : vector<8x32xf32>
    %158 = arith.negf %147 : vector<8x32xf32>
    %159 = math.exp %158 : vector<8x32xf32>
    %cst_87 = arith.constant 1.000000e+00 : f32
    %160 = vector.broadcast %cst_87 : f32 to vector<8x32xf32>
    %161 = arith.addf %160, %159 : vector<8x32xf32>
    %162 = arith.divf %160, %161 : vector<8x32xf32>
    %163 = math.tanh %143 : vector<8x32xf32>
    %164 = arith.mulf %157, %124 : vector<8x32xf32>
    %165 = arith.mulf %152, %163 : vector<8x32xf32>
    %166 = arith.addf %164, %165 : vector<8x32xf32>
    %167 = math.tanh %166 : vector<8x32xf32>
    %168 = arith.mulf %162, %167 : vector<8x32xf32>
    %169 = arith.index_cast %130 : i32 to index
    %c0_88 = arith.constant 0 : index
    %170 = vector.load %arg20[%169, %c0_88] : memref<64x32xf32, #tpu.memory_space<vmem>>, vector<8x32xf32>
    tpu.vector_store %arg20[%169, %c0_88], %168 {strides = array<i32>} : memref<64x32xf32, #tpu.memory_space<vmem>>, vector<8x32xf32>,
    %c3_i32 = arith.constant 3 : i32
    %c8_i32_89 = arith.constant 8 : i32
    %171 = arith.muli %c3_i32, %c8_i32_89 : i32
    %172 = tpu.assume_multiple %171, 8 : i32
    %173 = arith.truncf %168 : vector<8x32xf32> to vector<8x32xbf16>
    %174 = arith.index_cast %172 : i32 to index
    %c0_90 = arith.constant 0 : index
    %175 = vector.load %arg16[%174, %c0_90] : memref<64x32xf32, #tpu.memory_space<vmem>>, vector<8x32xf32>
    %cst_91 = arith.constant dense<0.000000e+00> : vector<8x32xf32>
    %176 = tpu.matmul %173, %34, %cst_91 {dimension_numbers = #tpu.dot_dimension_numbers<[1], [0], [0], [1], [0, 0, 1, 1], [], []>} : vector<8x32xbf16>, vector<32x32xbf16>, vector<8x32xf32> -> vector<8x32xf32>
    %177 = arith.addf %175, %176 : vector<8x32xf32>
    %178 = arith.index_cast %172 : i32 to index
    %c0_92 = arith.constant 0 : index
    %179 = vector.load %arg17[%178, %c0_92] : memref<64x32xf32, #tpu.memory_space<vmem>>, vector<8x32xf32>
    %cst_93 = arith.constant dense<0.000000e+00> : vector<8x32xf32>
    %180 = tpu.matmul %173, %36, %cst_93 {dimension_numbers = #tpu.dot_dimension_numbers<[1], [0], [0], [1], [0, 0, 1, 1], [], []>} : vector<8x32xbf16>, vector<32x32xbf16>, vector<8x32xf32> -> vector<8x32xf32>
    %181 = arith.addf %179, %180 : vector<8x32xf32>
    %182 = arith.index_cast %172 : i32 to index
    %c0_94 = arith.constant 0 : index
    %183 = vector.load %arg18[%182, %c0_94] : memref<64x32xf32, #tpu.memory_space<vmem>>, vector<8x32xf32>
    %cst_95 = arith.constant dense<0.000000e+00> : vector<8x32xf32>
    %184 = tpu.matmul %173, %38, %cst_95 {dimension_numbers = #tpu.dot_dimension_numbers<[1], [0], [0], [1], [0, 0, 1, 1], [], []>} : vector<8x32xbf16>, vector<32x32xbf16>, vector<8x32xf32> -> vector<8x32xf32>
    %185 = arith.addf %183, %184 : vector<8x32xf32>
    %186 = arith.index_cast %172 : i32 to index
    %c0_96 = arith.constant 0 : index
    %187 = vector.load %arg19[%186, %c0_96] : memref<64x32xf32, #tpu.memory_space<vmem>>, vector<8x32xf32>
    %cst_97 = arith.constant dense<0.000000e+00> : vector<8x32xf32>
    %188 = tpu.matmul %173, %40, %cst_97 {dimension_numbers = #tpu.dot_dimension_numbers<[1], [0], [0], [1], [0, 0, 1, 1], [], []>} : vector<8x32xbf16>, vector<32x32xbf16>, vector<8x32xf32> -> vector<8x32xf32>
    %189 = arith.addf %187, %188 : vector<8x32xf32>
    %190 = arith.negf %177 : vector<8x32xf32>
    %191 = math.exp %190 : vector<8x32xf32>
    %cst_98 = arith.constant 1.000000e+00 : f32
    %192 = vector.broadcast %cst_98 : f32 to vector<8x32xf32>
    %193 = arith.addf %192, %191 : vector<8x32xf32>
    %194 = arith.divf %192, %193 : vector<8x32xf32>
    %195 = arith.negf %181 : vector<8x32xf32>
    %196 = math.exp %195 : vector<8x32xf32>
    %cst_99 = arith.constant 1.000000e+00 : f32
    %197 = vector.broadcast %cst_99 : f32 to vector<8x32xf32>
    %198 = arith.addf %197, %196 : vector<8x32xf32>
    %199 = arith.divf %197, %198 : vector<8x32xf32>
    %200 = arith.negf %189 : vector<8x32xf32>
    %201 = math.exp %200 : vector<8x32xf32>
    %cst_100 = arith.constant 1.000000e+00 : f32
    %202 = vector.broadcast %cst_100 : f32 to vector<8x32xf32>
    %203 = arith.addf %202, %201 : vector<8x32xf32>
    %204 = arith.divf %202, %203 : vector<8x32xf32>
    %205 = math.tanh %185 : vector<8x32xf32>
    %206 = arith.mulf %199, %166 : vector<8x32xf32>
    %207 = arith.mulf %194, %205 : vector<8x32xf32>
    %208 = arith.addf %206, %207 : vector<8x32xf32>
    %209 = math.tanh %208 : vector<8x32xf32>
    %210 = arith.mulf %204, %209 : vector<8x32xf32>
    %211 = arith.index_cast %172 : i32 to index
    %c0_101 = arith.constant 0 : index
    %212 = vector.load %arg20[%211, %c0_101] : memref<64x32xf32, #tpu.memory_space<vmem>>, vector<8x32xf32>
    tpu.vector_store %arg20[%211, %c0_101], %210 {strides = array<i32>} : memref<64x32xf32, #tpu.memory_space<vmem>>, vector<8x32xf32>,
    %c4_i32 = arith.constant 4 : i32
    %c8_i32_102 = arith.constant 8 : i32
    %213 = arith.muli %c4_i32, %c8_i32_102 : i32
    %214 = tpu.assume_multiple %213, 8 : i32
    %215 = arith.truncf %210 : vector<8x32xf32> to vector<8x32xbf16>
    %216 = arith.index_cast %214 : i32 to index
    %c0_103 = arith.constant 0 : index
    %217 = vector.load %arg16[%216, %c0_103] : memref<64x32xf32, #tpu.memory_space<vmem>>, vector<8x32xf32>
    %cst_104 = arith.constant dense<0.000000e+00> : vector<8x32xf32>
    %218 = tpu.matmul %215, %34, %cst_104 {dimension_numbers = #tpu.dot_dimension_numbers<[1], [0], [0], [1], [0, 0, 1, 1], [], []>} : vector<8x32xbf16>, vector<32x32xbf16>, vector<8x32xf32> -> vector<8x32xf32>
    %219 = arith.addf %217, %218 : vector<8x32xf32>
    %220 = arith.index_cast %214 : i32 to index
    %c0_105 = arith.constant 0 : index
    %221 = vector.load %arg17[%220, %c0_105] : memref<64x32xf32, #tpu.memory_space<vmem>>, vector<8x32xf32>
    %cst_106 = arith.constant dense<0.000000e+00> : vector<8x32xf32>
    %222 = tpu.matmul %215, %36, %cst_106 {dimension_numbers = #tpu.dot_dimension_numbers<[1], [0], [0], [1], [0, 0, 1, 1], [], []>} : vector<8x32xbf16>, vector<32x32xbf16>, vector<8x32xf32> -> vector<8x32xf32>
    %223 = arith.addf %221, %222 : vector<8x32xf32>
    %224 = arith.index_cast %214 : i32 to index
    %c0_107 = arith.constant 0 : index
    %225 = vector.load %arg18[%224, %c0_107] : memref<64x32xf32, #tpu.memory_space<vmem>>, vector<8x32xf32>
    %cst_108 = arith.constant dense<0.000000e+00> : vector<8x32xf32>
    %226 = tpu.matmul %215, %38, %cst_108 {dimension_numbers = #tpu.dot_dimension_numbers<[1], [0], [0], [1], [0, 0, 1, 1], [], []>} : vector<8x32xbf16>, vector<32x32xbf16>, vector<8x32xf32> -> vector<8x32xf32>
    %227 = arith.addf %225, %226 : vector<8x32xf32>
    %228 = arith.index_cast %214 : i32 to index
    %c0_109 = arith.constant 0 : index
    %229 = vector.load %arg19[%228, %c0_109] : memref<64x32xf32, #tpu.memory_space<vmem>>, vector<8x32xf32>
    %cst_110 = arith.constant dense<0.000000e+00> : vector<8x32xf32>
    %230 = tpu.matmul %215, %40, %cst_110 {dimension_numbers = #tpu.dot_dimension_numbers<[1], [0], [0], [1], [0, 0, 1, 1], [], []>} : vector<8x32xbf16>, vector<32x32xbf16>, vector<8x32xf32> -> vector<8x32xf32>
    %231 = arith.addf %229, %230 : vector<8x32xf32>
    %232 = arith.negf %219 : vector<8x32xf32>
    %233 = math.exp %232 : vector<8x32xf32>
    %cst_111 = arith.constant 1.000000e+00 : f32
    %234 = vector.broadcast %cst_111 : f32 to vector<8x32xf32>
    %235 = arith.addf %234, %233 : vector<8x32xf32>
    %236 = arith.divf %234, %235 : vector<8x32xf32>
    %237 = arith.negf %223 : vector<8x32xf32>
    %238 = math.exp %237 : vector<8x32xf32>
    %cst_112 = arith.constant 1.000000e+00 : f32
    %239 = vector.broadcast %cst_112 : f32 to vector<8x32xf32>
    %240 = arith.addf %239, %238 : vector<8x32xf32>
    %241 = arith.divf %239, %240 : vector<8x32xf32>
    %242 = arith.negf %231 : vector<8x32xf32>
    %243 = math.exp %242 : vector<8x32xf32>
    %cst_113 = arith.constant 1.000000e+00 : f32
    %244 = vector.broadcast %cst_113 : f32 to vector<8x32xf32>
    %245 = arith.addf %244, %243 : vector<8x32xf32>
    %246 = arith.divf %244, %245 : vector<8x32xf32>
    %247 = math.tanh %227 : vector<8x32xf32>
    %248 = arith.mulf %241, %208 : vector<8x32xf32>
    %249 = arith.mulf %236, %247 : vector<8x32xf32>
    %250 = arith.addf %248, %249 : vector<8x32xf32>
    %251 = math.tanh %250 : vector<8x32xf32>
    %252 = arith.mulf %246, %251 : vector<8x32xf32>
    %253 = arith.index_cast %214 : i32 to index
    %c0_114 = arith.constant 0 : index
    %254 = vector.load %arg20[%253, %c0_114] : memref<64x32xf32, #tpu.memory_space<vmem>>, vector<8x32xf32>
    tpu.vector_store %arg20[%253, %c0_114], %252 {strides = array<i32>} : memref<64x32xf32, #tpu.memory_space<vmem>>, vector<8x32xf32>,
    %c5_i32 = arith.constant 5 : i32
    %c8_i32_115 = arith.constant 8 : i32
    %255 = arith.muli %c5_i32, %c8_i32_115 : i32
    %256 = tpu.assume_multiple %255, 8 : i32
    %257 = arith.truncf %252 : vector<8x32xf32> to vector<8x32xbf16>
    %258 = arith.index_cast %256 : i32 to index
    %c0_116 = arith.constant 0 : index
    %259 = vector.load %arg16[%258, %c0_116] : memref<64x32xf32, #tpu.memory_space<vmem>>, vector<8x32xf32>
    %cst_117 = arith.constant dense<0.000000e+00> : vector<8x32xf32>
    %260 = tpu.matmul %257, %34, %cst_117 {dimension_numbers = #tpu.dot_dimension_numbers<[1], [0], [0], [1], [0, 0, 1, 1], [], []>} : vector<8x32xbf16>, vector<32x32xbf16>, vector<8x32xf32> -> vector<8x32xf32>
    %261 = arith.addf %259, %260 : vector<8x32xf32>
    %262 = arith.index_cast %256 : i32 to index
    %c0_118 = arith.constant 0 : index
    %263 = vector.load %arg17[%262, %c0_118] : memref<64x32xf32, #tpu.memory_space<vmem>>, vector<8x32xf32>
    %cst_119 = arith.constant dense<0.000000e+00> : vector<8x32xf32>
    %264 = tpu.matmul %257, %36, %cst_119 {dimension_numbers = #tpu.dot_dimension_numbers<[1], [0], [0], [1], [0, 0, 1, 1], [], []>} : vector<8x32xbf16>, vector<32x32xbf16>, vector<8x32xf32> -> vector<8x32xf32>
    %265 = arith.addf %263, %264 : vector<8x32xf32>
    %266 = arith.index_cast %256 : i32 to index
    %c0_120 = arith.constant 0 : index
    %267 = vector.load %arg18[%266, %c0_120] : memref<64x32xf32, #tpu.memory_space<vmem>>, vector<8x32xf32>
    %cst_121 = arith.constant dense<0.000000e+00> : vector<8x32xf32>
    %268 = tpu.matmul %257, %38, %cst_121 {dimension_numbers = #tpu.dot_dimension_numbers<[1], [0], [0], [1], [0, 0, 1, 1], [], []>} : vector<8x32xbf16>, vector<32x32xbf16>, vector<8x32xf32> -> vector<8x32xf32>
    %269 = arith.addf %267, %268 : vector<8x32xf32>
    %270 = arith.index_cast %256 : i32 to index
    %c0_122 = arith.constant 0 : index
    %271 = vector.load %arg19[%270, %c0_122] : memref<64x32xf32, #tpu.memory_space<vmem>>, vector<8x32xf32>
    %cst_123 = arith.constant dense<0.000000e+00> : vector<8x32xf32>
    %272 = tpu.matmul %257, %40, %cst_123 {dimension_numbers = #tpu.dot_dimension_numbers<[1], [0], [0], [1], [0, 0, 1, 1], [], []>} : vector<8x32xbf16>, vector<32x32xbf16>, vector<8x32xf32> -> vector<8x32xf32>
    %273 = arith.addf %271, %272 : vector<8x32xf32>
    %274 = arith.negf %261 : vector<8x32xf32>
    %275 = math.exp %274 : vector<8x32xf32>
    %cst_124 = arith.constant 1.000000e+00 : f32
    %276 = vector.broadcast %cst_124 : f32 to vector<8x32xf32>
    %277 = arith.addf %276, %275 : vector<8x32xf32>
    %278 = arith.divf %276, %277 : vector<8x32xf32>
    %279 = arith.negf %265 : vector<8x32xf32>
    %280 = math.exp %279 : vector<8x32xf32>
    %cst_125 = arith.constant 1.000000e+00 : f32
    %281 = vector.broadcast %cst_125 : f32 to vector<8x32xf32>
    %282 = arith.addf %281, %280 : vector<8x32xf32>
    %283 = arith.divf %281, %282 : vector<8x32xf32>
    %284 = arith.negf %273 : vector<8x32xf32>
    %285 = math.exp %284 : vector<8x32xf32>
    %cst_126 = arith.constant 1.000000e+00 : f32
    %286 = vector.broadcast %cst_126 : f32 to vector<8x32xf32>
    %287 = arith.addf %286, %285 : vector<8x32xf32>
    %288 = arith.divf %286, %287 : vector<8x32xf32>
    %289 = math.tanh %269 : vector<8x32xf32>
    %290 = arith.mulf %283, %250 : vector<8x32xf32>
    %291 = arith.mulf %278, %289 : vector<8x32xf32>
    %292 = arith.addf %290, %291 : vector<8x32xf32>
    %293 = math.tanh %292 : vector<8x32xf32>
    %294 = arith.mulf %288, %293 : vector<8x32xf32>
    %295 = arith.index_cast %256 : i32 to index
    %c0_127 = arith.constant 0 : index
    %296 = vector.load %arg20[%295, %c0_127] : memref<64x32xf32, #tpu.memory_space<vmem>>, vector<8x32xf32>
    tpu.vector_store %arg20[%295, %c0_127], %294 {strides = array<i32>} : memref<64x32xf32, #tpu.memory_space<vmem>>, vector<8x32xf32>,
    %c6_i32 = arith.constant 6 : i32
    %c8_i32_128 = arith.constant 8 : i32
    %297 = arith.muli %c6_i32, %c8_i32_128 : i32
    %298 = tpu.assume_multiple %297, 8 : i32
    %299 = arith.truncf %294 : vector<8x32xf32> to vector<8x32xbf16>
    %300 = arith.index_cast %298 : i32 to index
    %c0_129 = arith.constant 0 : index
    %301 = vector.load %arg16[%300, %c0_129] : memref<64x32xf32, #tpu.memory_space<vmem>>, vector<8x32xf32>
    %cst_130 = arith.constant dense<0.000000e+00> : vector<8x32xf32>
    %302 = tpu.matmul %299, %34, %cst_130 {dimension_numbers = #tpu.dot_dimension_numbers<[1], [0], [0], [1], [0, 0, 1, 1], [], []>} : vector<8x32xbf16>, vector<32x32xbf16>, vector<8x32xf32> -> vector<8x32xf32>
    %303 = arith.addf %301, %302 : vector<8x32xf32>
    %304 = arith.index_cast %298 : i32 to index
    %c0_131 = arith.constant 0 : index
    %305 = vector.load %arg17[%304, %c0_131] : memref<64x32xf32, #tpu.memory_space<vmem>>, vector<8x32xf32>
    %cst_132 = arith.constant dense<0.000000e+00> : vector<8x32xf32>
    %306 = tpu.matmul %299, %36, %cst_132 {dimension_numbers = #tpu.dot_dimension_numbers<[1], [0], [0], [1], [0, 0, 1, 1], [], []>} : vector<8x32xbf16>, vector<32x32xbf16>, vector<8x32xf32> -> vector<8x32xf32>
    %307 = arith.addf %305, %306 : vector<8x32xf32>
    %308 = arith.index_cast %298 : i32 to index
    %c0_133 = arith.constant 0 : index
    %309 = vector.load %arg18[%308, %c0_133] : memref<64x32xf32, #tpu.memory_space<vmem>>, vector<8x32xf32>
    %cst_134 = arith.constant dense<0.000000e+00> : vector<8x32xf32>
    %310 = tpu.matmul %299, %38, %cst_134 {dimension_numbers = #tpu.dot_dimension_numbers<[1], [0], [0], [1], [0, 0, 1, 1], [], []>} : vector<8x32xbf16>, vector<32x32xbf16>, vector<8x32xf32> -> vector<8x32xf32>
    %311 = arith.addf %309, %310 : vector<8x32xf32>
    %312 = arith.index_cast %298 : i32 to index
    %c0_135 = arith.constant 0 : index
    %313 = vector.load %arg19[%312, %c0_135] : memref<64x32xf32, #tpu.memory_space<vmem>>, vector<8x32xf32>
    %cst_136 = arith.constant dense<0.000000e+00> : vector<8x32xf32>
    %314 = tpu.matmul %299, %40, %cst_136 {dimension_numbers = #tpu.dot_dimension_numbers<[1], [0], [0], [1], [0, 0, 1, 1], [], []>} : vector<8x32xbf16>, vector<32x32xbf16>, vector<8x32xf32> -> vector<8x32xf32>
    %315 = arith.addf %313, %314 : vector<8x32xf32>
    %316 = arith.negf %303 : vector<8x32xf32>
    %317 = math.exp %316 : vector<8x32xf32>
    %cst_137 = arith.constant 1.000000e+00 : f32
    %318 = vector.broadcast %cst_137 : f32 to vector<8x32xf32>
    %319 = arith.addf %318, %317 : vector<8x32xf32>
    %320 = arith.divf %318, %319 : vector<8x32xf32>
    %321 = arith.negf %307 : vector<8x32xf32>
    %322 = math.exp %321 : vector<8x32xf32>
    %cst_138 = arith.constant 1.000000e+00 : f32
    %323 = vector.broadcast %cst_138 : f32 to vector<8x32xf32>
    %324 = arith.addf %323, %322 : vector<8x32xf32>
    %325 = arith.divf %323, %324 : vector<8x32xf32>
    %326 = arith.negf %315 : vector<8x32xf32>
    %327 = math.exp %326 : vector<8x32xf32>
    %cst_139 = arith.constant 1.000000e+00 : f32
    %328 = vector.broadcast %cst_139 : f32 to vector<8x32xf32>
    %329 = arith.addf %328, %327 : vector<8x32xf32>
    %330 = arith.divf %328, %329 : vector<8x32xf32>
    %331 = math.tanh %311 : vector<8x32xf32>
    %332 = arith.mulf %325, %292 : vector<8x32xf32>
    %333 = arith.mulf %320, %331 : vector<8x32xf32>
    %334 = arith.addf %332, %333 : vector<8x32xf32>
    %335 = math.tanh %334 : vector<8x32xf32>
    %336 = arith.mulf %330, %335 : vector<8x32xf32>
    %337 = arith.index_cast %298 : i32 to index
    %c0_140 = arith.constant 0 : index
    %338 = vector.load %arg20[%337, %c0_140] : memref<64x32xf32, #tpu.memory_space<vmem>>, vector<8x32xf32>
    tpu.vector_store %arg20[%337, %c0_140], %336 {strides = array<i32>} : memref<64x32xf32, #tpu.memory_space<vmem>>, vector<8x32xf32>,
    %c7_i32 = arith.constant 7 : i32
    %c8_i32_141 = arith.constant 8 : i32
    %339 = arith.muli %c7_i32, %c8_i32_141 : i32
    %340 = tpu.assume_multiple %339, 8 : i32
    %341 = arith.truncf %336 : vector<8x32xf32> to vector<8x32xbf16>
    %342 = arith.index_cast %340 : i32 to index
    %c0_142 = arith.constant 0 : index
    %343 = vector.load %arg16[%342, %c0_142] : memref<64x32xf32, #tpu.memory_space<vmem>>, vector<8x32xf32>
    %cst_143 = arith.constant dense<0.000000e+00> : vector<8x32xf32>
    %344 = tpu.matmul %341, %34, %cst_143 {dimension_numbers = #tpu.dot_dimension_numbers<[1], [0], [0], [1], [0, 0, 1, 1], [], []>} : vector<8x32xbf16>, vector<32x32xbf16>, vector<8x32xf32> -> vector<8x32xf32>
    %345 = arith.addf %343, %344 : vector<8x32xf32>
    %346 = arith.index_cast %340 : i32 to index
    %c0_144 = arith.constant 0 : index
    %347 = vector.load %arg17[%346, %c0_144] : memref<64x32xf32, #tpu.memory_space<vmem>>, vector<8x32xf32>
    %cst_145 = arith.constant dense<0.000000e+00> : vector<8x32xf32>
    %348 = tpu.matmul %341, %36, %cst_145 {dimension_numbers = #tpu.dot_dimension_numbers<[1], [0], [0], [1], [0, 0, 1, 1], [], []>} : vector<8x32xbf16>, vector<32x32xbf16>, vector<8x32xf32> -> vector<8x32xf32>
    %349 = arith.addf %347, %348 : vector<8x32xf32>
    %350 = arith.index_cast %340 : i32 to index
    %c0_146 = arith.constant 0 : index
    %351 = vector.load %arg18[%350, %c0_146] : memref<64x32xf32, #tpu.memory_space<vmem>>, vector<8x32xf32>
    %cst_147 = arith.constant dense<0.000000e+00> : vector<8x32xf32>
    %352 = tpu.matmul %341, %38, %cst_147 {dimension_numbers = #tpu.dot_dimension_numbers<[1], [0], [0], [1], [0, 0, 1, 1], [], []>} : vector<8x32xbf16>, vector<32x32xbf16>, vector<8x32xf32> -> vector<8x32xf32>
    %353 = arith.addf %351, %352 : vector<8x32xf32>
    %354 = arith.index_cast %340 : i32 to index
    %c0_148 = arith.constant 0 : index
    %355 = vector.load %arg19[%354, %c0_148] : memref<64x32xf32, #tpu.memory_space<vmem>>, vector<8x32xf32>
    %cst_149 = arith.constant dense<0.000000e+00> : vector<8x32xf32>
    %356 = tpu.matmul %341, %40, %cst_149 {dimension_numbers = #tpu.dot_dimension_numbers<[1], [0], [0], [1], [0, 0, 1, 1], [], []>} : vector<8x32xbf16>, vector<32x32xbf16>, vector<8x32xf32> -> vector<8x32xf32>
    %357 = arith.addf %355, %356 : vector<8x32xf32>
    %358 = arith.negf %345 : vector<8x32xf32>
    %359 = math.exp %358 : vector<8x32xf32>
    %cst_150 = arith.constant 1.000000e+00 : f32
    %360 = vector.broadcast %cst_150 : f32 to vector<8x32xf32>
    %361 = arith.addf %360, %359 : vector<8x32xf32>
    %362 = arith.divf %360, %361 : vector<8x32xf32>
    %363 = arith.negf %349 : vector<8x32xf32>
    %364 = math.exp %363 : vector<8x32xf32>
    %cst_151 = arith.constant 1.000000e+00 : f32
    %365 = vector.broadcast %cst_151 : f32 to vector<8x32xf32>
    %366 = arith.addf %365, %364 : vector<8x32xf32>
    %367 = arith.divf %365, %366 : vector<8x32xf32>
    %368 = arith.negf %357 : vector<8x32xf32>
    %369 = math.exp %368 : vector<8x32xf32>
    %cst_152 = arith.constant 1.000000e+00 : f32
    %370 = vector.broadcast %cst_152 : f32 to vector<8x32xf32>
    %371 = arith.addf %370, %369 : vector<8x32xf32>
    %372 = arith.divf %370, %371 : vector<8x32xf32>
    %373 = math.tanh %353 : vector<8x32xf32>
    %374 = arith.mulf %367, %334 : vector<8x32xf32>
    %375 = arith.mulf %362, %373 : vector<8x32xf32>
    %376 = arith.addf %374, %375 : vector<8x32xf32>
    %377 = math.tanh %376 : vector<8x32xf32>
    %378 = arith.mulf %372, %377 : vector<8x32xf32>
    %379 = arith.index_cast %340 : i32 to index
    %c0_153 = arith.constant 0 : index
    %380 = vector.load %arg20[%379, %c0_153] : memref<64x32xf32, #tpu.memory_space<vmem>>, vector<8x32xf32>
    tpu.vector_store %arg20[%379, %c0_153], %378 {strides = array<i32>} : memref<64x32xf32, #tpu.memory_space<vmem>>, vector<8x32xf32>,
    %c8_i32_154 = arith.constant 8 : i32
    %c0_155 = arith.constant 0 : index
    %c0_156 = arith.constant 0 : index
    %c0_157 = arith.constant 0 : index
    %381 = vector.load %arg14[%c0_155, %c0_156, %c0_157] : memref<2x8x32xf32, #tpu.memory_space<vmem>>, vector<1x8x32xf32>
    %382 = vector.shape_cast %381 : vector<1x8x32xf32> to vector<8x32xf32>
    %383 = vector.shape_cast %378 : vector<8x32xf32> to vector<1x8x32xf32>
    tpu.vector_store %arg14[%c0_155, %c0_156, %c0_157], %383 {strides = array<i32>} : memref<2x8x32xf32, #tpu.memory_space<vmem>>, vector<1x8x32xf32>,
    %c0_158 = arith.constant 0 : index
    %c0_159 = arith.constant 0 : index
    %c0_160 = arith.constant 0 : index
    %384 = vector.load %arg15[%c0_158, %c0_159, %c0_160] : memref<2x8x32xf32, #tpu.memory_space<vmem>>, vector<1x8x32xf32>
    %385 = vector.shape_cast %384 : vector<1x8x32xf32> to vector<8x32xf32>
    %386 = vector.shape_cast %376 : vector<8x32xf32> to vector<1x8x32xf32>
    tpu.vector_store %arg15[%c0_158, %c0_159, %c0_160], %386 {strides = array<i32>} : memref<2x8x32xf32, #tpu.memory_space<vmem>>, vector<1x8x32xf32>,
    %c0_161 = arith.constant 0 : index
    %c0_162 = arith.constant 0 : index
    %387 = vector.load %arg20[%c0_161, %c0_162] : memref<64x32xf32, #tpu.memory_space<vmem>>, vector<64x32xf32>
    %388 = arith.truncf %387 : vector<64x32xf32> to vector<64x32xbf16>
    %c0_163 = arith.constant 0 : index
    %c0_164 = arith.constant 0 : index
    %c0_165 = arith.constant 0 : index
    %389 = vector.load %arg4[%c0_163, %c0_164, %c0_165] : memref<4x32x32xbf16, #tpu.memory_space<vmem>>, vector<1x32x32xbf16>
    %390 = vector.shape_cast %389 : vector<1x32x32xbf16> to vector<32x32xbf16>
    %cst_166 = arith.constant dense<0.000000e+00> : vector<64x32xf32>
    %391 = tpu.matmul %388, %390, %cst_166 {dimension_numbers = #tpu.dot_dimension_numbers<[1], [0], [0], [1], [0, 0, 1, 1], [], []>} : vector<64x32xbf16>, vector<32x32xbf16>, vector<64x32xf32> -> vector<64x32xf32>
    %c0_167 = arith.constant 0 : index
    %c0_168 = arith.constant 0 : index
    %c0_169 = arith.constant 0 : index
    %392 = vector.load %arg6[%c0_167, %c0_168, %c0_169] : memref<4x1x32xf32, #tpu.memory_space<vmem>>, vector<1x1x32xf32>
    %393 = vector.shape_cast %392 : vector<1x1x32xf32> to vector<1x32xf32>
    %394 = vector.broadcast %393 : vector<1x32xf32> to vector<64x32xf32>
    %395 = arith.addf %391, %394 : vector<64x32xf32>
    %c0_170 = arith.constant 0 : index
    %c0_171 = arith.constant 0 : index
    %396 = vector.load %arg16[%c0_170, %c0_171] : memref<64x32xf32, #tpu.memory_space<vmem>>, vector<64x32xf32>
    tpu.vector_store %arg16[%c0_170, %c0_171], %395 {strides = array<i32>} : memref<64x32xf32, #tpu.memory_space<vmem>>, vector<64x32xf32>,
    %c1_172 = arith.constant 1 : index
    %c0_173 = arith.constant 0 : index
    %c0_174 = arith.constant 0 : index
    %397 = vector.load %arg4[%c1_172, %c0_173, %c0_174] : memref<4x32x32xbf16, #tpu.memory_space<vmem>>, vector<1x32x32xbf16>
    %398 = vector.shape_cast %397 : vector<1x32x32xbf16> to vector<32x32xbf16>
    %cst_175 = arith.constant dense<0.000000e+00> : vector<64x32xf32>
    %399 = tpu.matmul %388, %398, %cst_175 {dimension_numbers = #tpu.dot_dimension_numbers<[1], [0], [0], [1], [0, 0, 1, 1], [], []>} : vector<64x32xbf16>, vector<32x32xbf16>, vector<64x32xf32> -> vector<64x32xf32>
    %c1_176 = arith.constant 1 : index
    %c0_177 = arith.constant 0 : index
    %c0_178 = arith.constant 0 : index
    %400 = vector.load %arg6[%c1_176, %c0_177, %c0_178] : memref<4x1x32xf32, #tpu.memory_space<vmem>>, vector<1x1x32xf32>
    %401 = vector.shape_cast %400 : vector<1x1x32xf32> to vector<1x32xf32>
    %402 = vector.broadcast %401 : vector<1x32xf32> to vector<64x32xf32>
    %403 = arith.addf %399, %402 : vector<64x32xf32>
    %c0_179 = arith.constant 0 : index
    %c0_180 = arith.constant 0 : index
    %404 = vector.load %arg17[%c0_179, %c0_180] : memref<64x32xf32, #tpu.memory_space<vmem>>, vector<64x32xf32>
    tpu.vector_store %arg17[%c0_179, %c0_180], %403 {strides = array<i32>} : memref<64x32xf32, #tpu.memory_space<vmem>>, vector<64x32xf32>,
    %c2_181 = arith.constant 2 : index
    %c0_182 = arith.constant 0 : index
    %c0_183 = arith.constant 0 : index
    %405 = vector.load %arg4[%c2_181, %c0_182, %c0_183] : memref<4x32x32xbf16, #tpu.memory_space<vmem>>, vector<1x32x32xbf16>
    %406 = vector.shape_cast %405 : vector<1x32x32xbf16> to vector<32x32xbf16>
    %cst_184 = arith.constant dense<0.000000e+00> : vector<64x32xf32>
    %407 = tpu.matmul %388, %406, %cst_184 {dimension_numbers = #tpu.dot_dimension_numbers<[1], [0], [0], [1], [0, 0, 1, 1], [], []>} : vector<64x32xbf16>, vector<32x32xbf16>, vector<64x32xf32> -> vector<64x32xf32>
    %c2_185 = arith.constant 2 : index
    %c0_186 = arith.constant 0 : index
    %c0_187 = arith.constant 0 : index
    %408 = vector.load %arg6[%c2_185, %c0_186, %c0_187] : memref<4x1x32xf32, #tpu.memory_space<vmem>>, vector<1x1x32xf32>
    %409 = vector.shape_cast %408 : vector<1x1x32xf32> to vector<1x32xf32>
    %410 = vector.broadcast %409 : vector<1x32xf32> to vector<64x32xf32>
    %411 = arith.addf %407, %410 : vector<64x32xf32>
    %c0_188 = arith.constant 0 : index
    %c0_189 = arith.constant 0 : index
    %412 = vector.load %arg18[%c0_188, %c0_189] : memref<64x32xf32, #tpu.memory_space<vmem>>, vector<64x32xf32>
    tpu.vector_store %arg18[%c0_188, %c0_189], %411 {strides = array<i32>} : memref<64x32xf32, #tpu.memory_space<vmem>>, vector<64x32xf32>,
    %c3_190 = arith.constant 3 : index
    %c0_191 = arith.constant 0 : index
    %c0_192 = arith.constant 0 : index
    %413 = vector.load %arg4[%c3_190, %c0_191, %c0_192] : memref<4x32x32xbf16, #tpu.memory_space<vmem>>, vector<1x32x32xbf16>
    %414 = vector.shape_cast %413 : vector<1x32x32xbf16> to vector<32x32xbf16>
    %cst_193 = arith.constant dense<0.000000e+00> : vector<64x32xf32>
    %415 = tpu.matmul %388, %414, %cst_193 {dimension_numbers = #tpu.dot_dimension_numbers<[1], [0], [0], [1], [0, 0, 1, 1], [], []>} : vector<64x32xbf16>, vector<32x32xbf16>, vector<64x32xf32> -> vector<64x32xf32>
    %c3_194 = arith.constant 3 : index
    %c0_195 = arith.constant 0 : index
    %c0_196 = arith.constant 0 : index
    %416 = vector.load %arg6[%c3_194, %c0_195, %c0_196] : memref<4x1x32xf32, #tpu.memory_space<vmem>>, vector<1x1x32xf32>
    %417 = vector.shape_cast %416 : vector<1x1x32xf32> to vector<1x32xf32>
    %418 = vector.broadcast %417 : vector<1x32xf32> to vector<64x32xf32>
    %419 = arith.addf %415, %418 : vector<64x32xf32>
    %c0_197 = arith.constant 0 : index
    %c0_198 = arith.constant 0 : index
    %420 = vector.load %arg19[%c0_197, %c0_198] : memref<64x32xf32, #tpu.memory_space<vmem>>, vector<64x32xf32>
    tpu.vector_store %arg19[%c0_197, %c0_198], %419 {strides = array<i32>} : memref<64x32xf32, #tpu.memory_space<vmem>>, vector<64x32xf32>,
    %c0_199 = arith.constant 0 : index
    %c0_200 = arith.constant 0 : index
    %c0_201 = arith.constant 0 : index
    %421 = vector.load %arg5[%c0_199, %c0_200, %c0_201] : memref<4x32x32xbf16, #tpu.memory_space<vmem>>, vector<1x32x32xbf16>
    %422 = vector.shape_cast %421 : vector<1x32x32xbf16> to vector<32x32xbf16>
    %c1_202 = arith.constant 1 : index
    %c0_203 = arith.constant 0 : index
    %c0_204 = arith.constant 0 : index
    %423 = vector.load %arg5[%c1_202, %c0_203, %c0_204] : memref<4x32x32xbf16, #tpu.memory_space<vmem>>, vector<1x32x32xbf16>
    %424 = vector.shape_cast %423 : vector<1x32x32xbf16> to vector<32x32xbf16>
    %c2_205 = arith.constant 2 : index
    %c0_206 = arith.constant 0 : index
    %c0_207 = arith.constant 0 : index
    %425 = vector.load %arg5[%c2_205, %c0_206, %c0_207] : memref<4x32x32xbf16, #tpu.memory_space<vmem>>, vector<1x32x32xbf16>
    %426 = vector.shape_cast %425 : vector<1x32x32xbf16> to vector<32x32xbf16>
    %c3_208 = arith.constant 3 : index
    %c0_209 = arith.constant 0 : index
    %c0_210 = arith.constant 0 : index
    %427 = vector.load %arg5[%c3_208, %c0_209, %c0_210] : memref<4x32x32xbf16, #tpu.memory_space<vmem>>, vector<1x32x32xbf16>
    %428 = vector.shape_cast %427 : vector<1x32x32xbf16> to vector<32x32xbf16>
    %c1_211 = arith.constant 1 : index
    %c0_212 = arith.constant 0 : index
    %c0_213 = arith.constant 0 : index
    %429 = vector.load %arg7[%c1_211, %c0_212, %c0_213] : memref<2x8x32xf32, #tpu.memory_space<vmem>>, vector<1x8x32xf32>
    %430 = vector.shape_cast %429 : vector<1x8x32xf32> to vector<8x32xf32>
    %c1_214 = arith.constant 1 : index
    %c0_215 = arith.constant 0 : index
    %c0_216 = arith.constant 0 : index
    %431 = vector.load %arg8[%c1_214, %c0_215, %c0_216] : memref<2x8x32xf32, #tpu.memory_space<vmem>>, vector<1x8x32xf32>
    %432 = vector.shape_cast %431 : vector<1x8x32xf32> to vector<8x32xf32>
    %c0_i32_217 = arith.constant 0 : i32
    %c8_i32_218 = arith.constant 8 : i32
    %433 = arith.muli %c0_i32_217, %c8_i32_218 : i32
    %434 = tpu.assume_multiple %433, 8 : i32
    %435 = arith.truncf %430 : vector<8x32xf32> to vector<8x32xbf16>
    %436 = arith.index_cast %434 : i32 to index
    %c0_219 = arith.constant 0 : index
    %437 = vector.load %arg16[%436, %c0_219] : memref<64x32xf32, #tpu.memory_space<vmem>>, vector<8x32xf32>
    %cst_220 = arith.constant dense<0.000000e+00> : vector<8x32xf32>
    %438 = tpu.matmul %435, %422, %cst_220 {dimension_numbers = #tpu.dot_dimension_numbers<[1], [0], [0], [1], [0, 0, 1, 1], [], []>} : vector<8x32xbf16>, vector<32x32xbf16>, vector<8x32xf32> -> vector<8x32xf32>
    %439 = arith.addf %437, %438 : vector<8x32xf32>
    %440 = arith.index_cast %434 : i32 to index
    %c0_221 = arith.constant 0 : index
    %441 = vector.load %arg17[%440, %c0_221] : memref<64x32xf32, #tpu.memory_space<vmem>>, vector<8x32xf32>
    %cst_222 = arith.constant dense<0.000000e+00> : vector<8x32xf32>
    %442 = tpu.matmul %435, %424, %cst_222 {dimension_numbers = #tpu.dot_dimension_numbers<[1], [0], [0], [1], [0, 0, 1, 1], [], []>} : vector<8x32xbf16>, vector<32x32xbf16>, vector<8x32xf32> -> vector<8x32xf32>
    %443 = arith.addf %441, %442 : vector<8x32xf32>
    %444 = arith.index_cast %434 : i32 to index
    %c0_223 = arith.constant 0 : index
    %445 = vector.load %arg18[%444, %c0_223] : memref<64x32xf32, #tpu.memory_space<vmem>>, vector<8x32xf32>
    %cst_224 = arith.constant dense<0.000000e+00> : vector<8x32xf32>
    %446 = tpu.matmul %435, %426, %cst_224 {dimension_numbers = #tpu.dot_dimension_numbers<[1], [0], [0], [1], [0, 0, 1, 1], [], []>} : vector<8x32xbf16>, vector<32x32xbf16>, vector<8x32xf32> -> vector<8x32xf32>
    %447 = arith.addf %445, %446 : vector<8x32xf32>
    %448 = arith.index_cast %434 : i32 to index
    %c0_225 = arith.constant 0 : index
    %449 = vector.load %arg19[%448, %c0_225] : memref<64x32xf32, #tpu.memory_space<vmem>>, vector<8x32xf32>
    %cst_226 = arith.constant dense<0.000000e+00> : vector<8x32xf32>
    %450 = tpu.matmul %435, %428, %cst_226 {dimension_numbers = #tpu.dot_dimension_numbers<[1], [0], [0], [1], [0, 0, 1, 1], [], []>} : vector<8x32xbf16>, vector<32x32xbf16>, vector<8x32xf32> -> vector<8x32xf32>
    %451 = arith.addf %449, %450 : vector<8x32xf32>
    %452 = arith.negf %439 : vector<8x32xf32>
    %453 = math.exp %452 : vector<8x32xf32>
    %cst_227 = arith.constant 1.000000e+00 : f32
    %454 = vector.broadcast %cst_227 : f32 to vector<8x32xf32>
    %455 = arith.addf %454, %453 : vector<8x32xf32>
    %456 = arith.divf %454, %455 : vector<8x32xf32>
    %457 = arith.negf %443 : vector<8x32xf32>
    %458 = math.exp %457 : vector<8x32xf32>
    %cst_228 = arith.constant 1.000000e+00 : f32
    %459 = vector.broadcast %cst_228 : f32 to vector<8x32xf32>
    %460 = arith.addf %459, %458 : vector<8x32xf32>
    %461 = arith.divf %459, %460 : vector<8x32xf32>
    %462 = arith.negf %451 : vector<8x32xf32>
    %463 = math.exp %462 : vector<8x32xf32>
    %cst_229 = arith.constant 1.000000e+00 : f32
    %464 = vector.broadcast %cst_229 : f32 to vector<8x32xf32>
    %465 = arith.addf %464, %463 : vector<8x32xf32>
    %466 = arith.divf %464, %465 : vector<8x32xf32>
    %467 = math.tanh %447 : vector<8x32xf32>
    %468 = arith.mulf %461, %432 : vector<8x32xf32>
    %469 = arith.mulf %456, %467 : vector<8x32xf32>
    %470 = arith.addf %468, %469 : vector<8x32xf32>
    %471 = math.tanh %470 : vector<8x32xf32>
    %472 = arith.mulf %466, %471 : vector<8x32xf32>
    %c1_i32_230 = arith.constant 1 : i32
    %c8_i32_231 = arith.constant 8 : i32
    %473 = arith.muli %c1_i32_230, %c8_i32_231 : i32
    %474 = tpu.assume_multiple %473, 8 : i32
    %475 = arith.truncf %472 : vector<8x32xf32> to vector<8x32xbf16>
    %476 = arith.index_cast %474 : i32 to index
    %c0_232 = arith.constant 0 : index
    %477 = vector.load %arg16[%476, %c0_232] : memref<64x32xf32, #tpu.memory_space<vmem>>, vector<8x32xf32>
    %cst_233 = arith.constant dense<0.000000e+00> : vector<8x32xf32>
    %478 = tpu.matmul %475, %422, %cst_233 {dimension_numbers = #tpu.dot_dimension_numbers<[1], [0], [0], [1], [0, 0, 1, 1], [], []>} : vector<8x32xbf16>, vector<32x32xbf16>, vector<8x32xf32> -> vector<8x32xf32>
    %479 = arith.addf %477, %478 : vector<8x32xf32>
    %480 = arith.index_cast %474 : i32 to index
    %c0_234 = arith.constant 0 : index
    %481 = vector.load %arg17[%480, %c0_234] : memref<64x32xf32, #tpu.memory_space<vmem>>, vector<8x32xf32>
    %cst_235 = arith.constant dense<0.000000e+00> : vector<8x32xf32>
    %482 = tpu.matmul %475, %424, %cst_235 {dimension_numbers = #tpu.dot_dimension_numbers<[1], [0], [0], [1], [0, 0, 1, 1], [], []>} : vector<8x32xbf16>, vector<32x32xbf16>, vector<8x32xf32> -> vector<8x32xf32>
    %483 = arith.addf %481, %482 : vector<8x32xf32>
    %484 = arith.index_cast %474 : i32 to index
    %c0_236 = arith.constant 0 : index
    %485 = vector.load %arg18[%484, %c0_236] : memref<64x32xf32, #tpu.memory_space<vmem>>, vector<8x32xf32>
    %cst_237 = arith.constant dense<0.000000e+00> : vector<8x32xf32>
    %486 = tpu.matmul %475, %426, %cst_237 {dimension_numbers = #tpu.dot_dimension_numbers<[1], [0], [0], [1], [0, 0, 1, 1], [], []>} : vector<8x32xbf16>, vector<32x32xbf16>, vector<8x32xf32> -> vector<8x32xf32>
    %487 = arith.addf %485, %486 : vector<8x32xf32>
    %488 = arith.index_cast %474 : i32 to index
    %c0_238 = arith.constant 0 : index
    %489 = vector.load %arg19[%488, %c0_238] : memref<64x32xf32, #tpu.memory_space<vmem>>, vector<8x32xf32>
    %cst_239 = arith.constant dense<0.000000e+00> : vector<8x32xf32>
    %490 = tpu.matmul %475, %428, %cst_239 {dimension_numbers = #tpu.dot_dimension_numbers<[1], [0], [0], [1], [0, 0, 1, 1], [], []>} : vector<8x32xbf16>, vector<32x32xbf16>, vector<8x32xf32> -> vector<8x32xf32>
    %491 = arith.addf %489, %490 : vector<8x32xf32>
    %492 = arith.negf %479 : vector<8x32xf32>
    %493 = math.exp %492 : vector<8x32xf32>
    %cst_240 = arith.constant 1.000000e+00 : f32
    %494 = vector.broadcast %cst_240 : f32 to vector<8x32xf32>
    %495 = arith.addf %494, %493 : vector<8x32xf32>
    %496 = arith.divf %494, %495 : vector<8x32xf32>
    %497 = arith.negf %483 : vector<8x32xf32>
    %498 = math.exp %497 : vector<8x32xf32>
    %cst_241 = arith.constant 1.000000e+00 : f32
    %499 = vector.broadcast %cst_241 : f32 to vector<8x32xf32>
    %500 = arith.addf %499, %498 : vector<8x32xf32>
    %501 = arith.divf %499, %500 : vector<8x32xf32>
    %502 = arith.negf %491 : vector<8x32xf32>
    %503 = math.exp %502 : vector<8x32xf32>
    %cst_242 = arith.constant 1.000000e+00 : f32
    %504 = vector.broadcast %cst_242 : f32 to vector<8x32xf32>
    %505 = arith.addf %504, %503 : vector<8x32xf32>
    %506 = arith.divf %504, %505 : vector<8x32xf32>
    %507 = math.tanh %487 : vector<8x32xf32>
    %508 = arith.mulf %501, %470 : vector<8x32xf32>
    %509 = arith.mulf %496, %507 : vector<8x32xf32>
    %510 = arith.addf %508, %509 : vector<8x32xf32>
    %511 = math.tanh %510 : vector<8x32xf32>
    %512 = arith.mulf %506, %511 : vector<8x32xf32>
    %c2_i32_243 = arith.constant 2 : i32
    %c8_i32_244 = arith.constant 8 : i32
    %513 = arith.muli %c2_i32_243, %c8_i32_244 : i32
    %514 = tpu.assume_multiple %513, 8 : i32
    %515 = arith.truncf %512 : vector<8x32xf32> to vector<8x32xbf16>
    %516 = arith.index_cast %514 : i32 to index
    %c0_245 = arith.constant 0 : index
    %517 = vector.load %arg16[%516, %c0_245] : memref<64x32xf32, #tpu.memory_space<vmem>>, vector<8x32xf32>
    %cst_246 = arith.constant dense<0.000000e+00> : vector<8x32xf32>
    %518 = tpu.matmul %515, %422, %cst_246 {dimension_numbers = #tpu.dot_dimension_numbers<[1], [0], [0], [1], [0, 0, 1, 1], [], []>} : vector<8x32xbf16>, vector<32x32xbf16>, vector<8x32xf32> -> vector<8x32xf32>
    %519 = arith.addf %517, %518 : vector<8x32xf32>
    %520 = arith.index_cast %514 : i32 to index
    %c0_247 = arith.constant 0 : index
    %521 = vector.load %arg17[%520, %c0_247] : memref<64x32xf32, #tpu.memory_space<vmem>>, vector<8x32xf32>
    %cst_248 = arith.constant dense<0.000000e+00> : vector<8x32xf32>
    %522 = tpu.matmul %515, %424, %cst_248 {dimension_numbers = #tpu.dot_dimension_numbers<[1], [0], [0], [1], [0, 0, 1, 1], [], []>} : vector<8x32xbf16>, vector<32x32xbf16>, vector<8x32xf32> -> vector<8x32xf32>
    %523 = arith.addf %521, %522 : vector<8x32xf32>
    %524 = arith.index_cast %514 : i32 to index
    %c0_249 = arith.constant 0 : index
    %525 = vector.load %arg18[%524, %c0_249] : memref<64x32xf32, #tpu.memory_space<vmem>>, vector<8x32xf32>
    %cst_250 = arith.constant dense<0.000000e+00> : vector<8x32xf32>
    %526 = tpu.matmul %515, %426, %cst_250 {dimension_numbers = #tpu.dot_dimension_numbers<[1], [0], [0], [1], [0, 0, 1, 1], [], []>} : vector<8x32xbf16>, vector<32x32xbf16>, vector<8x32xf32> -> vector<8x32xf32>
    %527 = arith.addf %525, %526 : vector<8x32xf32>
    %528 = arith.index_cast %514 : i32 to index
    %c0_251 = arith.constant 0 : index
    %529 = vector.load %arg19[%528, %c0_251] : memref<64x32xf32, #tpu.memory_space<vmem>>, vector<8x32xf32>
    %cst_252 = arith.constant dense<0.000000e+00> : vector<8x32xf32>
    %530 = tpu.matmul %515, %428, %cst_252 {dimension_numbers = #tpu.dot_dimension_numbers<[1], [0], [0], [1], [0, 0, 1, 1], [], []>} : vector<8x32xbf16>, vector<32x32xbf16>, vector<8x32xf32> -> vector<8x32xf32>
    %531 = arith.addf %529, %530 : vector<8x32xf32>
    %532 = arith.negf %519 : vector<8x32xf32>
    %533 = math.exp %532 : vector<8x32xf32>
    %cst_253 = arith.constant 1.000000e+00 : f32
    %534 = vector.broadcast %cst_253 : f32 to vector<8x32xf32>
    %535 = arith.addf %534, %533 : vector<8x32xf32>
    %536 = arith.divf %534, %535 : vector<8x32xf32>
    %537 = arith.negf %523 : vector<8x32xf32>
    %538 = math.exp %537 : vector<8x32xf32>
    %cst_254 = arith.constant 1.000000e+00 : f32
    %539 = vector.broadcast %cst_254 : f32 to vector<8x32xf32>
    %540 = arith.addf %539, %538 : vector<8x32xf32>
    %541 = arith.divf %539, %540 : vector<8x32xf32>
    %542 = arith.negf %531 : vector<8x32xf32>
    %543 = math.exp %542 : vector<8x32xf32>
    %cst_255 = arith.constant 1.000000e+00 : f32
    %544 = vector.broadcast %cst_255 : f32 to vector<8x32xf32>
    %545 = arith.addf %544, %543 : vector<8x32xf32>
    %546 = arith.divf %544, %545 : vector<8x32xf32>
    %547 = math.tanh %527 : vector<8x32xf32>
    %548 = arith.mulf %541, %510 : vector<8x32xf32>
    %549 = arith.mulf %536, %547 : vector<8x32xf32>
    %550 = arith.addf %548, %549 : vector<8x32xf32>
    %551 = math.tanh %550 : vector<8x32xf32>
    %552 = arith.mulf %546, %551 : vector<8x32xf32>
    %c3_i32_256 = arith.constant 3 : i32
    %c8_i32_257 = arith.constant 8 : i32
    %553 = arith.muli %c3_i32_256, %c8_i32_257 : i32
    %554 = tpu.assume_multiple %553, 8 : i32
    %555 = arith.truncf %552 : vector<8x32xf32> to vector<8x32xbf16>
    %556 = arith.index_cast %554 : i32 to index
    %c0_258 = arith.constant 0 : index
    %557 = vector.load %arg16[%556, %c0_258] : memref<64x32xf32, #tpu.memory_space<vmem>>, vector<8x32xf32>
    %cst_259 = arith.constant dense<0.000000e+00> : vector<8x32xf32>
    %558 = tpu.matmul %555, %422, %cst_259 {dimension_numbers = #tpu.dot_dimension_numbers<[1], [0], [0], [1], [0, 0, 1, 1], [], []>} : vector<8x32xbf16>, vector<32x32xbf16>, vector<8x32xf32> -> vector<8x32xf32>
    %559 = arith.addf %557, %558 : vector<8x32xf32>
    %560 = arith.index_cast %554 : i32 to index
    %c0_260 = arith.constant 0 : index
    %561 = vector.load %arg17[%560, %c0_260] : memref<64x32xf32, #tpu.memory_space<vmem>>, vector<8x32xf32>
    %cst_261 = arith.constant dense<0.000000e+00> : vector<8x32xf32>
    %562 = tpu.matmul %555, %424, %cst_261 {dimension_numbers = #tpu.dot_dimension_numbers<[1], [0], [0], [1], [0, 0, 1, 1], [], []>} : vector<8x32xbf16>, vector<32x32xbf16>, vector<8x32xf32> -> vector<8x32xf32>
    %563 = arith.addf %561, %562 : vector<8x32xf32>
    %564 = arith.index_cast %554 : i32 to index
    %c0_262 = arith.constant 0 : index
    %565 = vector.load %arg18[%564, %c0_262] : memref<64x32xf32, #tpu.memory_space<vmem>>, vector<8x32xf32>
    %cst_263 = arith.constant dense<0.000000e+00> : vector<8x32xf32>
    %566 = tpu.matmul %555, %426, %cst_263 {dimension_numbers = #tpu.dot_dimension_numbers<[1], [0], [0], [1], [0, 0, 1, 1], [], []>} : vector<8x32xbf16>, vector<32x32xbf16>, vector<8x32xf32> -> vector<8x32xf32>
    %567 = arith.addf %565, %566 : vector<8x32xf32>
    %568 = arith.index_cast %554 : i32 to index
    %c0_264 = arith.constant 0 : index
    %569 = vector.load %arg19[%568, %c0_264] : memref<64x32xf32, #tpu.memory_space<vmem>>, vector<8x32xf32>
    %cst_265 = arith.constant dense<0.000000e+00> : vector<8x32xf32>
    %570 = tpu.matmul %555, %428, %cst_265 {dimension_numbers = #tpu.dot_dimension_numbers<[1], [0], [0], [1], [0, 0, 1, 1], [], []>} : vector<8x32xbf16>, vector<32x32xbf16>, vector<8x32xf32> -> vector<8x32xf32>
    %571 = arith.addf %569, %570 : vector<8x32xf32>
    %572 = arith.negf %559 : vector<8x32xf32>
    %573 = math.exp %572 : vector<8x32xf32>
    %cst_266 = arith.constant 1.000000e+00 : f32
    %574 = vector.broadcast %cst_266 : f32 to vector<8x32xf32>
    %575 = arith.addf %574, %573 : vector<8x32xf32>
    %576 = arith.divf %574, %575 : vector<8x32xf32>
    %577 = arith.negf %563 : vector<8x32xf32>
    %578 = math.exp %577 : vector<8x32xf32>
    %cst_267 = arith.constant 1.000000e+00 : f32
    %579 = vector.broadcast %cst_267 : f32 to vector<8x32xf32>
    %580 = arith.addf %579, %578 : vector<8x32xf32>
    %581 = arith.divf %579, %580 : vector<8x32xf32>
    %582 = arith.negf %571 : vector<8x32xf32>
    %583 = math.exp %582 : vector<8x32xf32>
    %cst_268 = arith.constant 1.000000e+00 : f32
    %584 = vector.broadcast %cst_268 : f32 to vector<8x32xf32>
    %585 = arith.addf %584, %583 : vector<8x32xf32>
    %586 = arith.divf %584, %585 : vector<8x32xf32>
    %587 = math.tanh %567 : vector<8x32xf32>
    %588 = arith.mulf %581, %550 : vector<8x32xf32>
    %589 = arith.mulf %576, %587 : vector<8x32xf32>
    %590 = arith.addf %588, %589 : vector<8x32xf32>
    %591 = math.tanh %590 : vector<8x32xf32>
    %592 = arith.mulf %586, %591 : vector<8x32xf32>
    %c4_i32_269 = arith.constant 4 : i32
    %c8_i32_270 = arith.constant 8 : i32
    %593 = arith.muli %c4_i32_269, %c8_i32_270 : i32
    %594 = tpu.assume_multiple %593, 8 : i32
    %595 = arith.truncf %592 : vector<8x32xf32> to vector<8x32xbf16>
    %596 = arith.index_cast %594 : i32 to index
    %c0_271 = arith.constant 0 : index
    %597 = vector.load %arg16[%596, %c0_271] : memref<64x32xf32, #tpu.memory_space<vmem>>, vector<8x32xf32>
    %cst_272 = arith.constant dense<0.000000e+00> : vector<8x32xf32>
    %598 = tpu.matmul %595, %422, %cst_272 {dimension_numbers = #tpu.dot_dimension_numbers<[1], [0], [0], [1], [0, 0, 1, 1], [], []>} : vector<8x32xbf16>, vector<32x32xbf16>, vector<8x32xf32> -> vector<8x32xf32>
    %599 = arith.addf %597, %598 : vector<8x32xf32>
    %600 = arith.index_cast %594 : i32 to index
    %c0_273 = arith.constant 0 : index
    %601 = vector.load %arg17[%600, %c0_273] : memref<64x32xf32, #tpu.memory_space<vmem>>, vector<8x32xf32>
    %cst_274 = arith.constant dense<0.000000e+00> : vector<8x32xf32>
    %602 = tpu.matmul %595, %424, %cst_274 {dimension_numbers = #tpu.dot_dimension_numbers<[1], [0], [0], [1], [0, 0, 1, 1], [], []>} : vector<8x32xbf16>, vector<32x32xbf16>, vector<8x32xf32> -> vector<8x32xf32>
    %603 = arith.addf %601, %602 : vector<8x32xf32>
    %604 = arith.index_cast %594 : i32 to index
    %c0_275 = arith.constant 0 : index
    %605 = vector.load %arg18[%604, %c0_275] : memref<64x32xf32, #tpu.memory_space<vmem>>, vector<8x32xf32>
    %cst_276 = arith.constant dense<0.000000e+00> : vector<8x32xf32>
    %606 = tpu.matmul %595, %426, %cst_276 {dimension_numbers = #tpu.dot_dimension_numbers<[1], [0], [0], [1], [0, 0, 1, 1], [], []>} : vector<8x32xbf16>, vector<32x32xbf16>, vector<8x32xf32> -> vector<8x32xf32>
    %607 = arith.addf %605, %606 : vector<8x32xf32>
    %608 = arith.index_cast %594 : i32 to index
    %c0_277 = arith.constant 0 : index
    %609 = vector.load %arg19[%608, %c0_277] : memref<64x32xf32, #tpu.memory_space<vmem>>, vector<8x32xf32>
    %cst_278 = arith.constant dense<0.000000e+00> : vector<8x32xf32>
    %610 = tpu.matmul %595, %428, %cst_278 {dimension_numbers = #tpu.dot_dimension_numbers<[1], [0], [0], [1], [0, 0, 1, 1], [], []>} : vector<8x32xbf16>, vector<32x32xbf16>, vector<8x32xf32> -> vector<8x32xf32>
    %611 = arith.addf %609, %610 : vector<8x32xf32>
    %612 = arith.negf %599 : vector<8x32xf32>
    %613 = math.exp %612 : vector<8x32xf32>
    %cst_279 = arith.constant 1.000000e+00 : f32
    %614 = vector.broadcast %cst_279 : f32 to vector<8x32xf32>
    %615 = arith.addf %614, %613 : vector<8x32xf32>
    %616 = arith.divf %614, %615 : vector<8x32xf32>
    %617 = arith.negf %603 : vector<8x32xf32>
    %618 = math.exp %617 : vector<8x32xf32>
    %cst_280 = arith.constant 1.000000e+00 : f32
    %619 = vector.broadcast %cst_280 : f32 to vector<8x32xf32>
    %620 = arith.addf %619, %618 : vector<8x32xf32>
    %621 = arith.divf %619, %620 : vector<8x32xf32>
    %622 = arith.negf %611 : vector<8x32xf32>
    %623 = math.exp %622 : vector<8x32xf32>
    %cst_281 = arith.constant 1.000000e+00 : f32
    %624 = vector.broadcast %cst_281 : f32 to vector<8x32xf32>
    %625 = arith.addf %624, %623 : vector<8x32xf32>
    %626 = arith.divf %624, %625 : vector<8x32xf32>
    %627 = math.tanh %607 : vector<8x32xf32>
    %628 = arith.mulf %621, %590 : vector<8x32xf32>
    %629 = arith.mulf %616, %627 : vector<8x32xf32>
    %630 = arith.addf %628, %629 : vector<8x32xf32>
    %631 = math.tanh %630 : vector<8x32xf32>
    %632 = arith.mulf %626, %631 : vector<8x32xf32>
    %c5_i32_282 = arith.constant 5 : i32
    %c8_i32_283 = arith.constant 8 : i32
    %633 = arith.muli %c5_i32_282, %c8_i32_283 : i32
    %634 = tpu.assume_multiple %633, 8 : i32
    %635 = arith.truncf %632 : vector<8x32xf32> to vector<8x32xbf16>
    %636 = arith.index_cast %634 : i32 to index
    %c0_284 = arith.constant 0 : index
    %637 = vector.load %arg16[%636, %c0_284] : memref<64x32xf32, #tpu.memory_space<vmem>>, vector<8x32xf32>
    %cst_285 = arith.constant dense<0.000000e+00> : vector<8x32xf32>
    %638 = tpu.matmul %635, %422, %cst_285 {dimension_numbers = #tpu.dot_dimension_numbers<[1], [0], [0], [1], [0, 0, 1, 1], [], []>} : vector<8x32xbf16>, vector<32x32xbf16>, vector<8x32xf32> -> vector<8x32xf32>
    %639 = arith.addf %637, %638 : vector<8x32xf32>
    %640 = arith.index_cast %634 : i32 to index
    %c0_286 = arith.constant 0 : index
    %641 = vector.load %arg17[%640, %c0_286] : memref<64x32xf32, #tpu.memory_space<vmem>>, vector<8x32xf32>
    %cst_287 = arith.constant dense<0.000000e+00> : vector<8x32xf32>
    %642 = tpu.matmul %635, %424, %cst_287 {dimension_numbers = #tpu.dot_dimension_numbers<[1], [0], [0], [1], [0, 0, 1, 1], [], []>} : vector<8x32xbf16>, vector<32x32xbf16>, vector<8x32xf32> -> vector<8x32xf32>
    %643 = arith.addf %641, %642 : vector<8x32xf32>
    %644 = arith.index_cast %634 : i32 to index
    %c0_288 = arith.constant 0 : index
    %645 = vector.load %arg18[%644, %c0_288] : memref<64x32xf32, #tpu.memory_space<vmem>>, vector<8x32xf32>
    %cst_289 = arith.constant dense<0.000000e+00> : vector<8x32xf32>
    %646 = tpu.matmul %635, %426, %cst_289 {dimension_numbers = #tpu.dot_dimension_numbers<[1], [0], [0], [1], [0, 0, 1, 1], [], []>} : vector<8x32xbf16>, vector<32x32xbf16>, vector<8x32xf32> -> vector<8x32xf32>
    %647 = arith.addf %645, %646 : vector<8x32xf32>
    %648 = arith.index_cast %634 : i32 to index
    %c0_290 = arith.constant 0 : index
    %649 = vector.load %arg19[%648, %c0_290] : memref<64x32xf32, #tpu.memory_space<vmem>>, vector<8x32xf32>
    %cst_291 = arith.constant dense<0.000000e+00> : vector<8x32xf32>
    %650 = tpu.matmul %635, %428, %cst_291 {dimension_numbers = #tpu.dot_dimension_numbers<[1], [0], [0], [1], [0, 0, 1, 1], [], []>} : vector<8x32xbf16>, vector<32x32xbf16>, vector<8x32xf32> -> vector<8x32xf32>
    %651 = arith.addf %649, %650 : vector<8x32xf32>
    %652 = arith.negf %639 : vector<8x32xf32>
    %653 = math.exp %652 : vector<8x32xf32>
    %cst_292 = arith.constant 1.000000e+00 : f32
    %654 = vector.broadcast %cst_292 : f32 to vector<8x32xf32>
    %655 = arith.addf %654, %653 : vector<8x32xf32>
    %656 = arith.divf %654, %655 : vector<8x32xf32>
    %657 = arith.negf %643 : vector<8x32xf32>
    %658 = math.exp %657 : vector<8x32xf32>
    %cst_293 = arith.constant 1.000000e+00 : f32
    %659 = vector.broadcast %cst_293 : f32 to vector<8x32xf32>
    %660 = arith.addf %659, %658 : vector<8x32xf32>
    %661 = arith.divf %659, %660 : vector<8x32xf32>
    %662 = arith.negf %651 : vector<8x32xf32>
    %663 = math.exp %662 : vector<8x32xf32>
    %cst_294 = arith.constant 1.000000e+00 : f32
    %664 = vector.broadcast %cst_294 : f32 to vector<8x32xf32>
    %665 = arith.addf %664, %663 : vector<8x32xf32>
    %666 = arith.divf %664, %665 : vector<8x32xf32>
    %667 = math.tanh %647 : vector<8x32xf32>
    %668 = arith.mulf %661, %630 : vector<8x32xf32>
    %669 = arith.mulf %656, %667 : vector<8x32xf32>
    %670 = arith.addf %668, %669 : vector<8x32xf32>
    %671 = math.tanh %670 : vector<8x32xf32>
    %672 = arith.mulf %666, %671 : vector<8x32xf32>
    %c6_i32_295 = arith.constant 6 : i32
    %c8_i32_296 = arith.constant 8 : i32
    %673 = arith.muli %c6_i32_295, %c8_i32_296 : i32
    %674 = tpu.assume_multiple %673, 8 : i32
    %675 = arith.truncf %672 : vector<8x32xf32> to vector<8x32xbf16>
    %676 = arith.index_cast %674 : i32 to index
    %c0_297 = arith.constant 0 : index
    %677 = vector.load %arg16[%676, %c0_297] : memref<64x32xf32, #tpu.memory_space<vmem>>, vector<8x32xf32>
    %cst_298 = arith.constant dense<0.000000e+00> : vector<8x32xf32>
    %678 = tpu.matmul %675, %422, %cst_298 {dimension_numbers = #tpu.dot_dimension_numbers<[1], [0], [0], [1], [0, 0, 1, 1], [], []>} : vector<8x32xbf16>, vector<32x32xbf16>, vector<8x32xf32> -> vector<8x32xf32>
    %679 = arith.addf %677, %678 : vector<8x32xf32>
    %680 = arith.index_cast %674 : i32 to index
    %c0_299 = arith.constant 0 : index
    %681 = vector.load %arg17[%680, %c0_299] : memref<64x32xf32, #tpu.memory_space<vmem>>, vector<8x32xf32>
    %cst_300 = arith.constant dense<0.000000e+00> : vector<8x32xf32>
    %682 = tpu.matmul %675, %424, %cst_300 {dimension_numbers = #tpu.dot_dimension_numbers<[1], [0], [0], [1], [0, 0, 1, 1], [], []>} : vector<8x32xbf16>, vector<32x32xbf16>, vector<8x32xf32> -> vector<8x32xf32>
    %683 = arith.addf %681, %682 : vector<8x32xf32>
    %684 = arith.index_cast %674 : i32 to index
    %c0_301 = arith.constant 0 : index
    %685 = vector.load %arg18[%684, %c0_301] : memref<64x32xf32, #tpu.memory_space<vmem>>, vector<8x32xf32>
    %cst_302 = arith.constant dense<0.000000e+00> : vector<8x32xf32>
    %686 = tpu.matmul %675, %426, %cst_302 {dimension_numbers = #tpu.dot_dimension_numbers<[1], [0], [0], [1], [0, 0, 1, 1], [], []>} : vector<8x32xbf16>, vector<32x32xbf16>, vector<8x32xf32> -> vector<8x32xf32>
    %687 = arith.addf %685, %686 : vector<8x32xf32>
    %688 = arith.index_cast %674 : i32 to index
    %c0_303 = arith.constant 0 : index
    %689 = vector.load %arg19[%688, %c0_303] : memref<64x32xf32, #tpu.memory_space<vmem>>, vector<8x32xf32>
    %cst_304 = arith.constant dense<0.000000e+00> : vector<8x32xf32>
    %690 = tpu.matmul %675, %428, %cst_304 {dimension_numbers = #tpu.dot_dimension_numbers<[1], [0], [0], [1], [0, 0, 1, 1], [], []>} : vector<8x32xbf16>, vector<32x32xbf16>, vector<8x32xf32> -> vector<8x32xf32>
    %691 = arith.addf %689, %690 : vector<8x32xf32>
    %692 = arith.negf %679 : vector<8x32xf32>
    %693 = math.exp %692 : vector<8x32xf32>
    %cst_305 = arith.constant 1.000000e+00 : f32
    %694 = vector.broadcast %cst_305 : f32 to vector<8x32xf32>
    %695 = arith.addf %694, %693 : vector<8x32xf32>
    %696 = arith.divf %694, %695 : vector<8x32xf32>
    %697 = arith.negf %683 : vector<8x32xf32>
    %698 = math.exp %697 : vector<8x32xf32>
    %cst_306 = arith.constant 1.000000e+00 : f32
    %699 = vector.broadcast %cst_306 : f32 to vector<8x32xf32>
    %700 = arith.addf %699, %698 : vector<8x32xf32>
    %701 = arith.divf %699, %700 : vector<8x32xf32>
    %702 = arith.negf %691 : vector<8x32xf32>
    %703 = math.exp %702 : vector<8x32xf32>
    %cst_307 = arith.constant 1.000000e+00 : f32
    %704 = vector.broadcast %cst_307 : f32 to vector<8x32xf32>
    %705 = arith.addf %704, %703 : vector<8x32xf32>
    %706 = arith.divf %704, %705 : vector<8x32xf32>
    %707 = math.tanh %687 : vector<8x32xf32>
    %708 = arith.mulf %701, %670 : vector<8x32xf32>
    %709 = arith.mulf %696, %707 : vector<8x32xf32>
    %710 = arith.addf %708, %709 : vector<8x32xf32>
    %711 = math.tanh %710 : vector<8x32xf32>
    %712 = arith.mulf %706, %711 : vector<8x32xf32>
    %c7_i32_308 = arith.constant 7 : i32
    %c8_i32_309 = arith.constant 8 : i32
    %713 = arith.muli %c7_i32_308, %c8_i32_309 : i32
    %714 = tpu.assume_multiple %713, 8 : i32
    %715 = arith.truncf %712 : vector<8x32xf32> to vector<8x32xbf16>
    %716 = arith.index_cast %714 : i32 to index
    %c0_310 = arith.constant 0 : index
    %717 = vector.load %arg16[%716, %c0_310] : memref<64x32xf32, #tpu.memory_space<vmem>>, vector<8x32xf32>
    %cst_311 = arith.constant dense<0.000000e+00> : vector<8x32xf32>
    %718 = tpu.matmul %715, %422, %cst_311 {dimension_numbers = #tpu.dot_dimension_numbers<[1], [0], [0], [1], [0, 0, 1, 1], [], []>} : vector<8x32xbf16>, vector<32x32xbf16>, vector<8x32xf32> -> vector<8x32xf32>
    %719 = arith.addf %717, %718 : vector<8x32xf32>
    %720 = arith.index_cast %714 : i32 to index
    %c0_312 = arith.constant 0 : index
    %721 = vector.load %arg17[%720, %c0_312] : memref<64x32xf32, #tpu.memory_space<vmem>>, vector<8x32xf32>
    %cst_313 = arith.constant dense<0.000000e+00> : vector<8x32xf32>
    %722 = tpu.matmul %715, %424, %cst_313 {dimension_numbers = #tpu.dot_dimension_numbers<[1], [0], [0], [1], [0, 0, 1, 1], [], []>} : vector<8x32xbf16>, vector<32x32xbf16>, vector<8x32xf32> -> vector<8x32xf32>
    %723 = arith.addf %721, %722 : vector<8x32xf32>
    %724 = arith.index_cast %714 : i32 to index
    %c0_314 = arith.constant 0 : index
    %725 = vector.load %arg18[%724, %c0_314] : memref<64x32xf32, #tpu.memory_space<vmem>>, vector<8x32xf32>
    %cst_315 = arith.constant dense<0.000000e+00> : vector<8x32xf32>
    %726 = tpu.matmul %715, %426, %cst_315 {dimension_numbers = #tpu.dot_dimension_numbers<[1], [0], [0], [1], [0, 0, 1, 1], [], []>} : vector<8x32xbf16>, vector<32x32xbf16>, vector<8x32xf32> -> vector<8x32xf32>
    %727 = arith.addf %725, %726 : vector<8x32xf32>
    %728 = arith.index_cast %714 : i32 to index
    %c0_316 = arith.constant 0 : index
    %729 = vector.load %arg19[%728, %c0_316] : memref<64x32xf32, #tpu.memory_space<vmem>>, vector<8x32xf32>
    %cst_317 = arith.constant dense<0.000000e+00> : vector<8x32xf32>
    %730 = tpu.matmul %715, %428, %cst_317 {dimension_numbers = #tpu.dot_dimension_numbers<[1], [0], [0], [1], [0, 0, 1, 1], [], []>} : vector<8x32xbf16>, vector<32x32xbf16>, vector<8x32xf32> -> vector<8x32xf32>
    %731 = arith.addf %729, %730 : vector<8x32xf32>
    %732 = arith.negf %719 : vector<8x32xf32>
    %733 = math.exp %732 : vector<8x32xf32>
    %cst_318 = arith.constant 1.000000e+00 : f32
    %734 = vector.broadcast %cst_318 : f32 to vector<8x32xf32>
    %735 = arith.addf %734, %733 : vector<8x32xf32>
    %736 = arith.divf %734, %735 : vector<8x32xf32>
    %737 = arith.negf %723 : vector<8x32xf32>
    %738 = math.exp %737 : vector<8x32xf32>
    %cst_319 = arith.constant 1.000000e+00 : f32
    %739 = vector.broadcast %cst_319 : f32 to vector<8x32xf32>
    %740 = arith.addf %739, %738 : vector<8x32xf32>
    %741 = arith.divf %739, %740 : vector<8x32xf32>
    %742 = arith.negf %731 : vector<8x32xf32>
    %743 = math.exp %742 : vector<8x32xf32>
    %cst_320 = arith.constant 1.000000e+00 : f32
    %744 = vector.broadcast %cst_320 : f32 to vector<8x32xf32>
    %745 = arith.addf %744, %743 : vector<8x32xf32>
    %746 = arith.divf %744, %745 : vector<8x32xf32>
    %747 = math.tanh %727 : vector<8x32xf32>
    %748 = arith.mulf %741, %710 : vector<8x32xf32>
    %749 = arith.mulf %736, %747 : vector<8x32xf32>
    %750 = arith.addf %748, %749 : vector<8x32xf32>
    %751 = math.tanh %750 : vector<8x32xf32>
    %752 = arith.mulf %746, %751 : vector<8x32xf32>
    %c8_i32_321 = arith.constant 8 : i32
    %c1_322 = arith.constant 1 : index
    %c0_323 = arith.constant 0 : index
    %c0_324 = arith.constant 0 : index
    %753 = vector.load %arg14[%c1_322, %c0_323, %c0_324] : memref<2x8x32xf32, #tpu.memory_space<vmem>>, vector<1x8x32xf32>
    %754 = vector.shape_cast %753 : vector<1x8x32xf32> to vector<8x32xf32>
    %755 = vector.shape_cast %752 : vector<8x32xf32> to vector<1x8x32xf32>
    tpu.vector_store %arg14[%c1_322, %c0_323, %c0_324], %755 {strides = array<i32>} : memref<2x8x32xf32, #tpu.memory_space<vmem>>, vector<1x8x32xf32>,
    %c1_325 = arith.constant 1 : index
    %c0_326 = arith.constant 0 : index
    %c0_327 = arith.constant 0 : index
    %756 = vector.load %arg15[%c1_325, %c0_326, %c0_327] : memref<2x8x32xf32, #tpu.memory_space<vmem>>, vector<1x8x32xf32>
    %757 = vector.shape_cast %756 : vector<1x8x32xf32> to vector<8x32xf32>
    %758 = vector.shape_cast %750 : vector<8x32xf32> to vector<1x8x32xf32>
    tpu.vector_store %arg15[%c1_325, %c0_326, %c0_327], %758 {strides = array<i32>} : memref<2x8x32xf32, #tpu.memory_space<vmem>>, vector<1x8x32xf32>,
    %759 = arith.truncf %752 : vector<8x32xf32> to vector<8x32xbf16>
    %c0_328 = arith.constant 0 : index
    %c0_329 = arith.constant 0 : index
    %760 = vector.load %arg9[%c0_328, %c0_329] : memref<32x32xbf16, #tpu.memory_space<vmem>>, vector<32x32xbf16>
    %cst_330 = arith.constant dense<0.000000e+00> : vector<8x32xf32>
    %761 = tpu.matmul %759, %760, %cst_330 {dimension_numbers = #tpu.dot_dimension_numbers<[1], [0], [0], [1], [0, 0, 1, 1], [], []>} : vector<8x32xbf16>, vector<32x32xbf16>, vector<8x32xf32> -> vector<8x32xf32>
    %c0_331 = arith.constant 0 : index
    %c0_332 = arith.constant 0 : index
    %762 = vector.load %arg10[%c0_331, %c0_332] : memref<1x32xf32, #tpu.memory_space<vmem>>, vector<1x32xf32>
    %763 = vector.broadcast %762 : vector<1x32xf32> to vector<8x32xf32>
    %764 = arith.addf %761, %763 : vector<8x32xf32>
    %cst_333 = arith.constant 0.000000e+00 : f32
    %765 = vector.broadcast %cst_333 : f32 to vector<8x32xf32>
    %766 = arith.maximumf %764, %765 : vector<8x32xf32>
    %767 = arith.truncf %766 : vector<8x32xf32> to vector<8x32xbf16>
    %c0_334 = arith.constant 0 : index
    %c0_335 = arith.constant 0 : index
    %768 = vector.load %arg11[%c0_334, %c0_335] : memref<32x4xbf16, #tpu.memory_space<vmem>>, vector<32x4xbf16>
    %cst_336 = arith.constant dense<0.000000e+00> : vector<8x4xf32>
    %769 = tpu.matmul %767, %768, %cst_336 {dimension_numbers = #tpu.dot_dimension_numbers<[1], [0], [0], [1], [0, 0, 1, 1], [], []>} : vector<8x32xbf16>, vector<32x4xbf16>, vector<8x4xf32> -> vector<8x4xf32>
    %c0_337 = arith.constant 0 : index
    %c0_338 = arith.constant 0 : index
    %770 = vector.load %arg12[%c0_337, %c0_338] : memref<1x4xf32, #tpu.memory_space<vmem>>, vector<1x4xf32>
    %771 = vector.broadcast %770 : vector<1x4xf32> to vector<8x4xf32>
    %772 = arith.addf %769, %771 : vector<8x4xf32>
    %c0_339 = arith.constant 0 : index
    %c0_340 = arith.constant 0 : index
    %773 = vector.load %arg13[%c0_339, %c0_340] : memref<8x4xf32, #tpu.memory_space<vmem>>, vector<8x4xf32>
    tpu.vector_store %arg13[%c0_339, %c0_340], %772 {strides = array<i32>} : memref<8x4xf32, #tpu.memory_space<vmem>>, vector<8x4xf32>,
    return
  }
}

</mosaic_0001>

<bundles_post_ra>
// kernel: lstm03d_forward.3
= control target key start
LH: loop header
LB: loop body
LE: loop exit
PB: predicated region body
PF: predicated region fallthrough
CT: control target
= control target key end

     0   :  { %vm91_vm0 = vcmask 130048   ;;  %v5748_v8 = vmov 0.0   ;;  %vm5749_vm1 = vmmov 0   ;;  %vm169_vm2 = vcmask 261120   ;;  %s6755_s1 = inlined_call_operand.vmem [shape: bf16[4,16,32], index: 1, kind: input, shape index: {}]   ;;  %s6756_s0 = inlined_call_operand.vmem [shape: bf16[64,16], index: 0, kind: input, shape index: {}]   ;;  %s6757_s2 = inlined_call_operand.vmem [shape: bf16[4,32,32], index: 2, kind: input, shape index: {}]   ;;  %s6758_s7 = inlined_call_operand.vmem [shape: f32[2,8,32], index: 7, kind: input, shape index: {}]   ;;  %s6759_s3 = inlined_call_operand.vmem [shape: f32[4,1,32], index: 3, kind: input, shape index: {}]   ;;  %s6760_s8 = inlined_call_operand.vmem [shape: f32[2,8,32], index: 8, kind: input, shape index: {}]   ;;  %s6761_s4 = inlined_call_operand.vmem [shape: bf16[4,32,32], index: 4, kind: input, shape index: {}]   ;;  %s6762_s5 = inlined_call_operand.vmem [shape: bf16[4,32,32], index: 5, kind: input, shape index: {}]   ;;  %s6763_s6 = inlined_call_operand.vmem [shape: f32[4,1,32], index: 6, kind: input, shape index: {}]   ;;  %s6764_s15 = inlined_call_operand.vmem [shape: f32[2,8,32], index: 15, kind: output, shape index: {2}]   ;;  %s6765_s14 = inlined_call_operand.vmem [shape: f32[2,8,32], index: 14, kind: output, shape index: {1}]   ;;  %s6766_s9 = inlined_call_operand.vmem [shape: bf16[32,32], index: 9, kind: input, shape index: {}]   ;;  %s6767_s11 = inlined_call_operand.vmem [shape: bf16[32,4], index: 11, kind: input, shape index: {}]   ;;  %s6768_s10 = inlined_call_operand.vmem [shape: f32[1,32], index: 10, kind: input, shape index: {}]   ;;  %s6769_s12 = inlined_call_operand.vmem [shape: f32[1,4], index: 12, kind: input, shape index: {}]   ;;  %s6770_s13 = inlined_call_operand.vmem [shape: f32[8,4], index: 13, kind: output, shape index: {0}]  }
   0x1   :  { %v5440_v0 = vld [vmem:[%s6755_s1] sm:$0xff]   ;;  %v5441_v1 = vld [vmem:[%s6755_s1 + $0x8] sm:$0xff]   ;;  %v5444_v4 = vld [vmem:[%s6755_s1 + $0x10] sm:$0xff]   ;;  %vm4322_vm3 = vcmask 31744  }
   0x2   :  { %4822 = vmatprep.subr.bf16.mxu0 %v5440_v0  ;;  %v5442_v2 = vld [vmem:[%s6756_s0] sm:$0xff]   ;;  %4832 = vmatprep.subr.bf16.mxu1 %v5441_v1  ;;  %v5443_v3 = vld [vmem:[%s6756_s0 + $0x8] sm:$0xff]   ;;  %v5445_v5 = vld [vmem:[%s6755_s1 + $0x18] sm:$0xff]  }
   0x3   :  { %4823 = vmatpush3.bf16.msra.mxu0 %v5440_v0  ;;  %4833 = vmatpush3.bf16.msra.mxu1 %v5441_v1  ;;  %v5446_v6 = vld [vmem:[%s6756_s0 + $0x10] sm:$0xff]   ;;  %v5447_v7 = vld [vmem:[%s6756_s0 + $0x18] sm:$0xff]   ;;  %v5869_v9 = vld [vmem:[%s6757_s2] sm:$0xff]  }
   0x4   :  { %4824 = vmatprep.mubr.msk.bf16.mxu0 %vm91_vm0, %v5442_v2  ;;  %4834 = vmatprep.mubr.msk.bf16.mxu1 %vm91_vm0, %v5442_v2  ;;  %v5874_v10 = vld [vmem:[%s6757_s2 + $0x10] sm:$0xff]   ;;  %v5882_v11 = vld [vmem:[%s6757_s2 + $0x8] sm:$0xff]   ;;  %v5889_v12 = vld [vmem:[%s6757_s2 + $0x18] sm:$0xff]  }
   0x5   :  { %4842 = vmatprep.subr.bf16.mxu0 %v5444_v4  ;;  %4852 = vmatprep.subr.bf16.mxu1 %v5445_v5  ;;  %v467_v13 = vld [vmem:[%s6758_s7] sm:$0xff]  ;;  %v5915_v16 = vld [vmem:[%s6757_s2 + $0x30] sm:$0xff]   ;;  %v5923_v17 = vld [vmem:[%s6757_s2 + $0x28] sm:$0xff]  }
   0x6   :  { %4825 = vmatmul.mubr.msk.bf16.vlgmr.msra.gmra.mrb[0].mxu0 %vm91_vm0, %v5443_v3  ;;  %4835 = vmatmul.mubr.msk.bf16.vlgmr.msra.gmra.mrb[0].mxu1 %vm91_vm0, %v5443_v3  ;;  %v469_v14 = vpack.c.bf16 %v467_v13, %v467_v13  ;;  %v5910_v15 = vld [vmem:[%s6757_s2 + $0x20] sm:$0xff]   ;;  %v5930_v18 = vld [vmem:[%s6757_s2 + $0x38] sm:$0xff]  }
   0x7   :  { %4843 = vmatpush3.bf16.msra.mxu0 %v5444_v4  ;;  %4853 = vmatpush3.bf16.msra.mxu1 %v5445_v5  ;;  %v4336_v19 = vld [vmem:[%s6759_s3] ss:$0 sm:$0xff]  ;;  %v4349_v20 = vld [vmem:[%s6759_s3 + $0x1] ss:$0 sm:$0xff]  ;;  %v4358_v53 = vld [vmem:[%s6759_s3 + $0x2] ss:$0 sm:$0xff] }
   0x8   :  { %4828 = vmatprep.mubr.msk.bf16.mxu0 %vm91_vm0, %v5446_v6  ;;  %4838 = vmatprep.mubr.msk.bf16.mxu1 %vm91_vm0, %v5446_v6  ;;  %v4367_v54 = vld [vmem:[%s6759_s3 + $0x3] ss:$0 sm:$0xff] }
   0x9   :  { %4862 = vmatprep.subr.bf16.mxu0 %v5748_v8  ;;  %4870 = vmatprep.subr.bf16.mxu1 %v5748_v8 }
   0xe   :  { %4829 = vmatmul.mubr.msk.bf16.gmra.mrb[4].mxu0 %vm91_vm0, %v5447_v7  ;;  %4839 = vmatmul.mubr.msk.bf16.gmra.mrb[4].mxu1 %vm91_vm0, %v5447_v7 }
   0xf   :  { %4844 = vmatprep.mubr.msk.bf16.mxu0 %vm91_vm0, %v5442_v2  ;;  %4854 = vmatprep.mubr.msk.bf16.mxu1 %vm91_vm0, %v5442_v2 }
  0x16   :  { %4845 = vmatmul.mubr.msk.bf16.vlgmr.msra.gmra.mrb[8].mxu0 %vm91_vm0, %v5443_v3  ;;  %4855 = vmatmul.mubr.msk.bf16.vlgmr.msra.gmra.mrb[8].mxu1 %vm91_vm0, %v5443_v3 }
  0x17   :  { %4863 = vmatpush3.bf16.msra.mxu0 %v5869_v9  ;;  %4871 = vmatpush3.bf16.msra.mxu1 %v5874_v10 }
  0x18   :  { %4848 = vmatprep.mubr.msk.bf16.mxu0 %vm91_vm0, %v5446_v6  ;;  %4858 = vmatprep.mubr.msk.bf16.mxu1 %vm91_vm0, %v5446_v6 }
  0x19   :  { %4864 = vmatprep.subr.bf16.mxu0 %v5748_v8  ;;  %4872 = vmatprep.subr.bf16.mxu1 %v5748_v8 }
  0x1b   :  { %4865 = vmatpush3.bf16.msra.mxu0 %v5882_v11  ;;  %4873 = vmatpush3.bf16.msra.mxu1 %v5889_v12 }
  0x1c   :  { %4878 = vmatprep.subr.bf16.mxu0 %v5748_v8  ;;  %4886 = vmatprep.subr.bf16.mxu1 %v5748_v8 }
  0x1e   :  { %4849 = vmatmul.mubr.msk.bf16.gmra.mrb[12].mxu0 %vm91_vm0, %v5447_v7  ;;  %4859 = vmatmul.mubr.msk.bf16.gmra.mrb[12].mxu1 %vm91_vm0, %v5447_v7 }
  0x1f   :  { %4866 = vmatprep.mubr.msk.bf16.mxu0 %vm5749_vm1, %v5748_v8  ;;  %4874 = vmatprep.mubr.msk.bf16.mxu1 %vm5749_vm1, %v5748_v8 }
  0x26   :  { %4867 = vmatmul.mubr.msk.bf16.vlgmr.msra.gmra.mrb[16].mxu0 %vm169_vm2, %v469_v14  ;;  %4875 = vmatmul.mubr.msk.bf16.vlgmr.msra.gmra.mrb[16].mxu1 %vm169_vm2, %v469_v14 }
  0x27   :  { %4879 = vmatpush3.bf16.msra.mxu0 %v5910_v15  ;;  %4887 = vmatpush3.bf16.msra.mxu1 %v5915_v16 }
  0x28   :  { %4880 = vmatprep.subr.bf16.mxu0 %v5748_v8  ;;  %4888 = vmatprep.subr.bf16.mxu1 %v5748_v8 }
  0x29   :  { %4882 = vmatprep.mubr.msk.bf16.mxu0 %vm5749_vm1, %v5748_v8  ;;  %4890 = vmatprep.mubr.msk.bf16.mxu1 %vm5749_vm1, %v5748_v8 }
  0x2b   :  { %4881 = vmatpush3.bf16.msra.mxu0 %v5923_v17  ;;  %4889 = vmatpush3.bf16.msra.mxu1 %v5930_v18 }
  0x2c   :  { %4894 = vmatprep.subr.bf16.mxu0 %v5748_v8  ;;  %4902 = vmatprep.subr.bf16.mxu1 %v5748_v8 }
  0x2e   :  { %4883 = vmatmul.mubr.msk.bf16.vlgmr.msra.gmra.mrb[20].mxu0 %vm169_vm2, %v469_v14  ;;  %4891 = vmatmul.mubr.msk.bf16.vlgmr.msra.gmra.mrb[20].mxu1 %vm169_vm2, %v469_v14 }
  0x2f   :  { %4895 = vmatpush3.bf16.msra.mxu0 %v5869_v9  ;;  %4903 = vmatpush3.bf16.msra.mxu1 %v5874_v10 }
  0x30   :  { %4896 = vmatprep.subr.bf16.mxu0 %v5748_v8  ;;  %4904 = vmatprep.subr.bf16.mxu1 %v5748_v8 }
  0x31   :  { %4898 = vmatprep.mubr.msk.bf16.mxu0 %vm5749_vm1, %v5748_v8  ;;  %4906 = vmatprep.mubr.msk.bf16.mxu1 %vm5749_vm1, %v5748_v8 }
  0x33   :  { %4897 = vmatpush3.bf16.msra.mxu0 %v5882_v11  ;;  %4905 = vmatpush3.bf16.msra.mxu1 %v5889_v12 }
  0x34   :  { %4910 = vmatprep.subr.bf16.mxu0 %v5748_v8  ;;  %4918 = vmatprep.subr.bf16.mxu1 %v5748_v8 }
  0xd9   :  { %v4826_v21 = vpop.f32.mrb[0].mxu0  ;;  %v4836_v23 = vpop.f32.mrb[0].mxu1 }
  0xda   :  { %v147_v22 = vadd.f32 %v4826_v21, %v4336_v19  ;;  %v138_v24 = vpop.f32.mrb[1].mxu0  ;;  %v238_v25 = vadd.f32 %v4836_v23, %v4349_v20  ;;  %v229_v27 = vpop.f32.mrb[1].mxu1 }
  0xdb   :  { %v139_v26 = vadd.f32 %v4336_v19, %v138_v24  ;;  %v4827_v28 = vpop.f32.mrb[2].mxu0  ;;  %v230_v29 = vadd.f32 %v4349_v20, %v229_v27  ;;  %v4837_v31 = vpop.f32.mrb[2].mxu1 }
  0xdc   :  { %172 = vst.msk [vmem:[#allocation2 + $0x10] sm:$0xff] %vm169_vm2, %v147_v22  ;;  %v150_v30 = vadd.f32 %v4827_v28, %v4336_v19  ;;  %v141_v32 = vpop.f32.mrb[3].mxu0  ;;  %262 = vst.msk [vmem:[#allocation3 + $0x10] sm:$0xff] %vm169_vm2, %v238_v25  ;;  %v241_v33 = vadd.f32 %v4837_v31, %v4349_v20  ;;  %v232_v35 = vpop.f32.mrb[3].mxu1 }
  0xdd   :  { %170 = vst.msk [vmem:[#allocation2] sm:$0xff] %vm169_vm2, %v139_v26  ;;  %v142_v34 = vadd.f32 %v4336_v19, %v141_v32  ;;  %260 = vst.msk [vmem:[#allocation3] sm:$0xff] %vm169_vm2, %v230_v29  ;;  %v233_v36 = vadd.f32 %v4349_v20, %v232_v35 }
  0xde   :  { %173 = vst.msk [vmem:[#allocation2 + $0x18] sm:$0xff] %vm169_vm2, %v150_v30  ;;  %263 = vst.msk [vmem:[#allocation3 + $0x18] sm:$0xff] %vm169_vm2, %v241_v33 }
  0xdf   :  { %171 = vst.msk [vmem:[#allocation2 + $0x8] sm:$0xff] %vm169_vm2, %v142_v34  ;;  %261 = vst.msk [vmem:[#allocation3 + $0x8] sm:$0xff] %vm169_vm2, %v233_v36 }
  0xe1   :  { %v4830_v37 = vpop.f32.mrb[4].mxu0  ;;  %v4840_v39 = vpop.f32.mrb[4].mxu1 }
  0xe2   :  { %v163_v38 = vadd.f32 %v4830_v37, %v4336_v19  ;;  %v154_v40 = vpop.f32.mrb[5].mxu0  ;;  %v254_v41 = vadd.f32 %v4840_v39, %v4349_v20  ;;  %v245_v43 = vpop.f32.mrb[5].mxu1 }
  0xe3   :  { %v155_v42 = vadd.f32 %v4336_v19, %v154_v40  ;;  %v4831_v44 = vpop.f32.mrb[6].mxu0  ;;  %v246_v45 = vadd.f32 %v4349_v20, %v245_v43  ;;  %v4841_v47 = vpop.f32.mrb[6].mxu1 }
  0xe4   :  { %176 = vst.msk [vmem:[#allocation2 + $0x30] sm:$0xff] %vm169_vm2, %v163_v38  ;;  %v166_v46 = vadd.f32 %v4831_v44, %v4336_v19  ;;  %v157_v48 = vpop.f32.mrb[7].mxu0  ;;  %266 = vst.msk [vmem:[#allocation3 + $0x30] sm:$0xff] %vm169_vm2, %v254_v41  ;;  %v257_v49 = vadd.f32 %v4841_v47, %v4349_v20  ;;  %v248_v51 = vpop.f32.mrb[7].mxu1  ;;  %v470_v32 = vld [vmem:[#allocation2] sm:$0xff] }
  0xe5   :  { %174 = vst.msk [vmem:[#allocation2 + $0x20] sm:$0xff] %vm169_vm2, %v155_v42  ;;  %v158_v50 = vadd.f32 %v4336_v19, %v157_v48  ;;  %264 = vst.msk [vmem:[#allocation3 + $0x20] sm:$0xff] %vm169_vm2, %v246_v45  ;;  %v249_v52 = vadd.f32 %v4349_v20, %v248_v51  ;;  %v527_v35 = vld [vmem:[#allocation3] sm:$0xff] }
  0xe6   :  { %177 = vst.msk [vmem:[#allocation2 + $0x38] sm:$0xff] %vm169_vm2, %v166_v46  ;;  %267 = vst.msk [vmem:[#allocation3 + $0x38] sm:$0xff] %vm169_vm2, %v257_v49 }
  0xe7   :  { %175 = vst.msk [vmem:[#allocation2 + $0x28] sm:$0xff] %vm169_vm2, %v158_v50  ;;  %265 = vst.msk [vmem:[#allocation3 + $0x28] sm:$0xff] %vm169_vm2, %v249_v52 }
  0xe9   :  { %v4846_v55 = vpop.f32.mrb[8].mxu0  ;;  %v4856_v57 = vpop.f32.mrb[8].mxu1 }
  0xea   :  { %v328_v56 = vadd.f32 %v4846_v55, %v4358_v53  ;;  %v319_v58 = vpop.f32.mrb[9].mxu0  ;;  %v418_v59 = vadd.f32 %v4856_v57, %v4367_v54  ;;  %v409_v61 = vpop.f32.mrb[9].mxu1 }
  0xeb   :  { %v320_v60 = vadd.f32 %v4358_v53, %v319_v58  ;;  %v4847_v62 = vpop.f32.mrb[10].mxu0  ;;  %v410_v63 = vadd.f32 %v4367_v54, %v409_v61  ;;  %v4857_v1 = vpop.f32.mrb[10].mxu1 }
  0xec   :  { %352 = vst.msk [vmem:[#allocation4 + $0x10] sm:$0xff] %vm169_vm2, %v328_v56  ;;  %v331_v0 = vadd.f32 %v4847_v62, %v4358_v53  ;;  %v322_v2 = vpop.f32.mrb[11].mxu0  ;;  %442 = vst.msk [vmem:[#allocation5 + $0x10] sm:$0xff] %vm169_vm2, %v418_v59  ;;  %v421_v3 = vadd.f32 %v4857_v1, %v4367_v54  ;;  %v412_v5 = vpop.f32.mrb[11].mxu1  ;;  %v468_v1 = vld [vmem:[%s6760_s8] sm:$0xff] }
  0xed   :  { %350 = vst.msk [vmem:[#allocation4] sm:$0xff] %vm169_vm2, %v320_v60  ;;  %v323_v4 = vadd.f32 %v4358_v53, %v322_v2  ;;  %440 = vst.msk [vmem:[#allocation5] sm:$0xff] %vm169_vm2, %v410_v63  ;;  %v413_v6 = vadd.f32 %v4367_v54, %v412_v5 }
  0xee   :  { %353 = vst.msk [vmem:[#allocation4 + $0x18] sm:$0xff] %vm169_vm2, %v331_v0  ;;  %443 = vst.msk [vmem:[#allocation5 + $0x18] sm:$0xff] %vm169_vm2, %v421_v3 }
  0xef   :  { %351 = vst.msk [vmem:[#allocation4 + $0x8] sm:$0xff] %vm169_vm2, %v323_v4  ;;  %441 = vst.msk [vmem:[#allocation5 + $0x8] sm:$0xff] %vm169_vm2, %v413_v6 }
  0xf1   :  { %v4850_v7 = vpop.f32.mrb[12].mxu0  ;;  %v4860_v14 = vpop.f32.mrb[12].mxu1 }
  0xf2   :  { %v344_v13 = vadd.f32 %v4850_v7, %v4358_v53  ;;  %v335_v19 = vpop.f32.mrb[13].mxu0  ;;  %v434_v20 = vadd.f32 %v4860_v14, %v4367_v54  ;;  %v425_v22 = vpop.f32.mrb[13].mxu1 }
  0xf3   :  { %v336_v21 = vadd.f32 %v4358_v53, %v335_v19  ;;  %v4851_v23 = vpop.f32.mrb[14].mxu0  ;;  %v426_v24 = vadd.f32 %v4367_v54, %v425_v22  ;;  %v4861_v26 = vpop.f32.mrb[14].mxu1 }
  0xf4   :  { %356 = vst.msk [vmem:[#allocation4 + $0x30] sm:$0xff] %vm169_vm2, %v344_v13  ;;  %v347_v25 = vadd.f32 %v4851_v23, %v4358_v53  ;;  %v338_v27 = vpop.f32.mrb[15].mxu0  ;;  %446 = vst.msk [vmem:[#allocation5 + $0x30] sm:$0xff] %vm169_vm2, %v434_v20  ;;  %v437_v28 = vadd.f32 %v4861_v26, %v4367_v54  ;;  %v428_v30 = vpop.f32.mrb[15].mxu1  ;;  %v635_v47 = vld [vmem:[#allocation5] sm:$0xff]  ;;  %v762_v23 = vld [vmem:[#allocation3 + $0x8] sm:$0xff] }
  0xf5   :  { %354 = vst.msk [vmem:[#allocation4 + $0x20] sm:$0xff] %vm169_vm2, %v336_v21  ;;  %v339_v29 = vadd.f32 %v4358_v53, %v338_v27  ;;  %444 = vst.msk [vmem:[#allocation5 + $0x20] sm:$0xff] %vm169_vm2, %v426_v24  ;;  %v429_v31 = vadd.f32 %v4367_v54, %v428_v30  ;;  %v581_v55 = vld [vmem:[#allocation4] sm:$0xff]  ;;  %v716_v21 = vld [vmem:[#allocation2 + $0x8] sm:$0xff] }
  0xf6   :  { %357 = vst.msk [vmem:[#allocation4 + $0x38] sm:$0xff] %vm169_vm2, %v347_v25  ;;  %447 = vst.msk [vmem:[#allocation5 + $0x38] sm:$0xff] %vm169_vm2, %v437_v28 }
  0xf7   :  { %355 = vst.msk [vmem:[#allocation4 + $0x28] sm:$0xff] %vm169_vm2, %v339_v29  ;;  %445 = vst.msk [vmem:[#allocation5 + $0x28] sm:$0xff] %vm169_vm2, %v429_v31 }
  0xf9   :  { %v520_v33 = vpop.f32.mrb[16].mxu0  ;;  %v574_v36 = vpop.f32.mrb[16].mxu1 }
  0xfa   :  { %v526_v34 = vadd.f32 %v520_v33, %v470_v32  ;;  %v4868_v37 = vpop.f32.mrb[17].mxu0  ;;  %v580_v38 = vadd.f32 %v574_v36, %v527_v35  ;;  %v4876_v39 = vpop.f32.mrb[17].mxu1  ;;  %v848_v36 = vld [vmem:[#allocation5 + $0x8] sm:$0xff] }
  0xfb   :  { %v523_v40 = vpop.f32.mrb[18].mxu0  ;;  %v577_v42 = vpop.f32.mrb[18].mxu1 }
  0xfc   :  { %v4397_v41 = vmul.f32 -1.442695, %v526_v34  ;;  %v4869_v43 = vpop.f32.mrb[19].mxu0  ;;  %v4398_v44 = vmul.f32 -1.442695, %v580_v38  ;;  %v4877_v45 = vpop.f32.mrb[19].mxu1 }
  0xfd   :  { %v805_v45 = vld [vmem:[#allocation4 + $0x8] sm:$0xff] }
  0xfe   :  { %5476 = vpow2.f32 %v4397_v41 }
  0xff   :  { %5478 = vpow2.f32 %v4398_v44 }
 0x101   :  { %v628_v46 = vpop.f32.mrb[20].mxu0  ;;  %v682_v48 = vpop.f32.mrb[20].mxu1 }
 0x102   :  { %v4884_v49 = vpop.f32.mrb[21].mxu0  ;;  %v688_v50 = vadd.f32 %v682_v48, %v635_v47  ;;  %v4892_v51 = vpop.f32.mrb[21].mxu1  ;;  %v634_v58 = vadd.f32 %v628_v46, %v581_v55 }
 0x103   :  { %v631_v52 = vpop.f32.mrb[22].mxu0  ;;  %v685_v53 = vpop.f32.mrb[22].mxu1 }
 0x104   :  { %v4885_v54 = vpop.f32.mrb[23].mxu0  ;;  %v4399_v56 = vmul.f32 -1.442695, %v688_v50  ;;  %v4893_v57 = vpop.f32.mrb[23].mxu1 }
 0x106   :  { %5480 = vpow2.f32 %v4399_v56 }
 0x107   :  { %5482 = vtanh.f32 %v634_v58 }
 0x108   :  { %v5477_v59 = vpop.eup %5476 }
 0x109   :  { %v5479_v60 = vpop.eup %5478  ;;  %v692_v61 = vadd.f32 1.0, %v5477_v59 }
 0x10a   :  { %v698_v62 = vadd.f32 1.0, %v5479_v60 }
 0x10b   :  { %5484 = vrcp.f32 %v692_v61 }
 0x10c   :  { %5486 = vrcp.f32 %v698_v62 }
 0x110   :  { %v5481_v63 = vpop.eup %5480 }
 0x111   :  { %v5483_v0 = vpop.eup %5482  ;;  %v704_v5 = vadd.f32 1.0, %v5481_v63 }
 0x113   :  { %5488 = vrcp.f32 %v704_v5 }
 0x115   :  { %v5485_v2 = vpop.eup %5484 }
 0x116   :  { %v5487_v3 = vpop.eup %5486  ;;  %v709_v4 = vmul.f32 %v5485_v2, %v5483_v0  ;;  %v918_v0 = vld [vmem:[#allocation2 + $0x10] sm:$0xff] }
 0x117   :  { %v708_v6 = vmul.f32 %v5487_v3, %v468_v1  ;;  %v964_v2 = vld [vmem:[#allocation3 + $0x10] sm:$0xff] }
 0x119   :  { %v6002_v7 = vadd.f32 %v709_v4, %v708_v6 }
 0x11b   :  { %5490 = vtanh.f32 %v6002_v7 }
 0x11d   :  { %v5489_v13 = vpop.eup %5488 }
 0x125   :  { %v5491_v14 = vpop.eup %5490 }
 0x126   :  { %v712_v19 = vmul.f32 %v5491_v14, %v5489_v13 }
 0x128   :  { %713 = vst.msk [vmem:[#allocation6] sm:$0xff] %vm169_vm2, %v712_v19  ;;  %v714_v20 = vpack.c.bf16 %v712_v19, %v712_v19 }
 0x12a   :  { %4899 = vmatmul.mubr.msk.bf16.vlgmr.msra.gmra.mrb[24].mxu0 %vm169_vm2, %v714_v20  ;;  %4907 = vmatmul.mubr.msk.bf16.vlgmr.msra.gmra.mrb[24].mxu1 %vm169_vm2, %v714_v20 }
 0x12b   :  { %4911 = vmatpush3.bf16.msra.mxu0 %v5910_v15  ;;  %4919 = vmatpush3.bf16.msra.mxu1 %v5915_v16 }
 0x12c   :  { %4912 = vmatprep.subr.bf16.mxu0 %v5748_v8  ;;  %4920 = vmatprep.subr.bf16.mxu1 %v5748_v8 }
 0x12d   :  { %4914 = vmatprep.mubr.msk.bf16.mxu0 %vm5749_vm1, %v5748_v8  ;;  %4922 = vmatprep.mubr.msk.bf16.mxu1 %vm5749_vm1, %v5748_v8 }
 0x12f   :  { %4913 = vmatpush3.bf16.msra.mxu0 %v5923_v17  ;;  %4921 = vmatpush3.bf16.msra.mxu1 %v5930_v18 }
 0x130   :  { %4926 = vmatprep.subr.bf16.mxu0 %v5748_v8  ;;  %4934 = vmatprep.subr.bf16.mxu1 %v5748_v8 }
 0x132   :  { %4915 = vmatmul.mubr.msk.bf16.vlgmr.msra.gmra.mrb[28].mxu0 %vm169_vm2, %v714_v20  ;;  %4923 = vmatmul.mubr.msk.bf16.vlgmr.msra.gmra.mrb[28].mxu1 %vm169_vm2, %v714_v20 }
 0x133   :  { %4927 = vmatpush3.bf16.msra.mxu0 %v5869_v9  ;;  %4935 = vmatpush3.bf16.msra.mxu1 %v5874_v10 }
 0x134   :  { %4928 = vmatprep.subr.bf16.mxu0 %v5748_v8  ;;  %4936 = vmatprep.subr.bf16.mxu1 %v5748_v8 }
 0x135   :  { %4930 = vmatprep.mubr.msk.bf16.mxu0 %vm5749_vm1, %v5748_v8  ;;  %4938 = vmatprep.mubr.msk.bf16.mxu1 %vm5749_vm1, %v5748_v8 }
 0x137   :  { %4929 = vmatpush3.bf16.msra.mxu0 %v5882_v11  ;;  %4937 = vmatpush3.bf16.msra.mxu1 %v5889_v12 }
 0x138   :  { %4942 = vmatprep.subr.bf16.mxu0 %v5748_v8  ;;  %4950 = vmatprep.subr.bf16.mxu1 %v5748_v8 }
 0x1fd   :  { %v754_v22 = vpop.f32.mrb[24].mxu0  ;;  %v797_v24 = vpop.f32.mrb[24].mxu1 }
 0x1fe   :  { %v760_v25 = vadd.f32 %v754_v22, %v716_v21  ;;  %v803_v26 = vadd.f32 %v797_v24, %v762_v23  ;;  %v4900_v27 = vpop.f32.mrb[25].mxu0  ;;  %v4908_v28 = vpop.f32.mrb[25].mxu1  ;;  %v1050_v24 = vld [vmem:[#allocation5 + $0x10] sm:$0xff] }
 0x1ff   :  { %v757_v29 = vpop.f32.mrb[26].mxu0  ;;  %v800_v30 = vpop.f32.mrb[26].mxu1 }
 0x200   :  { %v4404_v31 = vmul.f32 -1.442695, %v760_v25  ;;  %v4405_v32 = vmul.f32 -1.442695, %v803_v26  ;;  %v4901_v33 = vpop.f32.mrb[27].mxu0  ;;  %v4909_v34 = vpop.f32.mrb[27].mxu1 }
 0x201   :  { %v1007_v33 = vld [vmem:[#allocation4 + $0x10] sm:$0xff] }
 0x202   :  { %5492 = vpow2.f32 %v4404_v31 }
 0x203   :  { %5494 = vpow2.f32 %v4405_v32 }
 0x205   :  { %v840_v35 = vpop.f32.mrb[28].mxu0  ;;  %v883_v37 = vpop.f32.mrb[28].mxu1 }
 0x206   :  { %v889_v38 = vadd.f32 %v883_v37, %v848_v36  ;;  %v4916_v39 = vpop.f32.mrb[29].mxu0  ;;  %v4924_v40 = vpop.f32.mrb[29].mxu1  ;;  %v846_v47 = vadd.f32 %v840_v35, %v805_v45 }
 0x207   :  { %v843_v41 = vpop.f32.mrb[30].mxu0  ;;  %v886_v42 = vpop.f32.mrb[30].mxu1 }
 0x208   :  { %v4917_v43 = vpop.f32.mrb[31].mxu0  ;;  %v4925_v44 = vpop.f32.mrb[31].mxu1  ;;  %v4406_v46 = vmul.f32 -1.442695, %v889_v38 }
 0x20a   :  { %5496 = vpow2.f32 %v4406_v46 }
 0x20b   :  { %5498 = vtanh.f32 %v846_v47 }
 0x20c   :  { %v5493_v48 = vpop.eup %5492 }
 0x20d   :  { %v5495_v49 = vpop.eup %5494  ;;  %v893_v50 = vadd.f32 1.0, %v5493_v48 }
 0x20e   :  { %v899_v51 = vadd.f32 1.0, %v5495_v49 }
 0x20f   :  { %5500 = vrcp.f32 %v893_v50 }
 0x210   :  { %5502 = vrcp.f32 %v899_v51 }
 0x214   :  { %v5497_v52 = vpop.eup %5496 }
 0x215   :  { %v5499_v53 = vpop.eup %5498  ;;  %v905_v57 = vadd.f32 1.0, %v5497_v52  ;;  %v1120_v52 = vld [vmem:[#allocation2 + $0x18] sm:$0xff] }
 0x217   :  { %5504 = vrcp.f32 %v905_v57 }
 0x219   :  { %v5501_v54 = vpop.eup %5500 }
 0x21a   :  { %v5503_v55 = vpop.eup %5502  ;;  %v910_v56 = vmul.f32 %v5501_v54, %v5499_v53  ;;  %v1166_v54 = vld [vmem:[#allocation3 + $0x18] sm:$0xff] }
 0x21b   :  { %v909_v58 = vmul.f32 %v5503_v55, %v6002_v7 }
 0x21d   :  { %v6035_v59 = vadd.f32 %v910_v56, %v909_v58 }
 0x21f   :  { %5506 = vtanh.f32 %v6035_v59 }
 0x221   :  { %v5505_v60 = vpop.eup %5504 }
 0x229   :  { %v5507_v61 = vpop.eup %5506 }
 0x22a   :  { %v913_v62 = vmul.f32 %v5507_v61, %v5505_v60 }
 0x22c   :  { %915 = vst.msk [vmem:[#allocation6 + $0x8] sm:$0xff] %vm169_vm2, %v913_v62  ;;  %v916_v63 = vpack.c.bf16 %v913_v62, %v913_v62 }
 0x22e   :  { %4931 = vmatmul.mubr.msk.bf16.vlgmr.msra.gmra.mrb[32].mxu0 %vm169_vm2, %v916_v63  ;;  %4939 = vmatmul.mubr.msk.bf16.vlgmr.msra.gmra.mrb[32].mxu1 %vm169_vm2, %v916_v63 }
 0x22f   :  { %4943 = vmatpush3.bf16.msra.mxu0 %v5910_v15  ;;  %4951 = vmatpush3.bf16.msra.mxu1 %v5915_v16 }
 0x230   :  { %4944 = vmatprep.subr.bf16.mxu0 %v5748_v8  ;;  %4952 = vmatprep.subr.bf16.mxu1 %v5748_v8 }
 0x231   :  { %4946 = vmatprep.mubr.msk.bf16.mxu0 %vm5749_vm1, %v5748_v8  ;;  %4954 = vmatprep.mubr.msk.bf16.mxu1 %vm5749_vm1, %v5748_v8 }
 0x233   :  { %4945 = vmatpush3.bf16.msra.mxu0 %v5923_v17  ;;  %4953 = vmatpush3.bf16.msra.mxu1 %v5930_v18 }
 0x234   :  { %4958 = vmatprep.subr.bf16.mxu0 %v5748_v8  ;;  %4966 = vmatprep.subr.bf16.mxu1 %v5748_v8 }
 0x236   :  { %4947 = vmatmul.mubr.msk.bf16.vlgmr.msra.gmra.mrb[36].mxu0 %vm169_vm2, %v916_v63  ;;  %4955 = vmatmul.mubr.msk.bf16.vlgmr.msra.gmra.mrb[36].mxu1 %vm169_vm2, %v916_v63 }
 0x237   :  { %4959 = vmatpush3.bf16.msra.mxu0 %v5869_v9  ;;  %4967 = vmatpush3.bf16.msra.mxu1 %v5874_v10 }
 0x238   :  { %4960 = vmatprep.subr.bf16.mxu0 %v5748_v8  ;;  %4968 = vmatprep.subr.bf16.mxu1 %v5748_v8 }
 0x239   :  { %4962 = vmatprep.mubr.msk.bf16.mxu0 %vm5749_vm1, %v5748_v8  ;;  %4970 = vmatprep.mubr.msk.bf16.mxu1 %vm5749_vm1, %v5748_v8 }
 0x23b   :  { %4961 = vmatpush3.bf16.msra.mxu0 %v5882_v11  ;;  %4969 = vmatpush3.bf16.msra.mxu1 %v5889_v12 }
 0x23c   :  { %4974 = vmatprep.subr.bf16.mxu0 %v5748_v8  ;;  %4982 = vmatprep.subr.bf16.mxu1 %v5748_v8 }
 0x301   :  { %v956_v1 = vpop.f32.mrb[32].mxu0  ;;  %v999_v3 = vpop.f32.mrb[32].mxu1 }
 0x302   :  { %v962_v4 = vadd.f32 %v956_v1, %v918_v0  ;;  %v1005_v5 = vadd.f32 %v999_v3, %v964_v2  ;;  %v4932_v6 = vpop.f32.mrb[33].mxu0  ;;  %v4940_v7 = vpop.f32.mrb[33].mxu1  ;;  %v1252_v3 = vld [vmem:[#allocation5 + $0x18] sm:$0xff] }
 0x303   :  { %v959_v13 = vpop.f32.mrb[34].mxu0  ;;  %v1002_v14 = vpop.f32.mrb[34].mxu1 }
 0x304   :  { %v4411_v19 = vmul.f32 -1.442695, %v962_v4  ;;  %v4412_v20 = vmul.f32 -1.442695, %v1005_v5  ;;  %v4933_v21 = vpop.f32.mrb[35].mxu0  ;;  %v4941_v22 = vpop.f32.mrb[35].mxu1 }
 0x305   :  { %v1209_v21 = vld [vmem:[#allocation4 + $0x18] sm:$0xff] }
 0x306   :  { %5508 = vpow2.f32 %v4411_v19 }
 0x307   :  { %5510 = vpow2.f32 %v4412_v20 }
 0x309   :  { %v1042_v23 = vpop.f32.mrb[36].mxu0  ;;  %v1085_v25 = vpop.f32.mrb[36].mxu1 }
 0x30a   :  { %v1091_v26 = vadd.f32 %v1085_v25, %v1050_v24  ;;  %v4948_v27 = vpop.f32.mrb[37].mxu0  ;;  %v4956_v28 = vpop.f32.mrb[37].mxu1  ;;  %v1048_v35 = vadd.f32 %v1042_v23, %v1007_v33 }
 0x30b   :  { %v1045_v29 = vpop.f32.mrb[38].mxu0  ;;  %v1088_v30 = vpop.f32.mrb[38].mxu1 }
 0x30c   :  { %v4949_v31 = vpop.f32.mrb[39].mxu0  ;;  %v4957_v32 = vpop.f32.mrb[39].mxu1  ;;  %v4413_v34 = vmul.f32 -1.442695, %v1091_v26 }
 0x30e   :  { %5512 = vpow2.f32 %v4413_v34 }
 0x30f   :  { %5514 = vtanh.f32 %v1048_v35 }
 0x310   :  { %v5509_v36 = vpop.eup %5508 }
 0x311   :  { %v5511_v37 = vpop.eup %5510  ;;  %v1095_v38 = vadd.f32 1.0, %v5509_v36 }
 0x312   :  { %v1101_v39 = vadd.f32 1.0, %v5511_v37 }
 0x313   :  { %5516 = vrcp.f32 %v1095_v38 }
 0x314   :  { %5518 = vrcp.f32 %v1101_v39 }
 0x318   :  { %v5513_v40 = vpop.eup %5512 }
 0x319   :  { %v5515_v41 = vpop.eup %5514  ;;  %v1107_v45 = vadd.f32 1.0, %v5513_v40  ;;  %v1368_v40 = vld [vmem:[#allocation3 + $0x20] sm:$0xff] }
 0x31b   :  { %5520 = vrcp.f32 %v1107_v45 }
 0x31d   :  { %v5517_v42 = vpop.eup %5516 }
 0x31e   :  { %v5519_v43 = vpop.eup %5518  ;;  %v1112_v44 = vmul.f32 %v5517_v42, %v5515_v41 }
 0x31f   :  { %v1111_v46 = vmul.f32 %v5519_v43, %v6035_v59 }
 0x321   :  { %v6068_v47 = vadd.f32 %v1112_v44, %v1111_v46 }
 0x323   :  { %5522 = vtanh.f32 %v6068_v47 }
 0x325   :  { %v5521_v48 = vpop.eup %5520 }
 0x32d   :  { %v5523_v49 = vpop.eup %5522 }
 0x32e   :  { %v1115_v50 = vmul.f32 %v5523_v49, %v5521_v48 }
 0x330   :  { %1117 = vst.msk [vmem:[#allocation6 + $0x10] sm:$0xff] %vm169_vm2, %v1115_v50  ;;  %v1118_v51 = vpack.c.bf16 %v1115_v50, %v1115_v50 }
 0x332   :  { %4963 = vmatmul.mubr.msk.bf16.vlgmr.msra.gmra.mrb[40].mxu0 %vm169_vm2, %v1118_v51  ;;  %4971 = vmatmul.mubr.msk.bf16.vlgmr.msra.gmra.mrb[40].mxu1 %vm169_vm2, %v1118_v51 }
 0x333   :  { %4975 = vmatpush3.bf16.msra.mxu0 %v5910_v15  ;;  %4983 = vmatpush3.bf16.msra.mxu1 %v5915_v16 }
 0x334   :  { %4976 = vmatprep.subr.bf16.mxu0 %v5748_v8  ;;  %4984 = vmatprep.subr.bf16.mxu1 %v5748_v8 }
 0x335   :  { %4978 = vmatprep.mubr.msk.bf16.mxu0 %vm5749_vm1, %v5748_v8  ;;  %4986 = vmatprep.mubr.msk.bf16.mxu1 %vm5749_vm1, %v5748_v8 }
 0x337   :  { %4977 = vmatpush3.bf16.msra.mxu0 %v5923_v17  ;;  %4985 = vmatpush3.bf16.msra.mxu1 %v5930_v18 }
 0x338   :  { %4990 = vmatprep.subr.bf16.mxu0 %v5748_v8  ;;  %4998 = vmatprep.subr.bf16.mxu1 %v5748_v8 }
 0x33a   :  { %4979 = vmatmul.mubr.msk.bf16.vlgmr.msra.gmra.mrb[44].mxu0 %vm169_vm2, %v1118_v51  ;;  %4987 = vmatmul.mubr.msk.bf16.vlgmr.msra.gmra.mrb[44].mxu1 %vm169_vm2, %v1118_v51  ;;  %v1454_v51 = vld [vmem:[#allocation5 + $0x20] sm:$0xff] }
 0x33b   :  { %4991 = vmatpush3.bf16.msra.mxu0 %v5869_v9  ;;  %4999 = vmatpush3.bf16.msra.mxu1 %v5874_v10 }
 0x33c   :  { %4992 = vmatprep.subr.bf16.mxu0 %v5748_v8  ;;  %5000 = vmatprep.subr.bf16.mxu1 %v5748_v8 }
 0x33d   :  { %4994 = vmatprep.mubr.msk.bf16.mxu0 %vm5749_vm1, %v5748_v8  ;;  %5002 = vmatprep.mubr.msk.bf16.mxu1 %vm5749_vm1, %v5748_v8 }
 0x33f   :  { %4993 = vmatpush3.bf16.msra.mxu0 %v5882_v11  ;;  %5001 = vmatpush3.bf16.msra.mxu1 %v5889_v12 }
 0x340   :  { %5006 = vmatprep.subr.bf16.mxu0 %v5748_v8  ;;  %5014 = vmatprep.subr.bf16.mxu1 %v5748_v8 }
 0x405   :  { %v1158_v53 = vpop.f32.mrb[40].mxu0  ;;  %v1201_v55 = vpop.f32.mrb[40].mxu1 }
 0x406   :  { %v1164_v56 = vadd.f32 %v1158_v53, %v1120_v52  ;;  %v1207_v57 = vadd.f32 %v1201_v55, %v1166_v54  ;;  %v4964_v58 = vpop.f32.mrb[41].mxu0  ;;  %v4972_v59 = vpop.f32.mrb[41].mxu1 }
 0x407   :  { %v1161_v60 = vpop.f32.mrb[42].mxu0  ;;  %v1204_v61 = vpop.f32.mrb[42].mxu1 }
 0x408   :  { %v4418_v62 = vmul.f32 -1.442695, %v1164_v56  ;;  %v4419_v63 = vmul.f32 -1.442695, %v1207_v57  ;;  %v4965_v0 = vpop.f32.mrb[43].mxu0  ;;  %v4973_v1 = vpop.f32.mrb[43].mxu1 }
 0x409   :  { %v1411_v60 = vld [vmem:[#allocation4 + $0x20] sm:$0xff] }
 0x40a   :  { %5524 = vpow2.f32 %v4418_v62 }
 0x40b   :  { %5526 = vpow2.f32 %v4419_v63 }
 0x40d   :  { %v1244_v2 = vpop.f32.mrb[44].mxu0  ;;  %v1287_v4 = vpop.f32.mrb[44].mxu1 }
 0x40e   :  { %v1293_v5 = vadd.f32 %v1287_v4, %v1252_v3  ;;  %v4980_v6 = vpop.f32.mrb[45].mxu0  ;;  %v4988_v7 = vpop.f32.mrb[45].mxu1  ;;  %v1250_v23 = vadd.f32 %v1244_v2, %v1209_v21 }
 0x40f   :  { %v1247_v13 = vpop.f32.mrb[46].mxu0  ;;  %v1290_v14 = vpop.f32.mrb[46].mxu1 }
 0x410   :  { %v4981_v19 = vpop.f32.mrb[47].mxu0  ;;  %v4989_v20 = vpop.f32.mrb[47].mxu1  ;;  %v4420_v22 = vmul.f32 -1.442695, %v1293_v5 }
 0x412   :  { %5528 = vpow2.f32 %v4420_v22 }
 0x413   :  { %5530 = vtanh.f32 %v1250_v23 }
 0x414   :  { %v5525_v24 = vpop.eup %5524 }
 0x415   :  { %v5527_v25 = vpop.eup %5526  ;;  %v1297_v26 = vadd.f32 1.0, %v5525_v24  ;;  %v1524_v24 = vld [vmem:[#allocation2 + $0x28] sm:$0xff] }
 0x416   :  { %v1303_v27 = vadd.f32 1.0, %v5527_v25 }
 0x417   :  { %5532 = vrcp.f32 %v1297_v26  ;;  %v1570_v26 = vld [vmem:[#allocation3 + $0x28] sm:$0xff] }
 0x418   :  { %5534 = vrcp.f32 %v1303_v27 }
 0x41c   :  { %v5529_v28 = vpop.eup %5528 }
 0x41d   :  { %v5531_v29 = vpop.eup %5530  ;;  %v1309_v33 = vadd.f32 1.0, %v5529_v28 }
 0x41f   :  { %5536 = vrcp.f32 %v1309_v33 }
 0x421   :  { %v5533_v30 = vpop.eup %5532 }
 0x422   :  { %v5535_v31 = vpop.eup %5534  ;;  %v1314_v32 = vmul.f32 %v5533_v30, %v5531_v29 }
 0x423   :  { %v1313_v34 = vmul.f32 %v5535_v31, %v6068_v47 }
 0x425   :  { %v6101_v35 = vadd.f32 %v1314_v32, %v1313_v34 }
 0x427   :  { %5538 = vtanh.f32 %v6101_v35 }
 0x429   :  { %v5537_v36 = vpop.eup %5536 }
 0x431   :  { %v5539_v37 = vpop.eup %5538 }
 0x432   :  { %v1317_v38 = vmul.f32 %v5539_v37, %v5537_v36 }
 0x434   :  { %1319 = vst.msk [vmem:[#allocation6 + $0x18] sm:$0xff] %vm169_vm2, %v1317_v38  ;;  %v1320_v39 = vpack.c.bf16 %v1317_v38, %v1317_v38 }
 0x436   :  { %4995 = vmatmul.mubr.msk.bf16.vlgmr.msra.gmra.mrb[48].mxu0 %vm169_vm2, %v1320_v39  ;;  %5003 = vmatmul.mubr.msk.bf16.vlgmr.msra.gmra.mrb[48].mxu1 %vm169_vm2, %v1320_v39 }
 0x437   :  { %5007 = vmatpush3.bf16.msra.mxu0 %v5910_v15  ;;  %5015 = vmatpush3.bf16.msra.mxu1 %v5915_v16 }
 0x438   :  { %5008 = vmatprep.subr.bf16.mxu0 %v5748_v8  ;;  %5016 = vmatprep.subr.bf16.mxu1 %v5748_v8 }
 0x439   :  { %5010 = vmatprep.mubr.msk.bf16.mxu0 %vm5749_vm1, %v5748_v8  ;;  %5018 = vmatprep.mubr.msk.bf16.mxu1 %vm5749_vm1, %v5748_v8 }
 0x43b   :  { %5009 = vmatpush3.bf16.msra.mxu0 %v5923_v17  ;;  %5017 = vmatpush3.bf16.msra.mxu1 %v5930_v18 }
 0x43c   :  { %5022 = vmatprep.subr.bf16.mxu0 %v5748_v8  ;;  %5030 = vmatprep.subr.bf16.mxu1 %v5748_v8 }
 0x43e   :  { %5011 = vmatmul.mubr.msk.bf16.vlgmr.msra.gmra.mrb[52].mxu0 %vm169_vm2, %v1320_v39  ;;  %5019 = vmatmul.mubr.msk.bf16.vlgmr.msra.gmra.mrb[52].mxu1 %vm169_vm2, %v1320_v39  ;;  %v1656_v39 = vld [vmem:[#allocation5 + $0x28] sm:$0xff] }
 0x43f   :  { %5023 = vmatpush3.bf16.msra.mxu0 %v5869_v9  ;;  %5031 = vmatpush3.bf16.msra.mxu1 %v5874_v10  ;;  %v1322_v9 = vld [vmem:[#allocation2 + $0x20] sm:$0xff] }
 0x440   :  { %5024 = vmatprep.subr.bf16.mxu0 %v5748_v8  ;;  %5032 = vmatprep.subr.bf16.mxu1 %v5748_v8 }
 0x441   :  { %5026 = vmatprep.mubr.msk.bf16.mxu0 %vm5749_vm1, %v5748_v8  ;;  %5034 = vmatprep.mubr.msk.bf16.mxu1 %vm5749_vm1, %v5748_v8 }
 0x443   :  { %5025 = vmatpush3.bf16.msra.mxu0 %v5882_v11  ;;  %5033 = vmatpush3.bf16.msra.mxu1 %v5889_v12 }
 0x444   :  { %5038 = vmatprep.subr.bf16.mxu0 %v5748_v8  ;;  %5046 = vmatprep.subr.bf16.mxu1 %v5748_v8 }
 0x509   :  { %v1360_v10 = vpop.f32.mrb[48].mxu0  ;;  %v1403_v41 = vpop.f32.mrb[48].mxu1 }
 0x50a   :  { %v1366_v42 = vadd.f32 %v1360_v10, %v1322_v9  ;;  %v1409_v43 = vadd.f32 %v1403_v41, %v1368_v40  ;;  %v4996_v44 = vpop.f32.mrb[49].mxu0  ;;  %v5004_v45 = vpop.f32.mrb[49].mxu1 }
 0x50b   :  { %v1363_v46 = vpop.f32.mrb[50].mxu0  ;;  %v1406_v47 = vpop.f32.mrb[50].mxu1 }
 0x50c   :  { %v4425_v48 = vmul.f32 -1.442695, %v1366_v42  ;;  %v4426_v49 = vmul.f32 -1.442695, %v1409_v43  ;;  %v4997_v50 = vpop.f32.mrb[51].mxu0  ;;  %v5005_v11 = vpop.f32.mrb[51].mxu1 }
 0x50d   :  { %v1613_v46 = vld [vmem:[#allocation4 + $0x28] sm:$0xff] }
 0x50e   :  { %5540 = vpow2.f32 %v4425_v48 }
 0x50f   :  { %5542 = vpow2.f32 %v4426_v49 }
 0x511   :  { %v1446_v12 = vpop.f32.mrb[52].mxu0  ;;  %v1489_v52 = vpop.f32.mrb[52].mxu1 }
 0x512   :  { %v1495_v53 = vadd.f32 %v1489_v52, %v1454_v51  ;;  %v5012_v54 = vpop.f32.mrb[53].mxu0  ;;  %v5020_v55 = vpop.f32.mrb[53].mxu1  ;;  %v1452_v62 = vadd.f32 %v1446_v12, %v1411_v60 }
 0x513   :  { %v1449_v56 = vpop.f32.mrb[54].mxu0  ;;  %v1492_v57 = vpop.f32.mrb[54].mxu1 }
 0x514   :  { %v5013_v58 = vpop.f32.mrb[55].mxu0  ;;  %v5021_v59 = vpop.f32.mrb[55].mxu1  ;;  %v4427_v61 = vmul.f32 -1.442695, %v1495_v53 }
 0x516   :  { %5544 = vpow2.f32 %v4427_v61 }
 0x517   :  { %5546 = vtanh.f32 %v1452_v62 }
 0x518   :  { %v5541_v63 = vpop.eup %5540 }
 0x519   :  { %v5543_v0 = vpop.eup %5542  ;;  %v1499_v1 = vadd.f32 1.0, %v5541_v63  ;;  %v6196_v63 = vld [vmem:[%s6757_s2 + $0x20] sm:$0xff]  }
 0x51a   :  { %v1505_v2 = vadd.f32 1.0, %v5543_v0  ;;  %v6202_v0 = vld [vmem:[%s6757_s2 + $0x30] sm:$0xff]  }
 0x51b   :  { %5548 = vrcp.f32 %v1499_v1  ;;  %v6214_v1 = vld [vmem:[%s6757_s2 + $0x28] sm:$0xff]  }
 0x51c   :  { %5550 = vrcp.f32 %v1505_v2  ;;  %v6220_v2 = vld [vmem:[%s6757_s2 + $0x38] sm:$0xff]  }
 0x520   :  { %v5545_v3 = vpop.eup %5544 }
 0x521   :  { %v5547_v4 = vpop.eup %5546  ;;  %v1511_v13 = vadd.f32 1.0, %v5545_v3  ;;  %v1726_v3 = vld [vmem:[#allocation2 + $0x30] sm:$0xff] }
 0x523   :  { %5552 = vrcp.f32 %v1511_v13 }
 0x525   :  { %v5549_v5 = vpop.eup %5548 }
 0x526   :  { %v5551_v6 = vpop.eup %5550  ;;  %v1516_v7 = vmul.f32 %v5549_v5, %v5547_v4  ;;  %v1772_v5 = vld [vmem:[#allocation3 + $0x30] sm:$0xff] }
 0x527   :  { %v1515_v14 = vmul.f32 %v5551_v6, %v6101_v35 }
 0x529   :  { %v6134_v19 = vadd.f32 %v1516_v7, %v1515_v14 }
 0x52b   :  { %5554 = vtanh.f32 %v6134_v19 }
 0x52d   :  { %v5553_v20 = vpop.eup %5552 }
 0x535   :  { %v5555_v21 = vpop.eup %5554 }
 0x536   :  { %v1519_v22 = vmul.f32 %v5555_v21, %v5553_v20 }
 0x538   :  { %1521 = vst.msk [vmem:[#allocation6 + $0x20] sm:$0xff] %vm169_vm2, %v1519_v22  ;;  %v1522_v23 = vpack.c.bf16 %v1519_v22, %v1519_v22 }
 0x53a   :  { %5027 = vmatmul.mubr.msk.bf16.vlgmr.msra.gmra.mrb[56].mxu0 %vm169_vm2, %v1522_v23  ;;  %5035 = vmatmul.mubr.msk.bf16.vlgmr.msra.gmra.mrb[56].mxu1 %vm169_vm2, %v1522_v23 }
 0x53b   :  { %5039 = vmatpush3.bf16.msra.mxu0 %v5910_v15  ;;  %5047 = vmatpush3.bf16.msra.mxu1 %v5915_v16  ;;  %v6157_v15 = vld [vmem:[%s6757_s2] sm:$0xff]   ;;  %v6163_v16 = vld [vmem:[%s6757_s2 + $0x10] sm:$0xff]  }
 0x53c   :  { %5040 = vmatprep.subr.bf16.mxu0 %v5748_v8  ;;  %5048 = vmatprep.subr.bf16.mxu1 %v5748_v8 }
 0x53d   :  { %5042 = vmatprep.mubr.msk.bf16.mxu0 %vm5749_vm1, %v5748_v8  ;;  %5050 = vmatprep.mubr.msk.bf16.mxu1 %vm5749_vm1, %v5748_v8 }
 0x53f   :  { %5041 = vmatpush3.bf16.msra.mxu0 %v5923_v17  ;;  %5049 = vmatpush3.bf16.msra.mxu1 %v5930_v18  ;;  %v6175_v17 = vld [vmem:[%s6757_s2 + $0x8] sm:$0xff]   ;;  %v6181_v18 = vld [vmem:[%s6757_s2 + $0x18] sm:$0xff]  }
 0x540   :  { %5054 = vmatprep.subr.bf16.mxu0 %v5748_v8  ;;  %5062 = vmatprep.subr.bf16.mxu1 %v5748_v8 }
 0x542   :  { %5043 = vmatmul.mubr.msk.bf16.vlgmr.msra.gmra.mrb[60].mxu0 %vm169_vm2, %v1522_v23  ;;  %5051 = vmatmul.mubr.msk.bf16.vlgmr.msra.gmra.mrb[60].mxu1 %vm169_vm2, %v1522_v23 }
 0x543   :  { %5055 = vmatpush3.bf16.msra.mxu0 %v6157_v15  ;;  %5063 = vmatpush3.bf16.msra.mxu1 %v6163_v16 }
 0x544   :  { %5056 = vmatprep.subr.bf16.mxu0 %v5748_v8  ;;  %5064 = vmatprep.subr.bf16.mxu1 %v5748_v8 }
 0x545   :  { %5058 = vmatprep.mubr.msk.bf16.mxu0 %vm5749_vm1, %v5748_v8  ;;  %5066 = vmatprep.mubr.msk.bf16.mxu1 %vm5749_vm1, %v5748_v8 }
 0x547   :  { %5057 = vmatpush3.bf16.msra.mxu0 %v6175_v17  ;;  %5065 = vmatpush3.bf16.msra.mxu1 %v6181_v18 }
 0x548   :  { %5070 = vmatprep.subr.bf16.mxu0 %v5748_v8  ;;  %5078 = vmatprep.subr.bf16.mxu1 %v5748_v8 }
 0x60d   :  { %v1562_v25 = vpop.f32.mrb[56].mxu0  ;;  %v1605_v27 = vpop.f32.mrb[56].mxu1 }
 0x60e   :  { %v1568_v28 = vadd.f32 %v1562_v25, %v1524_v24  ;;  %v1611_v29 = vadd.f32 %v1605_v27, %v1570_v26  ;;  %v5028_v30 = vpop.f32.mrb[57].mxu0  ;;  %v5036_v31 = vpop.f32.mrb[57].mxu1 }
 0x60f   :  { %v1565_v32 = vpop.f32.mrb[58].mxu0  ;;  %v1608_v33 = vpop.f32.mrb[58].mxu1 }
 0x610   :  { %v4432_v34 = vmul.f32 -1.442695, %v1568_v28  ;;  %v4433_v35 = vmul.f32 -1.442695, %v1611_v29  ;;  %v5029_v36 = vpop.f32.mrb[59].mxu0  ;;  %v5037_v37 = vpop.f32.mrb[59].mxu1 }
 0x611   :  { %v1815_v32 = vld [vmem:[#allocation4 + $0x30] sm:$0xff] }
 0x612   :  { %5556 = vpow2.f32 %v4432_v34 }
 0x613   :  { %5558 = vpow2.f32 %v4433_v35 }
 0x615   :  { %v1648_v38 = vpop.f32.mrb[60].mxu0  ;;  %v1691_v9 = vpop.f32.mrb[60].mxu1 }
 0x616   :  { %v1697_v10 = vadd.f32 %v1691_v9, %v1656_v39  ;;  %v5044_v40 = vpop.f32.mrb[61].mxu0  ;;  %v5052_v41 = vpop.f32.mrb[61].mxu1  ;;  %v1654_v48 = vadd.f32 %v1648_v38, %v1613_v46 }
 0x617   :  { %v1651_v42 = vpop.f32.mrb[62].mxu0  ;;  %v1694_v43 = vpop.f32.mrb[62].mxu1 }
 0x618   :  { %v5045_v44 = vpop.f32.mrb[63].mxu0  ;;  %v5053_v45 = vpop.f32.mrb[63].mxu1  ;;  %v4434_v47 = vmul.f32 -1.442695, %v1697_v10 }
 0x61a   :  { %5560 = vpow2.f32 %v4434_v47 }
 0x61b   :  { %5562 = vtanh.f32 %v1654_v48 }
 0x61c   :  { %v5557_v49 = vpop.eup %5556 }
 0x61d   :  { %v5559_v50 = vpop.eup %5558  ;;  %v1701_v11 = vadd.f32 1.0, %v5557_v49  ;;  %v5456_v49 = vld [vmem:[%s6761_s4] sm:$0xff]  }
 0x61e   :  { %v1707_v12 = vadd.f32 1.0, %v5559_v50  ;;  %v5457_v50 = vld [vmem:[%s6761_s4 + $0x10] sm:$0xff]  }
 0x61f   :  { %5564 = vrcp.f32 %v1701_v11  ;;  %v2131_v11 = vld [vmem:[#allocation6 + $0x8] sm:$0xff] }
 0x620   :  { %5566 = vrcp.f32 %v1707_v12  ;;  %v2130_v12 = vld [vmem:[#allocation6] sm:$0xff] }
 0x624   :  { %v5561_v51 = vpop.eup %5560 }
 0x625   :  { %v5563_v52 = vpop.eup %5562  ;;  %v1713_v56 = vadd.f32 1.0, %v5561_v51  ;;  %v6262_v51 = vpack.c.bf16 %v2131_v11, %v2130_v12 }
 0x627   :  { %5568 = vrcp.f32 %v1713_v56  ;;  %v2132_v56 = vld [vmem:[#allocation6 + $0x10] sm:$0xff] }
 0x629   :  { %v5565_v53 = vpop.eup %5564 }
 0x62a   :  { %v5567_v54 = vpop.eup %5566  ;;  %v1718_v55 = vmul.f32 %v5565_v53, %v5563_v52  ;;  %v5458_v52 = vld [vmem:[%s6761_s4 + $0x8] sm:$0xff]   ;;  %v5459_v53 = vld [vmem:[%s6761_s4 + $0x18] sm:$0xff]  }
 0x62b   :  { %v1717_v57 = vmul.f32 %v5567_v54, %v6134_v19  ;;  %v2133_v54 = vld [vmem:[#allocation6 + $0x18] sm:$0xff] }
 0x62d   :  { %v6187_v58 = vadd.f32 %v1718_v55, %v1717_v57  ;;  %v6276_v57 = vpack.c.bf16 %v2133_v54, %v2132_v56 }
 0x62f   :  { %5570 = vtanh.f32 %v6187_v58 }
 0x631   :  { %v5569_v59 = vpop.eup %5568 }
 0x639   :  { %v5571_v60 = vpop.eup %5570 }
 0x63a   :  { %v1721_v61 = vmul.f32 %v5571_v60, %v5569_v59  ;;  %v5460_v60 = vld [vmem:[%s6761_s4 + $0x20] sm:$0xff]  }
 0x63c   :  { %1723 = vst.msk [vmem:[#allocation6 + $0x28] sm:$0xff] %vm169_vm2, %v1721_v61  ;;  %v1724_v62 = vpack.c.bf16 %v1721_v61, %v1721_v61  ;;  %v5461_v61 = vld [vmem:[%s6761_s4 + $0x30] sm:$0xff]  }
 0x63e   :  { %5059 = vmatmul.mubr.msk.bf16.vlgmr.msra.gmra.mrb[64].mxu0 %vm169_vm2, %v1724_v62  ;;  %5067 = vmatmul.mubr.msk.bf16.vlgmr.msra.gmra.mrb[64].mxu1 %vm169_vm2, %v1724_v62 }
 0x63f   :  { %5071 = vmatpush3.bf16.msra.mxu0 %v6196_v63  ;;  %5079 = vmatpush3.bf16.msra.mxu1 %v6202_v0 }
 0x640   :  { %5072 = vmatprep.subr.bf16.mxu0 %v5748_v8  ;;  %5080 = vmatprep.subr.bf16.mxu1 %v5748_v8 }
 0x641   :  { %5074 = vmatprep.mubr.msk.bf16.mxu0 %vm5749_vm1, %v5748_v8  ;;  %5082 = vmatprep.mubr.msk.bf16.mxu1 %vm5749_vm1, %v5748_v8 }
 0x643   :  { %5073 = vmatpush3.bf16.msra.mxu0 %v6214_v1  ;;  %5081 = vmatpush3.bf16.msra.mxu1 %v6220_v2  ;;  %v2135_v55 = vld [vmem:[#allocation6 + $0x28] sm:$0xff] }
 0x644   :  { %5086 = vmatprep.subr.bf16.mxu0 %v5748_v8  ;;  %5094 = vmatprep.subr.bf16.mxu1 %v5748_v8 }
 0x646   :  { %5075 = vmatmul.mubr.msk.bf16.vlgmr.msra.gmra.mrb[68].mxu0 %vm169_vm2, %v1724_v62  ;;  %5083 = vmatmul.mubr.msk.bf16.vlgmr.msra.gmra.mrb[68].mxu1 %vm169_vm2, %v1724_v62  ;;  %v5462_v62 = vld [vmem:[%s6761_s4 + $0x28] sm:$0xff]  }
 0x647   :  { %5087 = vmatpush3.bf16.msra.mxu0 %v6157_v15  ;;  %5095 = vmatpush3.bf16.msra.mxu1 %v6163_v16 }
 0x648   :  { %5088 = vmatprep.subr.bf16.mxu0 %v5748_v8  ;;  %5096 = vmatprep.subr.bf16.mxu1 %v5748_v8 }
 0x649   :  { %5090 = vmatprep.mubr.msk.bf16.mxu0 %vm5749_vm1, %v5748_v8  ;;  %5098 = vmatprep.mubr.msk.bf16.mxu1 %vm5749_vm1, %v5748_v8 }
 0x64b   :  { %5089 = vmatpush3.bf16.msra.mxu0 %v6175_v17  ;;  %5097 = vmatpush3.bf16.msra.mxu1 %v6181_v18  ;;  %v1858_v18 = vld [vmem:[#allocation5 + $0x30] sm:$0xff] }
 0x64c   :  { %5102 = vmatprep.subr.bf16.mxu0 %v5748_v8  ;;  %5110 = vmatprep.subr.bf16.mxu1 %v5748_v8 }
 0x711   :  { %v1764_v4 = vpop.f32.mrb[64].mxu0  ;;  %v1807_v6 = vpop.f32.mrb[64].mxu1 }
 0x712   :  { %v1770_v7 = vadd.f32 %v1764_v4, %v1726_v3  ;;  %v1813_v13 = vadd.f32 %v1807_v6, %v1772_v5  ;;  %v5060_v14 = vpop.f32.mrb[65].mxu0  ;;  %v5068_v19 = vpop.f32.mrb[65].mxu1 }
 0x713   :  { %v1767_v20 = vpop.f32.mrb[66].mxu0  ;;  %v1810_v21 = vpop.f32.mrb[66].mxu1 }
 0x714   :  { %v4439_v22 = vmul.f32 -1.442695, %v1770_v7  ;;  %v4440_v23 = vmul.f32 -1.442695, %v1813_v13  ;;  %v5061_v15 = vpop.f32.mrb[67].mxu0  ;;  %v5069_v16 = vpop.f32.mrb[67].mxu1 }
 0x715   :  { %v2060_v15 = vld [vmem:[#allocation5 + $0x38] sm:$0xff] }
 0x716   :  { %5572 = vpow2.f32 %v4439_v22 }
 0x717   :  { %5574 = vpow2.f32 %v4440_v23 }
 0x719   :  { %v1850_v17 = vpop.f32.mrb[68].mxu0  ;;  %v1893_v24 = vpop.f32.mrb[68].mxu1 }
 0x71a   :  { %v1899_v25 = vadd.f32 %v1893_v24, %v1858_v18  ;;  %v5076_v26 = vpop.f32.mrb[69].mxu0  ;;  %v5084_v27 = vpop.f32.mrb[69].mxu1  ;;  %v1856_v34 = vadd.f32 %v1850_v17, %v1815_v32  ;;  %v6305_v32 = vld [vmem:[%s6763_s6] ss:$0 sm:$0xff] }
 0x71b   :  { %v1853_v28 = vpop.f32.mrb[70].mxu0  ;;  %v1896_v29 = vpop.f32.mrb[70].mxu1 }
 0x71c   :  { %v5077_v30 = vpop.f32.mrb[71].mxu0  ;;  %v5085_v31 = vpop.f32.mrb[71].mxu1  ;;  %v4441_v33 = vmul.f32 -1.442695, %v1899_v25  ;;  %v2017_v29 = vld [vmem:[#allocation4 + $0x38] sm:$0xff] }
 0x71e   :  { %5576 = vpow2.f32 %v4441_v33 }
 0x71f   :  { %5578 = vtanh.f32 %v1856_v34  ;;  %v6310_v34 = vld [vmem:[%s6763_s6 + $0x1] ss:$0 sm:$0xff] }
 0x720   :  { %v5573_v35 = vpop.eup %5572 }
 0x721   :  { %v5575_v36 = vpop.eup %5574  ;;  %v1903_v37 = vadd.f32 1.0, %v5573_v35 }
 0x722   :  { %v1909_v38 = vadd.f32 1.0, %v5575_v36 }
 0x723   :  { %5580 = vrcp.f32 %v1903_v37 }
 0x724   :  { %5582 = vrcp.f32 %v1909_v38 }
 0x728   :  { %v5577_v39 = vpop.eup %5576 }
 0x729   :  { %v5579_v9 = vpop.eup %5578  ;;  %v1915_v42 = vadd.f32 1.0, %v5577_v39 }
 0x72b   :  { %5584 = vrcp.f32 %v1915_v42 }
 0x72d   :  { %v5581_v10 = vpop.eup %5580 }
 0x72e   :  { %v5583_v40 = vpop.eup %5582  ;;  %v1920_v41 = vmul.f32 %v5581_v10, %v5579_v9 }
 0x72f   :  { %v1919_v43 = vmul.f32 %v5583_v40, %v6187_v58  ;;  %v2134_v58 = vld [vmem:[#allocation6 + $0x20] sm:$0xff] }
 0x730   :  { %v6278_v59 = vpack.c.bf16 %v2135_v55, %v2134_v58 }
 0x731   :  { %v6240_v44 = vadd.f32 %v1920_v41, %v1919_v43 }
 0x733   :  { %5586 = vtanh.f32 %v6240_v44 }
 0x735   :  { %v5585_v45 = vpop.eup %5584 }
 0x73d   :  { %v5587_v46 = vpop.eup %5586 }
 0x73e   :  { %v1923_v47 = vmul.f32 %v5587_v46, %v5585_v45 }
 0x740   :  { %1925 = vst.msk [vmem:[#allocation6 + $0x30] sm:$0xff] %vm169_vm2, %v1923_v47  ;;  %v1926_v48 = vpack.c.bf16 %v1923_v47, %v1923_v47 }
 0x742   :  { %5091 = vmatmul.mubr.msk.bf16.vlgmr.msra.gmra.mrb[72].mxu0 %vm169_vm2, %v1926_v48  ;;  %5099 = vmatmul.mubr.msk.bf16.vlgmr.msra.gmra.mrb[72].mxu1 %vm169_vm2, %v1926_v48 }
 0x743   :  { %5103 = vmatpush3.bf16.msra.mxu0 %v6196_v63  ;;  %5111 = vmatpush3.bf16.msra.mxu1 %v6202_v0  ;;  %v5463_v63 = vld [vmem:[%s6761_s4 + $0x38] sm:$0xff]  }
 0x744   :  { %5104 = vmatprep.subr.bf16.mxu0 %v5748_v8  ;;  %5112 = vmatprep.subr.bf16.mxu1 %v5748_v8  ;;  %v1928_v0 = vld [vmem:[#allocation2 + $0x38] sm:$0xff] }
 0x745   :  { %5106 = vmatprep.mubr.msk.bf16.mxu0 %vm5749_vm1, %v5748_v8  ;;  %5114 = vmatprep.mubr.msk.bf16.mxu1 %vm5749_vm1, %v5748_v8 }
 0x747   :  { %5105 = vmatpush3.bf16.msra.mxu0 %v6214_v1  ;;  %5113 = vmatpush3.bf16.msra.mxu1 %v6220_v2  ;;  %v1974_v2 = vld [vmem:[#allocation3 + $0x38] sm:$0xff] }
 0x748   :  { %5118 = vmatprep.subr.bf16.mxu0 %v5456_v49  ;;  %5130 = vmatprep.subr.bf16.mxu1 %v5457_v50 }
 0x74a   :  { %5107 = vmatmul.mubr.msk.bf16.vlgmr.msra.gmra.mrb[76].mxu0 %vm169_vm2, %v1926_v48  ;;  %5115 = vmatmul.mubr.msk.bf16.vlgmr.msra.gmra.mrb[76].mxu1 %vm169_vm2, %v1926_v48 }
 0x74b   :  { %5119 = vmatpush3.bf16.msra.mxu0 %v5456_v49  ;;  %5122 = vmatprep.mubr.msk.bf16.mxu0 %vm169_vm2, %v6262_v51 }
 0x74c   :  { %5131 = vmatpush3.bf16.msra.mxu1 %v5457_v50  ;;  %5134 = vmatprep.mubr.msk.bf16.mxu1 %vm169_vm2, %v6262_v51 }
 0x74d   :  { %5120 = vmatprep.subr.bf16.mxu0 %v5458_v52  ;;  %5132 = vmatprep.subr.bf16.mxu1 %v5459_v53 }
 0x74f   :  { %5121 = vmatpush3.bf16.msra.mxu0 %v5458_v52 }
 0x750   :  { %5133 = vmatpush3.bf16.msra.mxu1 %v5459_v53  ;;  %5142 = vmatprep.subr.bf16.mxu0 %v5460_v60 }
 0x751   :  { %5154 = vmatprep.subr.bf16.mxu1 %v5461_v61 }
 0x752   :  { %5123 = vmatmul.mubr.msk.bf16.vlgmr.msra.gmra.mrb[80].mxu0 %vm169_vm2, %v6276_v57 }
 0x753   :  { %5135 = vmatmul.mubr.msk.bf16.vlgmr.msra.gmra.mrb[80].mxu1 %vm169_vm2, %v6276_v57  ;;  %5126 = vmatprep.mubr.msk.bf16.mxu0 %vm169_vm2, %v6278_v59 }
 0x754   :  { %5138 = vmatprep.mubr.msk.bf16.mxu1 %vm169_vm2, %v6278_v59  ;;  %5143 = vmatpush3.bf16.msra.mxu0 %v5460_v60 }
 0x755   :  { %5155 = vmatpush3.bf16.msra.mxu1 %v5461_v61  ;;  %5144 = vmatprep.subr.bf16.mxu0 %v5462_v62 }
 0x756   :  { %5156 = vmatprep.subr.bf16.mxu1 %v5463_v63 }
 0x758   :  { %5145 = vmatpush3.bf16.msra.mxu0 %v5462_v62 }
 0x759   :  { %5157 = vmatpush3.bf16.msra.mxu1 %v5463_v63  ;;  %5166 = vmatprep.subr.bf16.mxu0 %v5748_v8 }
 0x75a   :  { %5174 = vmatprep.subr.bf16.mxu1 %v5748_v8 }
 0x815   :  { %v1966_v1 = vpop.f32.mrb[72].mxu0  ;;  %v2009_v3 = vpop.f32.mrb[72].mxu1 }
 0x816   :  { %v1972_v4 = vadd.f32 %v1966_v1, %v1928_v0  ;;  %v2015_v5 = vadd.f32 %v2009_v3, %v1974_v2  ;;  %v5092_v6 = vpop.f32.mrb[73].mxu0  ;;  %v5100_v7 = vpop.f32.mrb[73].mxu1  ;;  %v2136_v1 = vld [vmem:[#allocation6 + $0x30] sm:$0xff]  ;;  %v6347_v3 = vld [vmem:[%s6762_s5] sm:$0xff]  }
 0x817   :  { %v1969_v13 = vpop.f32.mrb[74].mxu0  ;;  %v2012_v14 = vpop.f32.mrb[74].mxu1  ;;  %v6392_v6 = vld [vmem:[%s6762_s5 + $0x20] sm:$0xff]   ;;  %v6397_v7 = vld [vmem:[%s6762_s5 + $0x30] sm:$0xff]  }
 0x818   :  { %v4446_v19 = vmul.f32 -1.442695, %v1972_v4  ;;  %v4447_v20 = vmul.f32 -1.442695, %v2015_v5  ;;  %v5093_v21 = vpop.f32.mrb[75].mxu0  ;;  %v5101_v22 = vpop.f32.mrb[75].mxu1 }
 0x819   :  { %v6352_v4 = vld [vmem:[%s6762_s5 + $0x10] sm:$0xff]   ;;  %v6372_v5 = vld [vmem:[%s6762_s5 + $0x18] sm:$0xff]   ;;  %v6406_v13 = vld [vmem:[%s6762_s5 + $0x28] sm:$0xff]  }
 0x81a   :  { %5588 = vpow2.f32 %v4446_v19  ;;  %v6411_v14 = vld [vmem:[%s6762_s5 + $0x38] sm:$0xff]  }
 0x81b   :  { %5590 = vpow2.f32 %v4447_v20 }
 0x81d   :  { %v2052_v23 = vpop.f32.mrb[76].mxu0  ;;  %v2095_v16 = vpop.f32.mrb[76].mxu1 }
 0x81e   :  { %v2101_v17 = vadd.f32 %v2095_v16, %v2060_v15  ;;  %v5108_v18 = vpop.f32.mrb[77].mxu0  ;;  %v5116_v24 = vpop.f32.mrb[77].mxu1  ;;  %v2058_v31 = vadd.f32 %v2052_v23, %v2017_v29 }
 0x81f   :  { %v2055_v25 = vpop.f32.mrb[78].mxu0  ;;  %v2098_v26 = vpop.f32.mrb[78].mxu1 }
 0x820   :  { %v5109_v27 = vpop.f32.mrb[79].mxu0  ;;  %v5117_v28 = vpop.f32.mrb[79].mxu1  ;;  %v4448_v30 = vmul.f32 -1.442695, %v2101_v17 }
 0x822   :  { %5592 = vpow2.f32 %v4448_v30 }
 0x823   :  { %5594 = vtanh.f32 %v2058_v31  ;;  %v4473_v31 = vld [vmem:[%s6763_s6 + $0x2] ss:$0 sm:$0xff] }
 0x824   :  { %v5589_v33 = vpop.eup %5588 }
 0x825   :  { %v5591_v35 = vpop.eup %5590  ;;  %v2105_v36 = vadd.f32 1.0, %v5589_v33  ;;  %v5124_v37 = vpop.f32.mrb[80].mxu0  ;;  %v4485_v33 = vld [vmem:[%s6763_s6 + $0x3] ss:$0 sm:$0xff] }
 0x826   :  { %v2111_v38 = vadd.f32 1.0, %v5591_v35  ;;  %v2220_v39 = vadd.f32 %v5124_v37, %v6305_v32  ;;  %v5136_v9 = vpop.f32.mrb[80].mxu1  ;;  %v2211_v10 = vpop.f32.mrb[81].mxu0 }
 0x827   :  { %5596 = vrcp.f32 %v2105_v36  ;;  %v2318_v40 = vadd.f32 %v5136_v9, %v6310_v34  ;;  %v2212_v41 = vadd.f32 %v6305_v32, %v2211_v10  ;;  %v2309_v42 = vpop.f32.mrb[81].mxu1  ;;  %v5125_v43 = vpop.f32.mrb[82].mxu0 }
 0x828   :  { %5598 = vrcp.f32 %v2111_v38  ;;  %2244 = vst.msk [vmem:[#allocation2 + $0x10] sm:$0xff] %vm169_vm2, %v2220_v39  ;;  %v2310_v45 = vadd.f32 %v6310_v34, %v2309_v42  ;;  %v2223_v46 = vadd.f32 %v5125_v43, %v6305_v32  ;;  %v5137_v47 = vpop.f32.mrb[82].mxu1  ;;  %v2214_v48 = vpop.f32.mrb[83].mxu0 }
 0x829   :  { %2342 = vst.msk [vmem:[#allocation3 + $0x10] sm:$0xff] %vm169_vm2, %v2318_v40  ;;  %2242 = vst.msk [vmem:[#allocation2] sm:$0xff] %vm169_vm2, %v2212_v41  ;;  %v2321_v49 = vadd.f32 %v5137_v47, %v6310_v34  ;;  %v2215_v50 = vadd.f32 %v6305_v32, %v2214_v48  ;;  %v2312_v11 = vpop.f32.mrb[83].mxu1 }
 0x82a   :  { %2340 = vst.msk [vmem:[#allocation3] sm:$0xff] %vm169_vm2, %v2310_v45  ;;  %2245 = vst.msk [vmem:[#allocation2 + $0x18] sm:$0xff] %vm169_vm2, %v2223_v46  ;;  %v2313_v12 = vadd.f32 %v6310_v34, %v2312_v11 }
 0x82b   :  { %2343 = vst.msk [vmem:[#allocation3 + $0x18] sm:$0xff] %vm169_vm2, %v2321_v49  ;;  %2243 = vst.msk [vmem:[#allocation2 + $0x8] sm:$0xff] %vm169_vm2, %v2215_v50 }
 0x82c   :  { %2341 = vst.msk [vmem:[#allocation3 + $0x8] sm:$0xff] %vm169_vm2, %v2313_v12  ;;  %v5593_v52 = vpop.eup %5592 }
 0x82d   :  { %v5595_v53 = vpop.eup %5594  ;;  %v2117_v58 = vadd.f32 1.0, %v5593_v52 }
 0x82f   :  { %5600 = vrcp.f32 %v2117_v58 }
 0x831   :  { %v5597_v54 = vpop.eup %5596 }
 0x832   :  { %v5599_v55 = vpop.eup %5598  ;;  %v2122_v56 = vmul.f32 %v5597_v54, %v5595_v53 }
 0x833   :  { %v2121_v60 = vmul.f32 %v5599_v55, %v6240_v44 }
 0x835   :  { %v2123_v61 = vadd.f32 %v2122_v56, %v2121_v60 }
 0x837   :  { %5602 = vtanh.f32 %v2123_v61  ;;  %2129 = vst.msk [vmem:[%s6764_s15] sm:$0xff] %vm169_vm2, %v2123_v61 }
 0x839   :  { %v5601_v62 = vpop.eup %5600 }
 0x841   :  { %v5603_v63 = vpop.eup %5602 }
 0x842   :  { %v2125_v0 = vmul.f32 %v5603_v63, %v5601_v62 }
 0x844   :  { %2127 = vst.msk [vmem:[#allocation6 + $0x38] sm:$0xff] %vm169_vm2, %v2125_v0  ;;  %2128 = vst.msk [vmem:[%s6765_s14] sm:$0xff] %vm169_vm2, %v2125_v0 }
 0x84b   :  { %v2137_v44 = vld [vmem:[#allocation6 + $0x38] sm:$0xff] }
 0x84c   :  { %v2141_v2 = vpack.c.bf16 %v2137_v44, %v2136_v1  ;;  %v2568_v1 = vld [vmem:[#allocation2] sm:$0xff] }
 0x84e   :  { %5127 = vmatmul.mubr.msk.bf16.gmra.mrb[84].mxu0 %vm169_vm2, %v2141_v2  ;;  %5139 = vmatmul.mubr.msk.bf16.gmra.mrb[84].mxu1 %vm169_vm2, %v2141_v2 }
 0x84f   :  { %5146 = vmatprep.mubr.msk.bf16.mxu0 %vm169_vm2, %v6262_v51  ;;  %5158 = vmatprep.mubr.msk.bf16.mxu1 %vm169_vm2, %v6262_v51  ;;  %v6367_v51 = vld [vmem:[%s6762_s5 + $0x8] sm:$0xff]  }
 0x856   :  { %5147 = vmatmul.mubr.msk.bf16.vlgmr.msra.gmra.mrb[88].mxu0 %vm169_vm2, %v6276_v57  ;;  %5159 = vmatmul.mubr.msk.bf16.vlgmr.msra.gmra.mrb[88].mxu1 %vm169_vm2, %v6276_v57  ;;  %v4504_v57 = vld [vmem:[%s6758_s7 + $0x8] sm:$0xff] }
 0x857   :  { %5150 = vmatprep.mubr.msk.bf16.mxu0 %vm169_vm2, %v6278_v59  ;;  %5162 = vmatprep.mubr.msk.bf16.mxu1 %vm169_vm2, %v6278_v59  ;;  %v2567_v59 = vpack.c.bf16 %v4504_v57, %v4504_v57 }
 0x858   :  { %5167 = vmatpush3.bf16.msra.mxu0 %v6347_v3  ;;  %5175 = vmatpush3.bf16.msra.mxu1 %v6352_v4 }
 0x859   :  { %5168 = vmatprep.subr.bf16.mxu0 %v5748_v8  ;;  %5176 = vmatprep.subr.bf16.mxu1 %v5748_v8 }
 0x85c   :  { %5169 = vmatpush3.bf16.msra.mxu0 %v6367_v51  ;;  %5177 = vmatpush3.bf16.msra.mxu1 %v6372_v5 }
 0x85d   :  { %5182 = vmatprep.subr.bf16.mxu0 %v5748_v8  ;;  %5190 = vmatprep.subr.bf16.mxu1 %v5748_v8 }
 0x85e   :  { %5151 = vmatmul.mubr.msk.bf16.gmra.mrb[92].mxu0 %vm169_vm2, %v2141_v2  ;;  %5163 = vmatmul.mubr.msk.bf16.gmra.mrb[92].mxu1 %vm169_vm2, %v2141_v2  ;;  %v2625_v2 = vld [vmem:[#allocation3] sm:$0xff] }
 0x85f   :  { %5170 = vmatprep.mubr.msk.bf16.mxu0 %vm5749_vm1, %v5748_v8  ;;  %5178 = vmatprep.mubr.msk.bf16.mxu1 %vm5749_vm1, %v5748_v8 }
 0x866   :  { %5171 = vmatmul.mubr.msk.bf16.vlgmr.msra.gmra.mrb[96].mxu0 %vm169_vm2, %v2567_v59  ;;  %5179 = vmatmul.mubr.msk.bf16.vlgmr.msra.gmra.mrb[96].mxu1 %vm169_vm2, %v2567_v59 }
 0x867   :  { %5183 = vmatpush3.bf16.msra.mxu0 %v6392_v6  ;;  %5191 = vmatpush3.bf16.msra.mxu1 %v6397_v7 }
 0x868   :  { %5184 = vmatprep.subr.bf16.mxu0 %v5748_v8  ;;  %5192 = vmatprep.subr.bf16.mxu1 %v5748_v8 }
 0x869   :  { %5186 = vmatprep.mubr.msk.bf16.mxu0 %vm5749_vm1, %v5748_v8  ;;  %5194 = vmatprep.mubr.msk.bf16.mxu1 %vm5749_vm1, %v5748_v8 }
 0x86b   :  { %5185 = vmatpush3.bf16.msra.mxu0 %v6406_v13  ;;  %5193 = vmatpush3.bf16.msra.mxu1 %v6411_v14 }
 0x86c   :  { %5198 = vmatprep.subr.bf16.mxu0 %v5748_v8  ;;  %5206 = vmatprep.subr.bf16.mxu1 %v5748_v8 }
 0x86e   :  { %5187 = vmatmul.mubr.msk.bf16.vlgmr.msra.gmra.mrb[100].mxu0 %vm169_vm2, %v2567_v59  ;;  %5195 = vmatmul.mubr.msk.bf16.vlgmr.msra.gmra.mrb[100].mxu1 %vm169_vm2, %v2567_v59 }
 0x86f   :  { %5199 = vmatpush3.bf16.msra.mxu0 %v6347_v3  ;;  %5207 = vmatpush3.bf16.msra.mxu1 %v6352_v4 }
 0x870   :  { %5200 = vmatprep.subr.bf16.mxu0 %v5748_v8  ;;  %5208 = vmatprep.subr.bf16.mxu1 %v5748_v8 }
 0x871   :  { %5202 = vmatprep.mubr.msk.bf16.mxu0 %vm5749_vm1, %v5748_v8  ;;  %5210 = vmatprep.mubr.msk.bf16.mxu1 %vm5749_vm1, %v5748_v8 }
 0x873   :  { %5201 = vmatpush3.bf16.msra.mxu0 %v6367_v51  ;;  %5209 = vmatpush3.bf16.msra.mxu1 %v6372_v5 }
 0x874   :  { %5214 = vmatprep.subr.bf16.mxu0 %v5748_v8  ;;  %5222 = vmatprep.subr.bf16.mxu1 %v5748_v8 }
 0x921   :  { %v5128_v19 = vpop.f32.mrb[84].mxu0  ;;  %v5140_v20 = vpop.f32.mrb[84].mxu1 }
 0x922   :  { %v2236_v21 = vadd.f32 %v5128_v19, %v6305_v32  ;;  %v2334_v22 = vadd.f32 %v5140_v20, %v6310_v34  ;;  %v2227_v23 = vpop.f32.mrb[85].mxu0  ;;  %v2325_v15 = vpop.f32.mrb[85].mxu1 }
 0x923   :  { %v2228_v16 = vadd.f32 %v6305_v32, %v2227_v23  ;;  %v2326_v17 = vadd.f32 %v6310_v34, %v2325_v15  ;;  %v5129_v18 = vpop.f32.mrb[86].mxu0  ;;  %v5141_v24 = vpop.f32.mrb[86].mxu1 }
 0x924   :  { %2248 = vst.msk [vmem:[#allocation2 + $0x30] sm:$0xff] %vm169_vm2, %v2236_v21  ;;  %2346 = vst.msk [vmem:[#allocation3 + $0x30] sm:$0xff] %vm169_vm2, %v2334_v22  ;;  %v2239_v25 = vadd.f32 %v5129_v18, %v6305_v32  ;;  %v2337_v26 = vadd.f32 %v5141_v24, %v6310_v34  ;;  %v2230_v27 = vpop.f32.mrb[87].mxu0  ;;  %v2328_v28 = vpop.f32.mrb[87].mxu1 }
 0x925   :  { %2246 = vst.msk [vmem:[#allocation2 + $0x20] sm:$0xff] %vm169_vm2, %v2228_v16  ;;  %2344 = vst.msk [vmem:[#allocation3 + $0x20] sm:$0xff] %vm169_vm2, %v2326_v17  ;;  %v2231_v29 = vadd.f32 %v6305_v32, %v2230_v27  ;;  %v2329_v30 = vadd.f32 %v6310_v34, %v2328_v28 }
 0x926   :  { %2249 = vst.msk [vmem:[#allocation2 + $0x38] sm:$0xff] %vm169_vm2, %v2239_v25  ;;  %2347 = vst.msk [vmem:[#allocation3 + $0x38] sm:$0xff] %vm169_vm2, %v2337_v26 }
 0x927   :  { %2247 = vst.msk [vmem:[#allocation2 + $0x28] sm:$0xff] %vm169_vm2, %v2231_v29  ;;  %2345 = vst.msk [vmem:[#allocation3 + $0x28] sm:$0xff] %vm169_vm2, %v2329_v30 }
 0x929   :  { %v5148_v35 = vpop.f32.mrb[88].mxu0  ;;  %v5160_v32 = vpop.f32.mrb[88].mxu1 }
 0x92a   :  { %v2416_v36 = vadd.f32 %v5148_v35, %v4473_v31  ;;  %v2514_v34 = vadd.f32 %v5160_v32, %v4485_v33  ;;  %v2407_v37 = vpop.f32.mrb[89].mxu0  ;;  %v2505_v38 = vpop.f32.mrb[89].mxu1 }
 0x92b   :  { %v2408_v39 = vadd.f32 %v4473_v31, %v2407_v37  ;;  %v2506_v9 = vadd.f32 %v4485_v33, %v2505_v38  ;;  %v5149_v10 = vpop.f32.mrb[90].mxu0  ;;  %v5161_v40 = vpop.f32.mrb[90].mxu1 }
 0x92c   :  { %2440 = vst.msk [vmem:[#allocation4 + $0x10] sm:$0xff] %vm169_vm2, %v2416_v36  ;;  %2538 = vst.msk [vmem:[#allocation5 + $0x10] sm:$0xff] %vm169_vm2, %v2514_v34  ;;  %v2419_v41 = vadd.f32 %v5149_v10, %v4473_v31  ;;  %v2517_v42 = vadd.f32 %v5161_v40, %v4485_v33  ;;  %v2410_v43 = vpop.f32.mrb[91].mxu0  ;;  %v2508_v45 = vpop.f32.mrb[91].mxu1 }
 0x92d   :  { %2438 = vst.msk [vmem:[#allocation4] sm:$0xff] %vm169_vm2, %v2408_v39  ;;  %2536 = vst.msk [vmem:[#allocation5] sm:$0xff] %vm169_vm2, %v2506_v9  ;;  %v2411_v46 = vadd.f32 %v4473_v31, %v2410_v43  ;;  %v2509_v47 = vadd.f32 %v4485_v33, %v2508_v45 }
 0x92e   :  { %2441 = vst.msk [vmem:[#allocation4 + $0x18] sm:$0xff] %vm169_vm2, %v2419_v41  ;;  %2539 = vst.msk [vmem:[#allocation5 + $0x18] sm:$0xff] %vm169_vm2, %v2517_v42  ;;  %v4505_v41 = vld [vmem:[%s6760_s8 + $0x8] sm:$0xff] }
 0x92f   :  { %2439 = vst.msk [vmem:[#allocation4 + $0x8] sm:$0xff] %vm169_vm2, %v2411_v46  ;;  %2537 = vst.msk [vmem:[#allocation5 + $0x8] sm:$0xff] %vm169_vm2, %v2509_v47 }
 0x931   :  { %v5152_v48 = vpop.f32.mrb[92].mxu0  ;;  %v5164_v49 = vpop.f32.mrb[92].mxu1 }
 0x932   :  { %v2432_v50 = vadd.f32 %v5152_v48, %v4473_v31  ;;  %v2530_v11 = vadd.f32 %v5164_v49, %v4485_v33  ;;  %v2423_v12 = vpop.f32.mrb[93].mxu0  ;;  %v2521_v52 = vpop.f32.mrb[93].mxu1 }
 0x933   :  { %v2424_v53 = vadd.f32 %v4473_v31, %v2423_v12  ;;  %v2522_v54 = vadd.f32 %v4485_v33, %v2521_v52  ;;  %v5153_v55 = vpop.f32.mrb[94].mxu0  ;;  %v5165_v56 = vpop.f32.mrb[94].mxu1  ;;  %v2812_v52 = vld [vmem:[#allocation2 + $0x8] sm:$0xff] }
 0x934   :  { %2444 = vst.msk [vmem:[#allocation4 + $0x30] sm:$0xff] %vm169_vm2, %v2432_v50  ;;  %2542 = vst.msk [vmem:[#allocation5 + $0x30] sm:$0xff] %vm169_vm2, %v2530_v11  ;;  %v2435_v58 = vadd.f32 %v5153_v55, %v4473_v31  ;;  %v2533_v60 = vadd.f32 %v5165_v56, %v4485_v33  ;;  %v2426_v61 = vpop.f32.mrb[95].mxu0  ;;  %v2524_v62 = vpop.f32.mrb[95].mxu1  ;;  %v2733_v25 = vld [vmem:[#allocation5] sm:$0xff] }
 0x935   :  { %2442 = vst.msk [vmem:[#allocation4 + $0x20] sm:$0xff] %vm169_vm2, %v2424_v53  ;;  %2540 = vst.msk [vmem:[#allocation5 + $0x20] sm:$0xff] %vm169_vm2, %v2522_v54  ;;  %v2427_v63 = vadd.f32 %v4473_v31, %v2426_v61  ;;  %v2525_v0 = vadd.f32 %v4485_v33, %v2524_v62  ;;  %v2679_v32 = vld [vmem:[#allocation4] sm:$0xff]  ;;  %v2857_v54 = vld [vmem:[#allocation3 + $0x8] sm:$0xff] }
 0x936   :  { %2445 = vst.msk [vmem:[#allocation4 + $0x38] sm:$0xff] %vm169_vm2, %v2435_v58  ;;  %2543 = vst.msk [vmem:[#allocation5 + $0x38] sm:$0xff] %vm169_vm2, %v2533_v60 }
 0x937   :  { %2443 = vst.msk [vmem:[#allocation4 + $0x28] sm:$0xff] %vm169_vm2, %v2427_v63  ;;  %2541 = vst.msk [vmem:[#allocation5 + $0x28] sm:$0xff] %vm169_vm2, %v2525_v0 }
 0x939   :  { %v2618_v44 = vpop.f32.mrb[96].mxu0  ;;  %v2672_v57 = vpop.f32.mrb[96].mxu1 }
 0x93a   :  { %v2624_v59 = vadd.f32 %v2618_v44, %v2568_v1  ;;  %v2678_v19 = vadd.f32 %v2672_v57, %v2625_v2  ;;  %v5172_v20 = vpop.f32.mrb[97].mxu0  ;;  %v5180_v21 = vpop.f32.mrb[97].mxu1 }
 0x93b   :  { %v2621_v22 = vpop.f32.mrb[98].mxu0  ;;  %v2675_v23 = vpop.f32.mrb[98].mxu1 }
 0x93c   :  { %v4518_v15 = vmul.f32 -1.442695, %v2624_v59  ;;  %v4519_v16 = vmul.f32 -1.442695, %v2678_v19  ;;  %v5173_v17 = vpop.f32.mrb[99].mxu0  ;;  %v5181_v18 = vpop.f32.mrb[99].mxu1 }
 0x93d   :  { %v2941_v59 = vld [vmem:[#allocation5 + $0x8] sm:$0xff] }
 0x93e   :  { %5604 = vpow2.f32 %v4518_v15  ;;  %v2899_v18 = vld [vmem:[#allocation4 + $0x8] sm:$0xff] }
 0x93f   :  { %5606 = vpow2.f32 %v4519_v16 }
 0x941   :  { %v2726_v24 = vpop.f32.mrb[100].mxu0  ;;  %v2780_v26 = vpop.f32.mrb[100].mxu1 }
 0x942   :  { %v2786_v27 = vadd.f32 %v2780_v26, %v2733_v25  ;;  %v5188_v28 = vpop.f32.mrb[101].mxu0  ;;  %v5196_v29 = vpop.f32.mrb[101].mxu1  ;;  %v2732_v34 = vadd.f32 %v2726_v24, %v2679_v32 }
 0x943   :  { %v2729_v30 = vpop.f32.mrb[102].mxu0  ;;  %v2783_v31 = vpop.f32.mrb[102].mxu1 }
 0x944   :  { %v5189_v33 = vpop.f32.mrb[103].mxu0  ;;  %v5197_v35 = vpop.f32.mrb[103].mxu1  ;;  %v4520_v36 = vmul.f32 -1.442695, %v2786_v27 }
 0x946   :  { %5608 = vpow2.f32 %v4520_v36 }
 0x947   :  { %5610 = vtanh.f32 %v2732_v34 }
 0x948   :  { %v5605_v37 = vpop.eup %5604 }
 0x949   :  { %v5607_v38 = vpop.eup %5606  ;;  %v2790_v39 = vadd.f32 1.0, %v5605_v37 }
 0x94a   :  { %v2796_v9 = vadd.f32 1.0, %v5607_v38 }
 0x94b   :  { %5612 = vrcp.f32 %v2790_v39 }
 0x94c   :  { %5614 = vrcp.f32 %v2796_v9 }
 0x950   :  { %v5609_v10 = vpop.eup %5608 }
 0x951   :  { %v5611_v40 = vpop.eup %5610  ;;  %v2802_v46 = vadd.f32 1.0, %v5609_v10 }
 0x953   :  { %5616 = vrcp.f32 %v2802_v46 }
 0x955   :  { %v5613_v42 = vpop.eup %5612 }
 0x956   :  { %v5615_v43 = vpop.eup %5614  ;;  %v2807_v45 = vmul.f32 %v5613_v42, %v5611_v40  ;;  %v3008_v40 = vld [vmem:[#allocation2 + $0x10] sm:$0xff] }
 0x957   :  { %v2806_v47 = vmul.f32 %v5615_v43, %v4505_v41  ;;  %v3053_v42 = vld [vmem:[#allocation3 + $0x10] sm:$0xff] }
 0x959   :  { %v6478_v48 = vadd.f32 %v2807_v45, %v2806_v47 }
 0x95b   :  { %5618 = vtanh.f32 %v6478_v48 }
 0x95d   :  { %v5617_v49 = vpop.eup %5616 }
 0x965   :  { %v5619_v50 = vpop.eup %5618 }
 0x966   :  { %v2810_v11 = vmul.f32 %v5619_v50, %v5617_v49 }
 0x968   :  { %v2811_v12 = vpack.c.bf16 %v2810_v11, %v2810_v11 }
 0x96a   :  { %5203 = vmatmul.mubr.msk.bf16.vlgmr.msra.gmra.mrb[104].mxu0 %vm169_vm2, %v2811_v12  ;;  %5211 = vmatmul.mubr.msk.bf16.vlgmr.msra.gmra.mrb[104].mxu1 %vm169_vm2, %v2811_v12 }
 0x96b   :  { %5215 = vmatpush3.bf16.msra.mxu0 %v6392_v6  ;;  %5223 = vmatpush3.bf16.msra.mxu1 %v6397_v7 }
 0x96c   :  { %5216 = vmatprep.subr.bf16.mxu0 %v5748_v8  ;;  %5224 = vmatprep.subr.bf16.mxu1 %v5748_v8 }
 0x96d   :  { %5218 = vmatprep.mubr.msk.bf16.mxu0 %vm5749_vm1, %v5748_v8  ;;  %5226 = vmatprep.mubr.msk.bf16.mxu1 %vm5749_vm1, %v5748_v8 }
 0x96f   :  { %5217 = vmatpush3.bf16.msra.mxu0 %v6406_v13  ;;  %5225 = vmatpush3.bf16.msra.mxu1 %v6411_v14 }
 0x970   :  { %5230 = vmatprep.subr.bf16.mxu0 %v5748_v8  ;;  %5238 = vmatprep.subr.bf16.mxu1 %v5748_v8 }
 0x972   :  { %5219 = vmatmul.mubr.msk.bf16.vlgmr.msra.gmra.mrb[108].mxu0 %vm169_vm2, %v2811_v12  ;;  %5227 = vmatmul.mubr.msk.bf16.vlgmr.msra.gmra.mrb[108].mxu1 %vm169_vm2, %v2811_v12 }
 0x973   :  { %5231 = vmatpush3.bf16.msra.mxu0 %v6347_v3  ;;  %5239 = vmatpush3.bf16.msra.mxu1 %v6352_v4 }
 0x974   :  { %5232 = vmatprep.subr.bf16.mxu0 %v5748_v8  ;;  %5240 = vmatprep.subr.bf16.mxu1 %v5748_v8 }
 0x975   :  { %5234 = vmatprep.mubr.msk.bf16.mxu0 %vm5749_vm1, %v5748_v8  ;;  %5242 = vmatprep.mubr.msk.bf16.mxu1 %vm5749_vm1, %v5748_v8 }
 0x977   :  { %5233 = vmatpush3.bf16.msra.mxu0 %v6367_v51  ;;  %5241 = vmatpush3.bf16.msra.mxu1 %v6372_v5 }
 0x978   :  { %5246 = vmatprep.subr.bf16.mxu0 %v5748_v8  ;;  %5254 = vmatprep.subr.bf16.mxu1 %v5748_v8 }
 0xa3d   :  { %v2850_v53 = vpop.f32.mrb[104].mxu0  ;;  %v2892_v55 = vpop.f32.mrb[104].mxu1 }
 0xa3e   :  { %v2856_v56 = vadd.f32 %v2850_v53, %v2812_v52  ;;  %v2898_v58 = vadd.f32 %v2892_v55, %v2857_v54  ;;  %v5204_v60 = vpop.f32.mrb[105].mxu0  ;;  %v5212_v61 = vpop.f32.mrb[105].mxu1  ;;  %v3137_v55 = vld [vmem:[#allocation5 + $0x10] sm:$0xff] }
 0xa3f   :  { %v2853_v62 = vpop.f32.mrb[106].mxu0  ;;  %v2895_v63 = vpop.f32.mrb[106].mxu1 }
 0xa40   :  { %v4525_v0 = vmul.f32 -1.442695, %v2856_v56  ;;  %v4526_v1 = vmul.f32 -1.442695, %v2898_v58  ;;  %v5205_v44 = vpop.f32.mrb[107].mxu0  ;;  %v5213_v2 = vpop.f32.mrb[107].mxu1 }
 0xa41   :  { %v3095_v44 = vld [vmem:[#allocation4 + $0x10] sm:$0xff] }
 0xa42   :  { %5620 = vpow2.f32 %v4525_v0 }
 0xa43   :  { %5622 = vpow2.f32 %v4526_v1 }
 0xa45   :  { %v2934_v57 = vpop.f32.mrb[108].mxu0  ;;  %v2976_v19 = vpop.f32.mrb[108].mxu1 }
 0xa46   :  { %v2982_v20 = vadd.f32 %v2976_v19, %v2941_v59  ;;  %v5220_v21 = vpop.f32.mrb[109].mxu0  ;;  %v5228_v22 = vpop.f32.mrb[109].mxu1  ;;  %v2940_v25 = vadd.f32 %v2934_v57, %v2899_v18 }
 0xa47   :  { %v2937_v23 = vpop.f32.mrb[110].mxu0  ;;  %v2979_v15 = vpop.f32.mrb[110].mxu1 }
 0xa48   :  { %v5221_v16 = vpop.f32.mrb[111].mxu0  ;;  %v5229_v17 = vpop.f32.mrb[111].mxu1  ;;  %v4527_v24 = vmul.f32 -1.442695, %v2982_v20 }
 0xa4a   :  { %5624 = vpow2.f32 %v4527_v24 }
 0xa4b   :  { %5626 = vtanh.f32 %v2940_v25 }
 0xa4c   :  { %v5621_v26 = vpop.eup %5620 }
 0xa4d   :  { %v5623_v27 = vpop.eup %5622  ;;  %v2986_v28 = vadd.f32 1.0, %v5621_v26 }
 0xa4e   :  { %v2992_v29 = vadd.f32 1.0, %v5623_v27 }
 0xa4f   :  { %5628 = vrcp.f32 %v2986_v28 }
 0xa50   :  { %5630 = vrcp.f32 %v2992_v29 }
 0xa54   :  { %v5625_v30 = vpop.eup %5624 }
 0xa55   :  { %v5627_v31 = vpop.eup %5626  ;;  %v2998_v36 = vadd.f32 1.0, %v5625_v30  ;;  %v3204_v30 = vld [vmem:[#allocation2 + $0x18] sm:$0xff] }
 0xa57   :  { %5632 = vrcp.f32 %v2998_v36 }
 0xa59   :  { %v5629_v33 = vpop.eup %5628 }
 0xa5a   :  { %v5631_v35 = vpop.eup %5630  ;;  %v3003_v32 = vmul.f32 %v5629_v33, %v5627_v31  ;;  %v3249_v33 = vld [vmem:[#allocation3 + $0x18] sm:$0xff] }
 0xa5b   :  { %v3002_v34 = vmul.f32 %v5631_v35, %v6478_v48 }
 0xa5d   :  { %v6510_v37 = vadd.f32 %v3003_v32, %v3002_v34 }
 0xa5f   :  { %5634 = vtanh.f32 %v6510_v37 }
 0xa61   :  { %v5633_v38 = vpop.eup %5632 }
 0xa69   :  { %v5635_v39 = vpop.eup %5634 }
 0xa6a   :  { %v3006_v9 = vmul.f32 %v5635_v39, %v5633_v38 }
 0xa6c   :  { %v3007_v10 = vpack.c.bf16 %v3006_v9, %v3006_v9 }
 0xa6e   :  { %5235 = vmatmul.mubr.msk.bf16.vlgmr.msra.gmra.mrb[112].mxu0 %vm169_vm2, %v3007_v10  ;;  %5243 = vmatmul.mubr.msk.bf16.vlgmr.msra.gmra.mrb[112].mxu1 %vm169_vm2, %v3007_v10 }
 0xa6f   :  { %5247 = vmatpush3.bf16.msra.mxu0 %v6392_v6  ;;  %5255 = vmatpush3.bf16.msra.mxu1 %v6397_v7 }
 0xa70   :  { %5248 = vmatprep.subr.bf16.mxu0 %v5748_v8  ;;  %5256 = vmatprep.subr.bf16.mxu1 %v5748_v8 }
 0xa71   :  { %5250 = vmatprep.mubr.msk.bf16.mxu0 %vm5749_vm1, %v5748_v8  ;;  %5258 = vmatprep.mubr.msk.bf16.mxu1 %vm5749_vm1, %v5748_v8 }
 0xa73   :  { %5249 = vmatpush3.bf16.msra.mxu0 %v6406_v13  ;;  %5257 = vmatpush3.bf16.msra.mxu1 %v6411_v14 }
 0xa74   :  { %5262 = vmatprep.subr.bf16.mxu0 %v5748_v8  ;;  %5270 = vmatprep.subr.bf16.mxu1 %v5748_v8 }
 0xa76   :  { %5251 = vmatmul.mubr.msk.bf16.vlgmr.msra.gmra.mrb[116].mxu0 %vm169_vm2, %v3007_v10  ;;  %5259 = vmatmul.mubr.msk.bf16.vlgmr.msra.gmra.mrb[116].mxu1 %vm169_vm2, %v3007_v10 }
 0xa77   :  { %5263 = vmatpush3.bf16.msra.mxu0 %v6347_v3  ;;  %5271 = vmatpush3.bf16.msra.mxu1 %v6352_v4 }
 0xa78   :  { %5264 = vmatprep.subr.bf16.mxu0 %v5748_v8  ;;  %5272 = vmatprep.subr.bf16.mxu1 %v5748_v8 }
 0xa79   :  { %5266 = vmatprep.mubr.msk.bf16.mxu0 %vm5749_vm1, %v5748_v8  ;;  %5274 = vmatprep.mubr.msk.bf16.mxu1 %vm5749_vm1, %v5748_v8 }
 0xa7b   :  { %5265 = vmatpush3.bf16.msra.mxu0 %v6367_v51  ;;  %5273 = vmatpush3.bf16.msra.mxu1 %v6372_v5 }
 0xa7c   :  { %5278 = vmatprep.subr.bf16.mxu0 %v5748_v8  ;;  %5286 = vmatprep.subr.bf16.mxu1 %v5748_v8 }
 0xb41   :  { %v3046_v41 = vpop.f32.mrb[112].mxu0  ;;  %v3088_v43 = vpop.f32.mrb[112].mxu1 }
 0xb42   :  { %v3052_v45 = vadd.f32 %v3046_v41, %v3008_v40  ;;  %v3094_v46 = vadd.f32 %v3088_v43, %v3053_v42  ;;  %v5236_v47 = vpop.f32.mrb[113].mxu0  ;;  %v5244_v48 = vpop.f32.mrb[113].mxu1  ;;  %v3333_v43 = vld [vmem:[#allocation5 + $0x18] sm:$0xff] }
 0xb43   :  { %v3049_v49 = vpop.f32.mrb[114].mxu0  ;;  %v3091_v50 = vpop.f32.mrb[114].mxu1 }
 0xb44   :  { %v4532_v11 = vmul.f32 -1.442695, %v3052_v45  ;;  %v4533_v12 = vmul.f32 -1.442695, %v3094_v46  ;;  %v5237_v52 = vpop.f32.mrb[115].mxu0  ;;  %v5245_v53 = vpop.f32.mrb[115].mxu1 }
 0xb45   :  { %v3291_v52 = vld [vmem:[#allocation4 + $0x18] sm:$0xff] }
 0xb46   :  { %5636 = vpow2.f32 %v4532_v11 }
 0xb47   :  { %5638 = vpow2.f32 %v4533_v12 }
 0xb49   :  { %v3130_v54 = vpop.f32.mrb[116].mxu0  ;;  %v3172_v56 = vpop.f32.mrb[116].mxu1 }
 0xb4a   :  { %v3178_v58 = vadd.f32 %v3172_v56, %v3137_v55  ;;  %v5252_v60 = vpop.f32.mrb[117].mxu0  ;;  %v5260_v61 = vpop.f32.mrb[117].mxu1  ;;  %v3136_v57 = vadd.f32 %v3130_v54, %v3095_v44 }
 0xb4b   :  { %v3133_v62 = vpop.f32.mrb[118].mxu0  ;;  %v3175_v63 = vpop.f32.mrb[118].mxu1 }
 0xb4c   :  { %v5253_v0 = vpop.f32.mrb[119].mxu0  ;;  %v5261_v1 = vpop.f32.mrb[119].mxu1  ;;  %v4534_v2 = vmul.f32 -1.442695, %v3178_v58 }
 0xb4e   :  { %5640 = vpow2.f32 %v4534_v2 }
 0xb4f   :  { %5642 = vtanh.f32 %v3136_v57 }
 0xb50   :  { %v5637_v59 = vpop.eup %5636 }
 0xb51   :  { %v5639_v19 = vpop.eup %5638  ;;  %v3182_v20 = vadd.f32 1.0, %v5637_v59 }
 0xb52   :  { %v3188_v21 = vadd.f32 1.0, %v5639_v19 }
 0xb53   :  { %5644 = vrcp.f32 %v3182_v20 }
 0xb54   :  { %5646 = vrcp.f32 %v3188_v21 }
 0xb58   :  { %v5641_v22 = vpop.eup %5640 }
 0xb59   :  { %v5643_v23 = vpop.eup %5642  ;;  %v3194_v18 = vadd.f32 1.0, %v5641_v22  ;;  %v3400_v22 = vld [vmem:[#allocation2 + $0x20] sm:$0xff] }
 0xb5b   :  { %5648 = vrcp.f32 %v3194_v18 }
 0xb5d   :  { %v5645_v15 = vpop.eup %5644 }
 0xb5e   :  { %v5647_v16 = vpop.eup %5646  ;;  %v3199_v17 = vmul.f32 %v5645_v15, %v5643_v23  ;;  %v3445_v15 = vld [vmem:[#allocation3 + $0x20] sm:$0xff] }
 0xb5f   :  { %v3198_v24 = vmul.f32 %v5647_v16, %v6510_v37 }
 0xb61   :  { %v6542_v25 = vadd.f32 %v3199_v17, %v3198_v24 }
 0xb63   :  { %5650 = vtanh.f32 %v6542_v25 }
 0xb65   :  { %v5649_v26 = vpop.eup %5648 }
 0xb6d   :  { %v5651_v27 = vpop.eup %5650 }
 0xb6e   :  { %v3202_v28 = vmul.f32 %v5651_v27, %v5649_v26 }
 0xb70   :  { %v3203_v29 = vpack.c.bf16 %v3202_v28, %v3202_v28 }
 0xb72   :  { %5267 = vmatmul.mubr.msk.bf16.vlgmr.msra.gmra.mrb[120].mxu0 %vm169_vm2, %v3203_v29  ;;  %5275 = vmatmul.mubr.msk.bf16.vlgmr.msra.gmra.mrb[120].mxu1 %vm169_vm2, %v3203_v29 }
 0xb73   :  { %5279 = vmatpush3.bf16.msra.mxu0 %v6392_v6  ;;  %5287 = vmatpush3.bf16.msra.mxu1 %v6397_v7 }
 0xb74   :  { %5280 = vmatprep.subr.bf16.mxu0 %v5748_v8  ;;  %5288 = vmatprep.subr.bf16.mxu1 %v5748_v8 }
 0xb75   :  { %5282 = vmatprep.mubr.msk.bf16.mxu0 %vm5749_vm1, %v5748_v8  ;;  %5290 = vmatprep.mubr.msk.bf16.mxu1 %vm5749_vm1, %v5748_v8 }
 0xb77   :  { %5281 = vmatpush3.bf16.msra.mxu0 %v6406_v13  ;;  %5289 = vmatpush3.bf16.msra.mxu1 %v6411_v14 }
 0xb78   :  { %5294 = vmatprep.subr.bf16.mxu0 %v5748_v8  ;;  %5302 = vmatprep.subr.bf16.mxu1 %v5748_v8 }
 0xb7a   :  { %5283 = vmatmul.mubr.msk.bf16.vlgmr.msra.gmra.mrb[124].mxu0 %vm169_vm2, %v3203_v29  ;;  %5291 = vmatmul.mubr.msk.bf16.vlgmr.msra.gmra.mrb[124].mxu1 %vm169_vm2, %v3203_v29 }
 0xb7b   :  { %5295 = vmatpush3.bf16.msra.mxu0 %v6347_v3  ;;  %5303 = vmatpush3.bf16.msra.mxu1 %v6352_v4 }
 0xb7c   :  { %5296 = vmatprep.subr.bf16.mxu0 %v5748_v8  ;;  %5304 = vmatprep.subr.bf16.mxu1 %v5748_v8 }
 0xb7d   :  { %5298 = vmatprep.mubr.msk.bf16.mxu0 %vm5749_vm1, %v5748_v8  ;;  %5306 = vmatprep.mubr.msk.bf16.mxu1 %vm5749_vm1, %v5748_v8 }
 0xb7f   :  { %5297 = vmatpush3.bf16.msra.mxu0 %v6367_v51  ;;  %5305 = vmatpush3.bf16.msra.mxu1 %v6372_v5 }
 0xb80   :  { %5310 = vmatprep.subr.bf16.mxu0 %v5748_v8  ;;  %5318 = vmatprep.subr.bf16.mxu1 %v5748_v8 }
 0xc45   :  { %v3242_v31 = vpop.f32.mrb[120].mxu0  ;;  %v3284_v35 = vpop.f32.mrb[120].mxu1 }
 0xc46   :  { %v3248_v32 = vadd.f32 %v3242_v31, %v3204_v30  ;;  %v3290_v36 = vadd.f32 %v3284_v35, %v3249_v33  ;;  %v5268_v34 = vpop.f32.mrb[121].mxu0  ;;  %v5276_v37 = vpop.f32.mrb[121].mxu1  ;;  %v3529_v35 = vld [vmem:[#allocation5 + $0x20] sm:$0xff] }
 0xc47   :  { %v3245_v38 = vpop.f32.mrb[122].mxu0  ;;  %v3287_v39 = vpop.f32.mrb[122].mxu1 }
 0xc48   :  { %v4539_v9 = vmul.f32 -1.442695, %v3248_v32  ;;  %v4540_v10 = vmul.f32 -1.442695, %v3290_v36  ;;  %v5269_v40 = vpop.f32.mrb[123].mxu0  ;;  %v5277_v41 = vpop.f32.mrb[123].mxu1 }
 0xc49   :  { %v3487_v40 = vld [vmem:[#allocation4 + $0x20] sm:$0xff] }
 0xc4a   :  { %5652 = vpow2.f32 %v4539_v9 }
 0xc4b   :  { %5654 = vpow2.f32 %v4540_v10 }
 0xc4d   :  { %v3326_v42 = vpop.f32.mrb[124].mxu0  ;;  %v3368_v45 = vpop.f32.mrb[124].mxu1 }
 0xc4e   :  { %v3374_v46 = vadd.f32 %v3368_v45, %v3333_v43  ;;  %v5284_v47 = vpop.f32.mrb[125].mxu0  ;;  %v5292_v48 = vpop.f32.mrb[125].mxu1  ;;  %v3332_v54 = vadd.f32 %v3326_v42, %v3291_v52 }
 0xc4f   :  { %v3329_v49 = vpop.f32.mrb[126].mxu0  ;;  %v3371_v50 = vpop.f32.mrb[126].mxu1 }
 0xc50   :  { %v5285_v11 = vpop.f32.mrb[127].mxu0  ;;  %v5293_v12 = vpop.f32.mrb[127].mxu1  ;;  %v4541_v53 = vmul.f32 -1.442695, %v3374_v46 }
 0xc52   :  { %5656 = vpow2.f32 %v4541_v53 }
 0xc53   :  { %5658 = vtanh.f32 %v3332_v54 }
 0xc54   :  { %v5653_v55 = vpop.eup %5652 }
 0xc55   :  { %v5655_v56 = vpop.eup %5654  ;;  %v3378_v58 = vadd.f32 1.0, %v5653_v55 }
 0xc56   :  { %v3384_v60 = vadd.f32 1.0, %v5655_v56 }
 0xc57   :  { %5660 = vrcp.f32 %v3378_v58 }
 0xc58   :  { %5662 = vrcp.f32 %v3384_v60 }
 0xc5c   :  { %v5657_v61 = vpop.eup %5656 }
 0xc5d   :  { %v5659_v62 = vpop.eup %5658  ;;  %v3390_v44 = vadd.f32 1.0, %v5657_v61 }
 0xc5f   :  { %5664 = vrcp.f32 %v3390_v44 }
 0xc61   :  { %v5661_v63 = vpop.eup %5660 }
 0xc62   :  { %v5663_v0 = vpop.eup %5662  ;;  %v3395_v1 = vmul.f32 %v5661_v63, %v5659_v62 }
 0xc63   :  { %v3394_v2 = vmul.f32 %v5663_v0, %v6542_v25 }
 0xc65   :  { %v6574_v57 = vadd.f32 %v3395_v1, %v3394_v2 }
 0xc67   :  { %5666 = vtanh.f32 %v6574_v57 }
 0xc69   :  { %v5665_v59 = vpop.eup %5664 }
 0xc71   :  { %v5667_v19 = vpop.eup %5666 }
 0xc72   :  { %v3398_v20 = vmul.f32 %v5667_v19, %v5665_v59 }
 0xc74   :  { %v3399_v21 = vpack.c.bf16 %v3398_v20, %v3398_v20 }
 0xc76   :  { %5299 = vmatmul.mubr.msk.bf16.vlgmr.msra.gmra.mrb[128].mxu0 %vm169_vm2, %v3399_v21  ;;  %5307 = vmatmul.mubr.msk.bf16.vlgmr.msra.gmra.mrb[128].mxu1 %vm169_vm2, %v3399_v21 }
 0xc77   :  { %5311 = vmatpush3.bf16.msra.mxu0 %v6392_v6  ;;  %5319 = vmatpush3.bf16.msra.mxu1 %v6397_v7 }
 0xc78   :  { %5312 = vmatprep.subr.bf16.mxu0 %v5748_v8  ;;  %5320 = vmatprep.subr.bf16.mxu1 %v5748_v8 }
 0xc79   :  { %5314 = vmatprep.mubr.msk.bf16.mxu0 %vm5749_vm1, %v5748_v8  ;;  %5322 = vmatprep.mubr.msk.bf16.mxu1 %vm5749_vm1, %v5748_v8 }
 0xc7b   :  { %5313 = vmatpush3.bf16.msra.mxu0 %v6406_v13  ;;  %5321 = vmatpush3.bf16.msra.mxu1 %v6411_v14 }
 0xc7c   :  { %5326 = vmatprep.subr.bf16.mxu0 %v5748_v8  ;;  %5334 = vmatprep.subr.bf16.mxu1 %v5748_v8 }
 0xc7e   :  { %5315 = vmatmul.mubr.msk.bf16.vlgmr.msra.gmra.mrb[132].mxu0 %vm169_vm2, %v3399_v21  ;;  %5323 = vmatmul.mubr.msk.bf16.vlgmr.msra.gmra.mrb[132].mxu1 %vm169_vm2, %v3399_v21 }
 0xc7f   :  { %5327 = vmatpush3.bf16.msra.mxu0 %v6347_v3  ;;  %5335 = vmatpush3.bf16.msra.mxu1 %v6352_v4 }
 0xc80   :  { %5328 = vmatprep.subr.bf16.mxu0 %v5748_v8  ;;  %5336 = vmatprep.subr.bf16.mxu1 %v5748_v8 }
 0xc81   :  { %5330 = vmatprep.mubr.msk.bf16.mxu0 %vm5749_vm1, %v5748_v8  ;;  %5338 = vmatprep.mubr.msk.bf16.mxu1 %vm5749_vm1, %v5748_v8 }
 0xc83   :  { %5329 = vmatpush3.bf16.msra.mxu0 %v6367_v51  ;;  %5337 = vmatpush3.bf16.msra.mxu1 %v6372_v5 }
 0xc84   :  { %5342 = vmatprep.subr.bf16.mxu0 %v5748_v8  ;;  %5350 = vmatprep.subr.bf16.mxu1 %v5748_v8 }
 0xd49   :  { %v3438_v23 = vpop.f32.mrb[128].mxu0  ;;  %v3480_v16 = vpop.f32.mrb[128].mxu1 }
 0xd4a   :  { %v3444_v17 = vadd.f32 %v3438_v23, %v3400_v22  ;;  %v3486_v18 = vadd.f32 %v3480_v16, %v3445_v15  ;;  %v5300_v24 = vpop.f32.mrb[129].mxu0  ;;  %v5308_v25 = vpop.f32.mrb[129].mxu1 }
 0xd4b   :  { %v3441_v26 = vpop.f32.mrb[130].mxu0  ;;  %v3483_v27 = vpop.f32.mrb[130].mxu1 }
 0xd4c   :  { %v4546_v28 = vmul.f32 -1.442695, %v3444_v17  ;;  %v4547_v29 = vmul.f32 -1.442695, %v3486_v18  ;;  %v5301_v30 = vpop.f32.mrb[131].mxu0  ;;  %v5309_v31 = vpop.f32.mrb[131].mxu1 }
 0xd4d   :  { %v3683_v17 = vld [vmem:[#allocation4 + $0x28] sm:$0xff] }
 0xd4e   :  { %5668 = vpow2.f32 %v4546_v28 }
 0xd4f   :  { %5670 = vpow2.f32 %v4547_v29 }
 0xd51   :  { %v3522_v33 = vpop.f32.mrb[132].mxu0  ;;  %v3564_v32 = vpop.f32.mrb[132].mxu1 }
 0xd52   :  { %v3570_v36 = vadd.f32 %v3564_v32, %v3529_v35  ;;  %v5316_v34 = vpop.f32.mrb[133].mxu0  ;;  %v5324_v37 = vpop.f32.mrb[133].mxu1  ;;  %v3528_v42 = vadd.f32 %v3522_v33, %v3487_v40  ;;  %v6652_v40 = vld [vmem:[%s6762_s5 + $0x30] sm:$0xff]  }
 0xd53   :  { %v3525_v38 = vpop.f32.mrb[134].mxu0  ;;  %v3567_v39 = vpop.f32.mrb[134].mxu1 }
 0xd54   :  { %v5317_v9 = vpop.f32.mrb[135].mxu0  ;;  %v5325_v10 = vpop.f32.mrb[135].mxu1  ;;  %v4548_v41 = vmul.f32 -1.442695, %v3570_v36 }
 0xd55   :  { %v6646_v10 = vld [vmem:[%s6762_s5 + $0x20] sm:$0xff]  }
 0xd56   :  { %5672 = vpow2.f32 %v4548_v41  ;;  %v6664_v41 = vld [vmem:[%s6762_s5 + $0x28] sm:$0xff]  }
 0xd57   :  { %5674 = vtanh.f32 %v3528_v42  ;;  %v6670_v42 = vld [vmem:[%s6762_s5 + $0x38] sm:$0xff]  }
 0xd58   :  { %v5669_v43 = vpop.eup %5668 }
 0xd59   :  { %v5671_v45 = vpop.eup %5670  ;;  %v3574_v46 = vadd.f32 1.0, %v5669_v43  ;;  %v5744_v43 = vld [vmem:[%s6762_s5] sm:$0xff]  }
 0xd5a   :  { %v3580_v47 = vadd.f32 1.0, %v5671_v45  ;;  %v5745_v45 = vld [vmem:[%s6762_s5 + $0x10] sm:$0xff]  }
 0xd5b   :  { %5676 = vrcp.f32 %v3574_v46  ;;  %v5746_v46 = vld [vmem:[%s6762_s5 + $0x8] sm:$0xff]  }
 0xd5c   :  { %5678 = vrcp.f32 %v3580_v47  ;;  %v5747_v47 = vld [vmem:[%s6762_s5 + $0x18] sm:$0xff]  }
 0xd60   :  { %v5673_v48 = vpop.eup %5672 }
 0xd61   :  { %v5675_v49 = vpop.eup %5674  ;;  %v3586_v52 = vadd.f32 1.0, %v5673_v48  ;;  %v3792_v48 = vld [vmem:[#allocation2 + $0x30] sm:$0xff] }
 0xd63   :  { %5680 = vrcp.f32 %v3586_v52 }
 0xd65   :  { %v5677_v50 = vpop.eup %5676 }
 0xd66   :  { %v5679_v11 = vpop.eup %5678  ;;  %v3591_v12 = vmul.f32 %v5677_v50, %v5675_v49  ;;  %v3837_v50 = vld [vmem:[#allocation3 + $0x30] sm:$0xff] }
 0xd67   :  { %v3590_v53 = vmul.f32 %v5679_v11, %v6574_v57  ;;  %v3725_v57 = vld [vmem:[#allocation5 + $0x28] sm:$0xff] }
 0xd69   :  { %v6606_v54 = vadd.f32 %v3591_v12, %v3590_v53 }
 0xd6b   :  { %5682 = vtanh.f32 %v6606_v54 }
 0xd6d   :  { %v5681_v55 = vpop.eup %5680 }
 0xd75   :  { %v5683_v56 = vpop.eup %5682 }
 0xd76   :  { %v3594_v58 = vmul.f32 %v5683_v56, %v5681_v55 }
 0xd78   :  { %v3595_v60 = vpack.c.bf16 %v3594_v58, %v3594_v58 }
 0xd7a   :  { %5331 = vmatmul.mubr.msk.bf16.vlgmr.msra.gmra.mrb[136].mxu0 %vm169_vm2, %v3595_v60  ;;  %5339 = vmatmul.mubr.msk.bf16.vlgmr.msra.gmra.mrb[136].mxu1 %vm169_vm2, %v3595_v60 }
 0xd7b   :  { %5343 = vmatpush3.bf16.msra.mxu0 %v6392_v6  ;;  %5351 = vmatpush3.bf16.msra.mxu1 %v6397_v7  ;;  %v3641_v6 = vld [vmem:[#allocation3 + $0x28] sm:$0xff] }
 0xd7c   :  { %5344 = vmatprep.subr.bf16.mxu0 %v5748_v8  ;;  %5352 = vmatprep.subr.bf16.mxu1 %v5748_v8 }
 0xd7d   :  { %5346 = vmatprep.mubr.msk.bf16.mxu0 %vm5749_vm1, %v5748_v8  ;;  %5354 = vmatprep.mubr.msk.bf16.mxu1 %vm5749_vm1, %v5748_v8 }
 0xd7f   :  { %5345 = vmatpush3.bf16.msra.mxu0 %v6406_v13  ;;  %5353 = vmatpush3.bf16.msra.mxu1 %v6411_v14 }
 0xd80   :  { %5358 = vmatprep.subr.bf16.mxu0 %v5748_v8  ;;  %5366 = vmatprep.subr.bf16.mxu1 %v5748_v8 }
 0xd82   :  { %5347 = vmatmul.mubr.msk.bf16.vlgmr.msra.gmra.mrb[140].mxu0 %vm169_vm2, %v3595_v60  ;;  %5355 = vmatmul.mubr.msk.bf16.vlgmr.msra.gmra.mrb[140].mxu1 %vm169_vm2, %v3595_v60 }
 0xd83   :  { %5359 = vmatpush3.bf16.msra.mxu0 %v6347_v3  ;;  %5367 = vmatpush3.bf16.msra.mxu1 %v6352_v4  ;;  %v3596_v3 = vld [vmem:[#allocation2 + $0x28] sm:$0xff] }
 0xd84   :  { %5360 = vmatprep.subr.bf16.mxu0 %v5748_v8  ;;  %5368 = vmatprep.subr.bf16.mxu1 %v5748_v8 }
 0xd85   :  { %5362 = vmatprep.mubr.msk.bf16.mxu0 %vm5749_vm1, %v5748_v8  ;;  %5370 = vmatprep.mubr.msk.bf16.mxu1 %vm5749_vm1, %v5748_v8 }
 0xd87   :  { %5361 = vmatpush3.bf16.msra.mxu0 %v6367_v51  ;;  %5369 = vmatpush3.bf16.msra.mxu1 %v6372_v5 }
 0xd88   :  { %5374 = vmatprep.subr.bf16.mxu0 %v5748_v8  ;;  %5382 = vmatprep.subr.bf16.mxu1 %v5748_v8 }
 0xe4d   :  { %v3634_v4 = vpop.f32.mrb[136].mxu0  ;;  %v3676_v7 = vpop.f32.mrb[136].mxu1 }
 0xe4e   :  { %v3640_v13 = vadd.f32 %v3634_v4, %v3596_v3  ;;  %v3682_v14 = vadd.f32 %v3676_v7, %v3641_v6  ;;  %v5332_v61 = vpop.f32.mrb[137].mxu0  ;;  %v5340_v62 = vpop.f32.mrb[137].mxu1  ;;  %v3921_v7 = vld [vmem:[#allocation5 + $0x30] sm:$0xff] }
 0xe4f   :  { %v3637_v63 = vpop.f32.mrb[138].mxu0  ;;  %v3679_v0 = vpop.f32.mrb[138].mxu1 }
 0xe50   :  { %v4553_v1 = vmul.f32 -1.442695, %v3640_v13  ;;  %v4554_v44 = vmul.f32 -1.442695, %v3682_v14  ;;  %v5333_v2 = vpop.f32.mrb[139].mxu0  ;;  %v5341_v51 = vpop.f32.mrb[139].mxu1 }
 0xe51   :  { %v3879_v2 = vld [vmem:[#allocation4 + $0x30] sm:$0xff] }
 0xe52   :  { %5684 = vpow2.f32 %v4553_v1 }
 0xe53   :  { %5686 = vpow2.f32 %v4554_v44 }
 0xe55   :  { %v3718_v5 = vpop.f32.mrb[140].mxu0  ;;  %v3760_v59 = vpop.f32.mrb[140].mxu1 }
 0xe56   :  { %v3766_v19 = vadd.f32 %v3760_v59, %v3725_v57  ;;  %v5348_v20 = vpop.f32.mrb[141].mxu0  ;;  %v5356_v21 = vpop.f32.mrb[141].mxu1  ;;  %v3724_v24 = vadd.f32 %v3718_v5, %v3683_v17 }
 0xe57   :  { %v3721_v22 = vpop.f32.mrb[142].mxu0  ;;  %v3763_v23 = vpop.f32.mrb[142].mxu1 }
 0xe58   :  { %v5349_v15 = vpop.f32.mrb[143].mxu0  ;;  %v5357_v16 = vpop.f32.mrb[143].mxu1  ;;  %v4555_v18 = vmul.f32 -1.442695, %v3766_v19 }
 0xe5a   :  { %5688 = vpow2.f32 %v4555_v18 }
 0xe5b   :  { %5690 = vtanh.f32 %v3724_v24 }
 0xe5c   :  { %v5685_v25 = vpop.eup %5684 }
 0xe5d   :  { %v5687_v26 = vpop.eup %5686  ;;  %v3770_v27 = vadd.f32 1.0, %v5685_v25 }
 0xe5e   :  { %v3776_v28 = vadd.f32 1.0, %v5687_v26 }
 0xe5f   :  { %5692 = vrcp.f32 %v3770_v27 }
 0xe60   :  { %5694 = vrcp.f32 %v3776_v28 }
 0xe64   :  { %v5689_v29 = vpop.eup %5688 }
 0xe65   :  { %v5691_v30 = vpop.eup %5690  ;;  %v3782_v32 = vadd.f32 1.0, %v5689_v29  ;;  %v5472_v29 = vld [vmem:[%s6766_s9] sm:$0xff]  }
 0xe67   :  { %5696 = vrcp.f32 %v3782_v32 }
 0xe69   :  { %v5693_v31 = vpop.eup %5692 }
 0xe6a   :  { %v5695_v33 = vpop.eup %5694  ;;  %v3787_v35 = vmul.f32 %v5693_v31, %v5691_v30  ;;  %v5473_v30 = vld [vmem:[%s6766_s9 + $0x8] sm:$0xff]   ;;  %v3988_v31 = vld [vmem:[#allocation2 + $0x38] sm:$0xff] }
 0xe6b   :  { %v3786_v36 = vmul.f32 %v5695_v33, %v6606_v54 }
 0xe6d   :  { %v6638_v34 = vadd.f32 %v3787_v35, %v3786_v36  ;;  %v4033_v35 = vld [vmem:[#allocation3 + $0x38] sm:$0xff] }
 0xe6f   :  { %5698 = vtanh.f32 %v6638_v34 }
 0xe71   :  { %v5697_v37 = vpop.eup %5696 }
 0xe79   :  { %v5699_v38 = vpop.eup %5698 }
 0xe7a   :  { %v3790_v39 = vmul.f32 %v5699_v38, %v5697_v37 }
 0xe7c   :  { %v3791_v9 = vpack.c.bf16 %v3790_v39, %v3790_v39 }
 0xe7e   :  { %5363 = vmatmul.mubr.msk.bf16.vlgmr.msra.gmra.mrb[144].mxu0 %vm169_vm2, %v3791_v9  ;;  %5371 = vmatmul.mubr.msk.bf16.vlgmr.msra.gmra.mrb[144].mxu1 %vm169_vm2, %v3791_v9 }
 0xe7f   :  { %5375 = vmatpush3.bf16.msra.mxu0 %v6646_v10  ;;  %5383 = vmatpush3.bf16.msra.mxu1 %v6652_v40 }
 0xe80   :  { %5376 = vmatprep.subr.bf16.mxu0 %v5748_v8  ;;  %5384 = vmatprep.subr.bf16.mxu1 %v5748_v8 }
 0xe81   :  { %5378 = vmatprep.mubr.msk.bf16.mxu0 %vm5749_vm1, %v5748_v8  ;;  %5386 = vmatprep.mubr.msk.bf16.mxu1 %vm5749_vm1, %v5748_v8 }
 0xe83   :  { %5377 = vmatpush3.bf16.msra.mxu0 %v6664_v41  ;;  %5385 = vmatpush3.bf16.msra.mxu1 %v6670_v42 }
 0xe84   :  { %5390 = vmatprep.subr.bf16.mxu0 %v5748_v8  ;;  %5398 = vmatprep.subr.bf16.mxu1 %v5748_v8 }
 0xe86   :  { %5379 = vmatmul.mubr.msk.bf16.vlgmr.msra.gmra.mrb[148].mxu0 %vm169_vm2, %v3791_v9  ;;  %5387 = vmatmul.mubr.msk.bf16.vlgmr.msra.gmra.mrb[148].mxu1 %vm169_vm2, %v3791_v9 }
 0xe87   :  { %5391 = vmatpush3.bf16.msra.mxu0 %v5744_v43  ;;  %5399 = vmatpush3.bf16.msra.mxu1 %v5745_v45  ;;  %v4117_v45 = vld [vmem:[#allocation5 + $0x38] sm:$0xff] }
 0xe88   :  { %5392 = vmatprep.subr.bf16.mxu0 %v5748_v8  ;;  %5400 = vmatprep.subr.bf16.mxu1 %v5748_v8 }
 0xe89   :  { %5394 = vmatprep.mubr.msk.bf16.mxu0 %vm5749_vm1, %v5748_v8  ;;  %5402 = vmatprep.mubr.msk.bf16.mxu1 %vm5749_vm1, %v5748_v8 }
 0xe8b   :  { %5393 = vmatpush3.bf16.msra.mxu0 %v5746_v46  ;;  %5401 = vmatpush3.bf16.msra.mxu1 %v5747_v47 }
 0xe8c   :  { %5406 = vmatprep.subr.bf16.mxu0 %v5748_v8  ;;  %5414 = vmatprep.subr.bf16.mxu1 %v5748_v8 }
 0xf51   :  { %v3830_v49 = vpop.f32.mrb[144].mxu0  ;;  %v3872_v11 = vpop.f32.mrb[144].mxu1 }
 0xf52   :  { %v3836_v12 = vadd.f32 %v3830_v49, %v3792_v48  ;;  %v3878_v52 = vadd.f32 %v3872_v11, %v3837_v50  ;;  %v5364_v53 = vpop.f32.mrb[145].mxu0  ;;  %v5372_v54 = vpop.f32.mrb[145].mxu1 }
 0xf53   :  { %v3833_v55 = vpop.f32.mrb[146].mxu0  ;;  %v3875_v56 = vpop.f32.mrb[146].mxu1  ;;  %v4075_v53 = vld [vmem:[#allocation4 + $0x38] sm:$0xff] }
 0xf54   :  { %v4560_v58 = vmul.f32 -1.442695, %v3836_v12  ;;  %v4561_v60 = vmul.f32 -1.442695, %v3878_v52  ;;  %v5365_v3 = vpop.f32.mrb[147].mxu0  ;;  %v5373_v4 = vpop.f32.mrb[147].mxu1 }
 0xf56   :  { %5700 = vpow2.f32 %v4560_v58 }
 0xf57   :  { %5702 = vpow2.f32 %v4561_v60 }
 0xf59   :  { %v3914_v6 = vpop.f32.mrb[148].mxu0  ;;  %v3956_v13 = vpop.f32.mrb[148].mxu1 }
 0xf5a   :  { %v3962_v14 = vadd.f32 %v3956_v13, %v3921_v7  ;;  %v5380_v61 = vpop.f32.mrb[149].mxu0  ;;  %v5388_v62 = vpop.f32.mrb[149].mxu1  ;;  %v3920_v5 = vadd.f32 %v3914_v6, %v3879_v2 }
 0xf5b   :  { %v3917_v63 = vpop.f32.mrb[150].mxu0  ;;  %v3959_v0 = vpop.f32.mrb[150].mxu1 }
 0xf5c   :  { %v5381_v1 = vpop.f32.mrb[151].mxu0  ;;  %v5389_v44 = vpop.f32.mrb[151].mxu1  ;;  %v4562_v51 = vmul.f32 -1.442695, %v3962_v14 }
 0xf5e   :  { %5704 = vpow2.f32 %v4562_v51  ;;  %v5474_v51 = vld [vmem:[%s6767_s11] sm:$0xff]  }
 0xf5f   :  { %5706 = vtanh.f32 %v3920_v5  ;;  %v5475_v5 = vld [vmem:[%s6767_s11 + $0x8] sm:$0xff]  }
 0xf60   :  { %v5701_v57 = vpop.eup %5700 }
 0xf61   :  { %v5703_v59 = vpop.eup %5702  ;;  %v3966_v19 = vadd.f32 1.0, %v5701_v57  ;;  %v4572_v57 = vld [vmem:[%s6768_s10] ss:$0 sm:$0xff] }
 0xf62   :  { %v3972_v20 = vadd.f32 1.0, %v5703_v59 }
 0xf63   :  { %5708 = vrcp.f32 %v3966_v19 }
 0xf64   :  { %5710 = vrcp.f32 %v3972_v20 }
 0xf68   :  { %v5705_v21 = vpop.eup %5704 }
 0xf69   :  { %v5707_v22 = vpop.eup %5706  ;;  %v3978_v17 = vadd.f32 1.0, %v5705_v21 }
 0xf6b   :  { %5712 = vrcp.f32 %v3978_v17 }
 0xf6d   :  { %v5709_v23 = vpop.eup %5708 }
 0xf6e   :  { %v5711_v15 = vpop.eup %5710  ;;  %v3983_v16 = vmul.f32 %v5709_v23, %v5707_v22 }
 0xf6f   :  { %v3982_v18 = vmul.f32 %v5711_v15, %v6638_v34 }
 0xf71   :  { %v6698_v24 = vadd.f32 %v3983_v16, %v3982_v18 }
 0xf73   :  { %5714 = vtanh.f32 %v6698_v24 }
 0xf75   :  { %v5713_v25 = vpop.eup %5712 }
 0xf7d   :  { %v5715_v26 = vpop.eup %5714 }
 0xf7e   :  { %v3986_v27 = vmul.f32 %v5715_v26, %v5713_v25 }
 0xf80   :  { %v3987_v28 = vpack.c.bf16 %v3986_v27, %v3986_v27 }
 0xf82   :  { %5395 = vmatmul.mubr.msk.bf16.vlgmr.msra.gmra.mrb[152].mxu0 %vm169_vm2, %v3987_v28  ;;  %5403 = vmatmul.mubr.msk.bf16.vlgmr.msra.gmra.mrb[152].mxu1 %vm169_vm2, %v3987_v28 }
 0xf83   :  { %5407 = vmatpush3.bf16.msra.mxu0 %v6646_v10  ;;  %5415 = vmatpush3.bf16.msra.mxu1 %v6652_v40 }
 0xf84   :  { %5408 = vmatprep.subr.bf16.mxu0 %v5748_v8  ;;  %5416 = vmatprep.subr.bf16.mxu1 %v5748_v8 }
 0xf85   :  { %5410 = vmatprep.mubr.msk.bf16.mxu0 %vm5749_vm1, %v5748_v8  ;;  %5418 = vmatprep.mubr.msk.bf16.mxu1 %vm5749_vm1, %v5748_v8 }
 0xf87   :  { %5409 = vmatpush3.bf16.msra.mxu0 %v6664_v41  ;;  %5417 = vmatpush3.bf16.msra.mxu1 %v6670_v42 }
 0xf88   :  { %5422 = vmatprep.subr.bf16.mxu0 %v5748_v8  ;;  %5430 = vmatprep.subr.bf16.mxu1 %v5748_v8 }
 0xf8a   :  { %5411 = vmatmul.mubr.msk.bf16.vlgmr.msra.gmra.mrb[156].mxu0 %vm169_vm2, %v3987_v28  ;;  %5419 = vmatmul.mubr.msk.bf16.vlgmr.msra.gmra.mrb[156].mxu1 %vm169_vm2, %v3987_v28 }
 0xf8b   :  { %5426 = vmatprep.mubr.msk.bf16.mxu0 %vm5749_vm1, %v5748_v8  ;;  %5434 = vmatprep.mubr.msk.bf16.mxu1 %vm5749_vm1, %v5748_v8 }
 0xf8c   :  { %5423 = vmatpush3.bf16.msra.mxu0 %v5472_v29  ;;  %5431 = vmatpush3.bf16.msra.mxu1 %v5474_v51 }
 0xf8d   :  { %5424 = vmatprep.subr.bf16.mxu0 %v5748_v8  ;;  %5432 = vmatprep.subr.bf16.mxu1 %v5748_v8  ;;  %v4576_v8 = vld [vmem:[%s6769_s12] ss:$0 sm:$0xff] }
 0xf90   :  { %5425 = vmatpush3.bf16.msra.mxu0 %v5473_v30  ;;  %5433 = vmatpush3.bf16.msra.mxu1 %v5475_v5 }
0x1055   :  { %v4026_v33 = vpop.f32.mrb[152].mxu0  ;;  %v4068_v32 = vpop.f32.mrb[152].mxu1 }
0x1056   :  { %v4032_v36 = vadd.f32 %v4026_v33, %v3988_v31  ;;  %v4074_v34 = vadd.f32 %v4068_v32, %v4033_v35  ;;  %v5396_v37 = vpop.f32.mrb[153].mxu0  ;;  %v5404_v38 = vpop.f32.mrb[153].mxu1 }
0x1057   :  { %v4029_v39 = vpop.f32.mrb[154].mxu0  ;;  %v4071_v9 = vpop.f32.mrb[154].mxu1 }
0x1058   :  { %v4567_v10 = vmul.f32 -1.442695, %v4032_v36  ;;  %v4568_v40 = vmul.f32 -1.442695, %v4074_v34  ;;  %v5397_v41 = vpop.f32.mrb[155].mxu0  ;;  %v5405_v42 = vpop.f32.mrb[155].mxu1 }
0x105a   :  { %5716 = vpow2.f32 %v4567_v10 }
0x105b   :  { %5718 = vpow2.f32 %v4568_v40 }
0x105d   :  { %v4110_v43 = vpop.f32.mrb[156].mxu0  ;;  %v4152_v46 = vpop.f32.mrb[156].mxu1 }
0x105e   :  { %v4158_v47 = vadd.f32 %v4152_v46, %v4117_v45  ;;  %v5412_v48 = vpop.f32.mrb[157].mxu0  ;;  %v5420_v49 = vpop.f32.mrb[157].mxu1  ;;  %v4116_v55 = vadd.f32 %v4110_v43, %v4075_v53 }
0x105f   :  { %v4113_v50 = vpop.f32.mrb[158].mxu0  ;;  %v4155_v11 = vpop.f32.mrb[158].mxu1 }
0x1060   :  { %v5413_v12 = vpop.f32.mrb[159].mxu0  ;;  %v5421_v52 = vpop.f32.mrb[159].mxu1  ;;  %v4569_v54 = vmul.f32 -1.442695, %v4158_v47 }
0x1062   :  { %5720 = vpow2.f32 %v4569_v54 }
0x1063   :  { %5722 = vtanh.f32 %v4116_v55 }
0x1064   :  { %v5717_v56 = vpop.eup %5716 }
0x1065   :  { %v5719_v58 = vpop.eup %5718  ;;  %v4162_v60 = vadd.f32 1.0, %v5717_v56 }
0x1066   :  { %v4168_v3 = vadd.f32 1.0, %v5719_v58 }
0x1067   :  { %5724 = vrcp.f32 %v4162_v60 }
0x1068   :  { %5726 = vrcp.f32 %v4168_v3 }
0x106c   :  { %v5721_v4 = vpop.eup %5720 }
0x106d   :  { %v5723_v6 = vpop.eup %5722  ;;  %v4174_v61 = vadd.f32 1.0, %v5721_v4 }
0x106f   :  { %5728 = vrcp.f32 %v4174_v61 }
0x1071   :  { %v5725_v7 = vpop.eup %5724 }
0x1072   :  { %v5727_v13 = vpop.eup %5726  ;;  %v4179_v14 = vmul.f32 %v5725_v7, %v5723_v6 }
0x1073   :  { %v4178_v62 = vmul.f32 %v5727_v13, %v6698_v24 }
0x1075   :  { %v4180_v63 = vadd.f32 %v4179_v14, %v4178_v62 }
0x1077   :  { %5730 = vtanh.f32 %v4180_v63  ;;  %4571 = vst.msk [vmem:[%s6764_s15 + $0x8] sm:$0xff] %vm169_vm2, %v4180_v63 }
0x1079   :  { %v5729_v0 = vpop.eup %5728 }
0x1081   :  { %v5731_v1 = vpop.eup %5730 }
0x1082   :  { %v4182_v44 = vmul.f32 %v5731_v1, %v5729_v0 }
0x1084   :  { %4570 = vst.msk [vmem:[%s6765_s14 + $0x8] sm:$0xff] %vm169_vm2, %v4182_v44  ;;  %v4187_v2 = vpack.c.bf16 %v4182_v44, %v4182_v44 }
0x1086   :  { %5427 = vmatmul.mubr.msk.bf16.vlgmr.msra.gmra.mrb[160].mxu0 %vm169_vm2, %v4187_v2 }
0x1159   :  { %v4248_v59 = vpop.f32.mrb[160].mxu0 }
0x115a   :  { %v4249_v19 = vadd.f32 %v4572_v57, %v4248_v59  ;;  %v5428_v20 = vpop.f32.mrb[161].mxu0 }
0x115b   :  { %v4251_v21 = vpop.f32.mrb[162].mxu0 }
0x115c   :  { %v4254_v22 = vmax.f32 %v4249_v19, 0.0  ;;  %v5429_v23 = vpop.f32.mrb[163].mxu0 }
0x115e   :  { %v4255_v15 = vpack.c.bf16 %v4254_v22, %v4254_v22 }
0x1160   :  { %5435 = vmatmul.mubr.msk.bf16.vlgmr.msra.gmra.mrb[160].mxu1 %vm169_vm2, %v4255_v15 }
0x1233   :  { %v4316_v16 = vpop.f32.mrb[160].mxu1 }
0x1234   :  { %v4317_v17 = vadd.f32 %v4576_v8, %v4316_v16  ;;  %v5436_v18 = vpop.f32.mrb[161].mxu1 }
0x1235   :  { %v4319_v24 = vpop.f32.mrb[162].mxu1 }
0x1236   :  { %4323 = vst.msk [vmem:[%s6770_s13] sm:$0xff] %vm4322_vm3, %v4317_v17  ;;  %v5437_v25 = vpop.f32.mrb[163].mxu1 }

</bundles_post_ra>
